<compile_context>
chip_gen: v7x
topology: tpu7x:2x2x1
jax: 0.10.0
libtpu: 0.0.40
codegen_flags: <defaults>
</compile_context>

<pallas_src>
import functools
import math

import jax
import jax.numpy as jnp
from jax.experimental import pallas as pl
from jax.experimental.pallas import tpu as pltpu

EPS = 1e-5
LEAKY_SLOPE = 0.2   # TODO(synk): get_nonlinearity_layer('LeakyReLU') assumed to use slope 0.2.

_W_KEYS = ["wq", "bq", "wk", "bk", "wv", "bv", "wo", "bo", "w1", "b1", "w2", "b2"]


def _instance_norm(x):
    # InstanceNorm1d: normalize over L (axis=1) per (batch, channel); affine=False.
    mean = jnp.mean(x, axis=1, keepdims=True)
    var = jnp.mean((x - mean) ** 2, axis=1, keepdims=True)
    return (x - mean) * jax.lax.rsqrt(var + EPS)


def ttbs_fused_kernel(tgt_ref, mem_ref, val_ref, pos_ref,
                      wq_ref, bq_ref, wk_ref, bk_ref, wv_ref, bv_ref,
                      wo_ref, bo_ref, w1_ref, b1_ref, w2_ref, b2_ref,
                      out_ref, attw_first_ref, attw_last_ref,
                      x_scr, *, nhead, num_layers):
    f32 = jnp.float32
    cdt = wq_ref.dtype                          # bf16 matmul-operand dtype
    layer = pl.program_id(1)

    # Initialize the layer-carry from tgt at the first layer of each batch block.
    @pl.when(layer == 0)
    def _():
        x_scr[...] = tgt_ref[...].astype(f32)

    x = x_scr[...]                              # (B, L, E) f32 carry
    pos = pos_ref[...].astype(f32)
    B, L, E = x.shape
    hd = E // nhead
    scale = 1.0 / math.sqrt(hd)

    # Projections as flat (B*L, E) @ (E, E) matmuls (bigger MXU tiles than batched dots).
    q_in = (x + pos).astype(cdt).reshape(B * L, E)
    k_in = (mem_ref[...].astype(f32) + pos).astype(cdt).reshape(B * L, E)
    v_in = val_ref[...].astype(cdt).reshape(B * L, E)

    q = ((jnp.dot(q_in, wq_ref[...], preferred_element_type=f32) + bq_ref[...])
         * scale).astype(cdt).reshape(B, L, E)
    k = (jnp.dot(k_in, wk_ref[...], preferred_element_type=f32)
         + bk_ref[...]).astype(cdt).reshape(B, L, E)
    v = (jnp.dot(v_in, wv_ref[...], preferred_element_type=f32)
         + bv_ref[...]).astype(cdt).reshape(B, L, E)

    heads = []                                  # per-head outputs, lane-aligned (hd=128)
    w_sum = jnp.zeros((B, L, L), f32)           # head-averaged attention weights
    for h in range(nhead):                      # static unroll; hd=128 -> lane slices
        sl = slice(h * hd, (h + 1) * hd)
        s = jnp.einsum('bqd,bkd->bqk', q[:, :, sl], k[:, :, sl],
                       preferred_element_type=f32)                      # (B, L, L) f32
        s = s - jnp.max(s, axis=-1, keepdims=True)
        e = jnp.exp(s)
        denom = jnp.sum(e, axis=-1, keepdims=True)
        p = e * pl.reciprocal(denom, approx=True)      # value path: approx (EUP slot)
        w_sum = w_sum + e * (1.0 / denom)              # user-visible weights: exact
        heads.append(jnp.einsum('bqk,bkd->bqd', p.astype(cdt), v[:, :, sl],
                                preferred_element_type=f32).astype(cdt))
    # Fused out-projection: lane-aligned head concat + one (B*L,E)@(E,E) matmul (K=256).
    heads_cat = jnp.concatenate(heads, axis=-1).reshape(B * L, E)
    attn = jnp.dot(heads_cat, wo_ref[...], preferred_element_type=f32) + bo_ref[...]

    # Residual + InstanceNorm1d (no affine).
    x1 = _instance_norm(x + attn.reshape(B, L, E))

    # Feed-forward: linear2(LeakyReLU(linear1(x))), bf16 operands / f32 accumulate.
    h1 = jnp.dot(x1.reshape(B * L, E).astype(cdt), w1_ref[...],
                 preferred_element_type=f32) + b1_ref[...]
    h1 = jnp.where(h1 > 0, h1, LEAKY_SLOPE * h1)
    ff = jnp.dot(h1.astype(cdt), w2_ref[...],
                 preferred_element_type=f32) + b2_ref[...]

    x2 = _instance_norm(x1 + ff.reshape(B, L, E))

    x_scr[...] = x2                              # carry to next layer
    out_ref[...] = x2.astype(out_ref.dtype)      # last layer's value is what gets flushed

    w_avg = w_sum * (1.0 / nhead)

    @pl.when(layer == 0)
    def _():
        attw_first_ref[...] = w_avg.astype(attw_first_ref.dtype)

    @pl.when(layer == num_layers - 1)
    def _():
        attw_last_ref[...] = w_avg.astype(attw_last_ref.dtype)


# --------------------------------- wrapper ---------------------------------
def _stack_params(layer_params, compute_dtype=jnp.bfloat16):
    """Stack per-layer params on a leading layer axis.
    Weight matrices -> bf16 (halves weight DMA bytes); biases -> (1, d) f32."""
    stacked = {}
    for key in _W_KEYS:
        arrs = [jnp.asarray(p[key], jnp.float32) for p in layer_params]
        if arrs[0].ndim == 2:
            stacked[key] = jnp.stack([a.astype(compute_dtype) for a in arrs])
        else:
            stacked[key] = jnp.stack([a.reshape(1, -1) for a in arrs])
    return stacked


def _pick_b_block(N):
    """Generation-aware batch blocking: single grid step on 1-TC chips (v5e/v6e),
    two batch blocks on chips with 2 TensorCores (v7x / megacore)."""
    try:
        kind = jax.devices()[0].device_kind.lower()
    except Exception:
        kind = ""
    two_tc = any(t in kind for t in ("v7", "v5p", "v4"))
    if two_tc and N >= 2 and N % 2 == 0:
        return N // 2
    return N


def _vmem_limit(b_block, L, E, w_layer_bytes):
    try:
        phys = pltpu.get_tpu_info().vmem_capacity_bytes
    except Exception:
        phys = 64 << 20                         # v7x per-TC VMEM as the conservative floor
    blk_act = b_block * L * E * 4               # one f32 activation block
    needed = (4 * 2 * blk_act                   # tgt/mem/val/pos (double-buffered)
              + 2 * blk_act                     # out (double-buffered)
              + 2 * 2 * b_block * L * L * 4     # attw_first / attw_last
              + 2 * w_layer_bytes               # two layers' weights (pipeline overlap)
              + blk_act                         # x carry scratch
              + (16 << 20))                     # compiler scratch / temporaries headroom
    cap = max(int(phys * 3 // 4), 32 << 20)
    return int(min(max(needed, 32 << 20), cap))


def ttbs_forward(tgt, memory, val, layer_params, pos=None, *, nhead, b_block=None):
    """TTBs forward. tgt/memory/val[/pos]: (L, N, E) f32.
    Returns (output (L, N, E), attn_w_first (N, L, L), attn_w_last (N, L, L))."""
    L, N, E = tgt.shape
    num_layers = len(layer_params)

    x = jnp.transpose(tgt, (1, 0, 2))
    m = jnp.transpose(memory, (1, 0, 2))
    v = jnp.transpose(val, (1, 0, 2))
    p_ = jnp.transpose(pos, (1, 0, 2)) if pos is not None else jnp.zeros_like(x)

    if b_block is None:
        b_block = _pick_b_block(N)
    n_pad = -N % b_block
    if n_pad:
        padf = lambda a: jnp.pad(a, ((0, n_pad), (0, 0), (0, 0)))
        x, m, v, p_ = padf(x), padf(m), padf(v), padf(p_)
    Np = N + n_pad

    sp = _stack_params(layer_params)
    weight_args = [sp[k] for k in _W_KEYS]
    dff = sp["w1"].shape[-1]

    def data_spec(last):
        # Constant block index along the layer axis -> DMA'd once per batch block.
        return pl.BlockSpec((b_block, L, last), lambda n, l: (n, 0, 0))

    def wspec(arr):
        # Per-layer weight slab, streamed (double-buffered) along the layer grid axis.
        _, d0, d1 = arr.shape
        return pl.BlockSpec((None, d0, d1), lambda n, l: (l, 0, 0))

    in_specs = [data_spec(E)] * 4 + [wspec(a) for a in weight_args]

    w_layer_bytes = sum(math.prod(a.shape[1:]) * a.dtype.itemsize for a in weight_args)
    io_bytes = (4 * Np * L * E * 4 + Np * L * E * 4 + 2 * Np * L * L * 4
                + num_layers * w_layer_bytes)
    flops = num_layers * (2 * Np * L * E * E * 4      # q/k/v/out projections
                          + 2 * Np * L * L * E * 2    # scores + prob@V
                          + 2 * Np * L * E * dff * 2)  # FFN
    cost = pl.CostEstimate(flops=flops,
                           transcendentals=num_layers * Np * nhead * L * L,
                           bytes_accessed=io_bytes)

    out, w_first, w_last = pl.pallas_call(
        functools.partial(ttbs_fused_kernel, nhead=nhead, num_layers=num_layers),
        out_shape=(jax.ShapeDtypeStruct((Np, L, E), jnp.float32),
                   jax.ShapeDtypeStruct((Np, L, L), jnp.float32),
                   jax.ShapeDtypeStruct((Np, L, L), jnp.float32)),
        grid_spec=pltpu.PrefetchScalarGridSpec(
            num_scalar_prefetch=0,
            grid=(Np // b_block, num_layers),          # layer axis innermost (carry)
            in_specs=in_specs,
            out_specs=(data_spec(E), data_spec(L), data_spec(L)),
            scratch_shapes=[pltpu.VMEM((b_block, L, E), jnp.float32)]),
        compiler_params=pltpu.CompilerParams(
            dimension_semantics=("parallel", "arbitrary"),
            vmem_limit_bytes=_vmem_limit(b_block, L, E, w_layer_bytes)),
        cost_estimate=cost,
    )(x, m, v, p_, *weight_args)

    out = jnp.transpose(out[:N], (1, 0, 2))
    # TODO(synk): TTBs(norm=...) final norm on output.permute(1,2,0) not implemented (norm=None default).
    return out, w_first[:N], w_last[:N]


# ----------------------- pure-JAX reference (same precision policy) -----------------------
def _prep_params(p, compute_dtype=jnp.bfloat16):
    def w(k): return jnp.asarray(p[k], jnp.float32).astype(compute_dtype)
    def b(k): return jnp.asarray(p[k], jnp.float32).reshape(1, -1)
    return {"wq": w("wq"), "bq": b("bq"), "wk": w("wk"), "bk": b("bk"),
            "wv": w("wv"), "bv": b("bv"), "wo": w("wo"), "bo": b("bo"),
            "w1": w("w1"), "b1": b("b1"), "w2": w("w2"), "b2": b("b2")}


def _layer_reference(x, m, v, pos, p, *, nhead):
    f32 = jnp.float32
    cdt = p["wq"].dtype
    N, L, E = x.shape
    hd = E // nhead
    scale = 1.0 / math.sqrt(hd)

    def proj(inp, w, b):
        return jnp.einsum("nle,ef->nlf", inp.astype(cdt), w, preferred_element_type=f32) + b

    q = (proj(x + pos, p["wq"], p["bq"]) * scale).astype(cdt)
    k = proj(m + pos, p["wk"], p["bk"]).astype(cdt)
    vv = proj(v, p["wv"], p["bv"]).astype(cdt)

    attn = jnp.zeros((N, L, E), f32)
    w_sum = jnp.zeros((N, L, L), f32)
    for h in range(nhead):
        sl = slice(h * hd, (h + 1) * hd)
        s = jnp.einsum("nqd,nkd->nqk", q[..., sl], k[..., sl], preferred_element_type=f32)
        pr = jax.nn.softmax(s, axis=-1)
        w_sum = w_sum + pr
        ho = jnp.einsum("nqk,nkd->nqd", pr.astype(cdt), vv[..., sl], preferred_element_type=f32)
        attn = attn + jnp.einsum("nqd,de->nqe", ho.astype(cdt), p["wo"][sl, :],
                                 preferred_element_type=f32)
    attn = attn + p["bo"]

    y = _instance_norm(x + attn)
    h1 = jnp.einsum("nle,ef->nlf", y.astype(cdt), p["w1"], preferred_element_type=f32) + p["b1"]
    h1 = jnp.where(h1 > 0, h1, LEAKY_SLOPE * h1)
    ff = jnp.einsum("nlf,fe->nle", h1.astype(cdt), p["w2"], preferred_element_type=f32) + p["b2"]
    return _instance_norm(y + ff), w_sum / nhead


def ttbs_reference(tgt, memory, val, layer_params, pos=None, *, nhead):
    x = jnp.transpose(tgt, (1, 0, 2))
    m = jnp.transpose(memory, (1, 0, 2))
    v = jnp.transpose(val, (1, 0, 2))
    p_ = jnp.transpose(pos, (1, 0, 2)) if pos is not None else jnp.zeros_like(x)
    weights = []
    for lp in layer_params:
        x, w = _layer_reference(x, m, v, p_, _prep_params(lp), nhead=nhead)
        weights.append(w)
    return jnp.transpose(x, (1, 0, 2)), weights[0], weights[-1]


def init_params(key, d_model, nhead, dim_feedforward):
    """Weights stored as (in, out) = torch_weight.T.  For nn.MultiheadAttention the packed
    in_proj_weight rows are ordered (q, k, v): wq = in_proj_weight[:E].T, wk = [E:2E].T, ..."""
    E, F = d_model, dim_feedforward
    ks = jax.random.split(key, 12)
    u = lambda k, shp, s: jax.random.uniform(k, shp, jnp.float32, -s, s)
    sa, sf = 1.0 / math.sqrt(E), 1.0 / math.sqrt(F)
    return {
        "wq": u(ks[0], (E, E), sa), "bq": u(ks[1], (E,), sa),
        "wk": u(ks[2], (E, E), sa), "bk": u(ks[3], (E,), sa),
        "wv": u(ks[4], (E, E), sa), "bv": u(ks[5], (E,), sa),
        "wo": u(ks[6], (E, E), sa), "bo": u(ks[7], (E,), sa),
        "w1": u(ks[8], (E, F), sa), "b1": u(ks[9], (F,), sa),
        "w2": u(ks[10], (F, E), sf), "b2": u(ks[11], (E,), sf),
    }


if __name__ == "__main__":
    L, N, E = 16, 4, 256      # seq (mult of 8), batch, d_model (mult of 128 -> lane-dense)
    NHEAD = 2                 # head_dim = 128 -> lane-register-aligned head slices
    DFF = 512                 # mult of 128
    NUM_TTBS = 2

    key = jax.random.PRNGKey(0)
    k_t, k_m, k_v, k_p, k_par = jax.random.split(key, 5)
    tgt = jax.random.normal(k_t, (L, N, E), jnp.float32)
    memory = jax.random.normal(k_m, (L, N, E), jnp.float32)
    val = jax.random.normal(k_v, (L, N, E), jnp.float32)
    pos = jax.random.normal(k_p, (L, N, E), jnp.float32)
    # _get_clones deep-copies one initialized layer -> all layers share identical weights.
    layer_params = [init_params(k_par, E, NHEAD, DFF)] * NUM_TTBS

    # jit the whole forward so transposes / padding / weight casts fuse with the call.
    ttbs_fn = jax.jit(functools.partial(ttbs_forward, nhead=NHEAD))
    out, w_first, w_last = ttbs_fn(tgt, memory, val, layer_params, pos)
    out, w_first, w_last = jax.block_until_ready((out, w_first, w_last))

    assert out.shape == (L, N, E) and out.dtype == jnp.float32
    assert w_first.shape == (N, L, L) and w_last.shape == (N, L, L)

    ref_out, ref_wf, ref_wl = ttbs_reference(tgt, memory, val, layer_params,
                                             pos=pos, nhead=NHEAD)
    err_out = float(jnp.max(jnp.abs(out - ref_out)))
    err_w = max(float(jnp.max(jnp.abs(w_first - ref_wf))),
                float(jnp.max(jnp.abs(w_last - ref_wl))))
    assert err_out < 1e-1 and err_w < 5e-2, (err_out, err_w)
    print("KERNEL_OK")
</pallas_src>

<mosaic_0001>
module attributes {stable_mosaic.version = 11 : i64} {
  func.func @ttbs_fused_kernel(%arg0: i32, %arg1: i32, %arg2: memref<4x16x256xf32, #tpu.memory_space<vmem>>, %arg3: memref<4x16x256xf32, #tpu.memory_space<vmem>>, %arg4: memref<4x16x256xf32, #tpu.memory_space<vmem>>, %arg5: memref<4x16x256xf32, #tpu.memory_space<vmem>>, %arg6: memref<1x256x256xbf16, #tpu.memory_space<vmem>>, %arg7: memref<1x1x256xf32, #tpu.memory_space<vmem>>, %arg8: memref<1x256x256xbf16, #tpu.memory_space<vmem>>, %arg9: memref<1x1x256xf32, #tpu.memory_space<vmem>>, %arg10: memref<1x256x256xbf16, #tpu.memory_space<vmem>>, %arg11: memref<1x1x256xf32, #tpu.memory_space<vmem>>, %arg12: memref<1x256x256xbf16, #tpu.memory_space<vmem>>, %arg13: memref<1x1x256xf32, #tpu.memory_space<vmem>>, %arg14: memref<1x256x512xbf16, #tpu.memory_space<vmem>>, %arg15: memref<1x1x512xf32, #tpu.memory_space<vmem>>, %arg16: memref<1x512x256xbf16, #tpu.memory_space<vmem>>, %arg17: memref<1x1x256xf32, #tpu.memory_space<vmem>>, %arg18: memref<4x16x256xf32, #tpu.memory_space<vmem>>, %arg19: memref<4x16x16xf32, #tpu.memory_space<vmem>>, %arg20: memref<4x16x16xf32, #tpu.memory_space<vmem>>, %arg21: memref<4x16x256xf32, #tpu.memory_space<vmem>>) attributes {dimension_semantics = [#tpu.dimension_semantics<parallel>, #tpu.dimension_semantics<arbitrary>], iteration_bounds = array<i64: 1, 2>, scalar_prefetch = 0 : i64, scratch_operands = 1 : i64, tpu.core_type = #tpu.core_type<tc>, window_params = [{transform_indices = @transform_0, window_bounds = array<i64: 4, 16, 256>}, {transform_indices = @transform_1, window_bounds = array<i64: 4, 16, 256>}, {transform_indices = @transform_2, window_bounds = array<i64: 4, 16, 256>}, {transform_indices = @transform_3, window_bounds = array<i64: 4, 16, 256>}, {transform_indices = @transform_4, window_bounds = array<i64: 1, 256, 256>}, {transform_indices = @transform_5, window_bounds = array<i64: 1, 1, 256>}, {transform_indices = @transform_6, window_bounds = array<i64: 1, 256, 256>}, {transform_indices = @transform_7, window_bounds = array<i64: 1, 1, 256>}, {transform_indices = @transform_8, window_bounds = array<i64: 1, 256, 256>}, {transform_indices = @transform_9, window_bounds = array<i64: 1, 1, 256>}, {transform_indices = @transform_10, window_bounds = array<i64: 1, 256, 256>}, {transform_indices = @transform_11, window_bounds = array<i64: 1, 1, 256>}, {transform_indices = @transform_12, window_bounds = array<i64: 1, 256, 512>}, {transform_indices = @transform_13, window_bounds = array<i64: 1, 1, 512>}, {transform_indices = @transform_14, window_bounds = array<i64: 1, 512, 256>}, {transform_indices = @transform_15, window_bounds = array<i64: 1, 1, 256>}, {transform_indices = @transform_16, window_bounds = array<i64: 4, 16, 256>}, {transform_indices = @transform_17, window_bounds = array<i64: 4, 16, 16>}, {transform_indices = @transform_18, window_bounds = array<i64: 4, 16, 16>}]} {
    %c0_i32 = arith.constant 0 : i32
    %0 = arith.cmpi eq, %arg1, %c0_i32 : i32
    %1 = arith.extui %0 : i1 to i32
    %c0_i32_0 = arith.constant 0 : i32
    %2 = arith.cmpi ne, %1, %c0_i32_0 : i32
    scf.if %2 {
      %c0_87 = arith.constant 0 : index
      %c0_88 = arith.constant 0 : index
      %c0_89 = arith.constant 0 : index
      %170 = vector.load %arg2[%c0_87, %c0_88, %c0_89] : memref<4x16x256xf32, #tpu.memory_space<vmem>>, vector<4x16x256xf32>
      %c0_90 = arith.constant 0 : index
      %c0_91 = arith.constant 0 : index
      %c0_92 = arith.constant 0 : index
      %171 = vector.load %arg21[%c0_90, %c0_91, %c0_92] : memref<4x16x256xf32, #tpu.memory_space<vmem>>, vector<4x16x256xf32>
      tpu.vector_store %arg21[%c0_90, %c0_91, %c0_92], %170 {strides = array<i32>} : memref<4x16x256xf32, #tpu.memory_space<vmem>>, vector<4x16x256xf32>,
    } else {
    }
    %c0 = arith.constant 0 : index
    %c0_1 = arith.constant 0 : index
    %c0_2 = arith.constant 0 : index
    %3 = vector.load %arg21[%c0, %c0_1, %c0_2] : memref<4x16x256xf32, #tpu.memory_space<vmem>>, vector<4x16x256xf32>
    %c0_3 = arith.constant 0 : index
    %c0_4 = arith.constant 0 : index
    %c0_5 = arith.constant 0 : index
    %4 = vector.load %arg5[%c0_3, %c0_4, %c0_5] : memref<4x16x256xf32, #tpu.memory_space<vmem>>, vector<4x16x256xf32>
    %5 = arith.addf %3, %4 : vector<4x16x256xf32>
    %6 = arith.truncf %5 : vector<4x16x256xf32> to vector<4x16x256xbf16>
    %7 = vector.shape_cast %6 : vector<4x16x256xbf16> to vector<64x256xbf16>
    %c0_6 = arith.constant 0 : index
    %c0_7 = arith.constant 0 : index
    %c0_8 = arith.constant 0 : index
    %8 = vector.load %arg3[%c0_6, %c0_7, %c0_8] : memref<4x16x256xf32, #tpu.memory_space<vmem>>, vector<4x16x256xf32>
    %9 = arith.addf %8, %4 : vector<4x16x256xf32>
    %10 = arith.truncf %9 : vector<4x16x256xf32> to vector<4x16x256xbf16>
    %11 = vector.shape_cast %10 : vector<4x16x256xbf16> to vector<64x256xbf16>
    %c0_9 = arith.constant 0 : index
    %c0_10 = arith.constant 0 : index
    %c0_11 = arith.constant 0 : index
    %12 = vector.load %arg4[%c0_9, %c0_10, %c0_11] : memref<4x16x256xf32, #tpu.memory_space<vmem>>, vector<4x16x256xf32>
    %13 = arith.truncf %12 : vector<4x16x256xf32> to vector<4x16x256xbf16>
    %14 = vector.shape_cast %13 : vector<4x16x256xbf16> to vector<64x256xbf16>
    %c0_12 = arith.constant 0 : index
    %c0_13 = arith.constant 0 : index
    %c0_14 = arith.constant 0 : index
    %15 = vector.load %arg6[%c0_12, %c0_13, %c0_14] : memref<1x256x256xbf16, #tpu.memory_space<vmem>>, vector<1x256x256xbf16>
    %16 = vector.shape_cast %15 : vector<1x256x256xbf16> to vector<256x256xbf16>
    %cst = arith.constant dense<0.000000e+00> : vector<64x256xf32>
    %17 = tpu.matmul %7, %16, %cst {dimension_numbers = #tpu.dot_dimension_numbers<[1], [0], [0], [1], [0, 0, 1, 1], [], []>} : vector<64x256xbf16>, vector<256x256xbf16>, vector<64x256xf32> -> vector<64x256xf32>
    %c0_15 = arith.constant 0 : index
    %c0_16 = arith.constant 0 : index
    %c0_17 = arith.constant 0 : index
    %18 = vector.load %arg7[%c0_15, %c0_16, %c0_17] : memref<1x1x256xf32, #tpu.memory_space<vmem>>, vector<1x1x256xf32>
    %19 = vector.shape_cast %18 : vector<1x1x256xf32> to vector<1x256xf32>
    %20 = vector.broadcast %19 : vector<1x256xf32> to vector<64x256xf32>
    %21 = arith.addf %17, %20 : vector<64x256xf32>
    %cst_18 = arith.constant 0.0883883461 : f32
    %22 = vector.broadcast %cst_18 : f32 to vector<64x256xf32>
    %23 = arith.mulf %21, %22 : vector<64x256xf32>
    %24 = arith.truncf %23 : vector<64x256xf32> to vector<64x256xbf16>
    %25 = vector.shape_cast %24 : vector<64x256xbf16> to vector<4x16x256xbf16>
    %c0_19 = arith.constant 0 : index
    %c0_20 = arith.constant 0 : index
    %c0_21 = arith.constant 0 : index
    %26 = vector.load %arg8[%c0_19, %c0_20, %c0_21] : memref<1x256x256xbf16, #tpu.memory_space<vmem>>, vector<1x256x256xbf16>
    %27 = vector.shape_cast %26 : vector<1x256x256xbf16> to vector<256x256xbf16>
    %cst_22 = arith.constant dense<0.000000e+00> : vector<64x256xf32>
    %28 = tpu.matmul %11, %27, %cst_22 {dimension_numbers = #tpu.dot_dimension_numbers<[1], [0], [0], [1], [0, 0, 1, 1], [], []>} : vector<64x256xbf16>, vector<256x256xbf16>, vector<64x256xf32> -> vector<64x256xf32>
    %c0_23 = arith.constant 0 : index
    %c0_24 = arith.constant 0 : index
    %c0_25 = arith.constant 0 : index
    %29 = vector.load %arg9[%c0_23, %c0_24, %c0_25] : memref<1x1x256xf32, #tpu.memory_space<vmem>>, vector<1x1x256xf32>
    %30 = vector.shape_cast %29 : vector<1x1x256xf32> to vector<1x256xf32>
    %31 = vector.broadcast %30 : vector<1x256xf32> to vector<64x256xf32>
    %32 = arith.addf %28, %31 : vector<64x256xf32>
    %33 = arith.truncf %32 : vector<64x256xf32> to vector<64x256xbf16>
    %34 = vector.shape_cast %33 : vector<64x256xbf16> to vector<4x16x256xbf16>
    %c0_26 = arith.constant 0 : index
    %c0_27 = arith.constant 0 : index
    %c0_28 = arith.constant 0 : index
    %35 = vector.load %arg10[%c0_26, %c0_27, %c0_28] : memref<1x256x256xbf16, #tpu.memory_space<vmem>>, vector<1x256x256xbf16>
    %36 = vector.shape_cast %35 : vector<1x256x256xbf16> to vector<256x256xbf16>
    %cst_29 = arith.constant dense<0.000000e+00> : vector<64x256xf32>
    %37 = tpu.matmul %14, %36, %cst_29 {dimension_numbers = #tpu.dot_dimension_numbers<[1], [0], [0], [1], [0, 0, 1, 1], [], []>} : vector<64x256xbf16>, vector<256x256xbf16>, vector<64x256xf32> -> vector<64x256xf32>
    %c0_30 = arith.constant 0 : index
    %c0_31 = arith.constant 0 : index
    %c0_32 = arith.constant 0 : index
    %38 = vector.load %arg11[%c0_30, %c0_31, %c0_32] : memref<1x1x256xf32, #tpu.memory_space<vmem>>, vector<1x1x256xf32>
    %39 = vector.shape_cast %38 : vector<1x1x256xf32> to vector<1x256xf32>
    %40 = vector.broadcast %39 : vector<1x256xf32> to vector<64x256xf32>
    %41 = arith.addf %37, %40 : vector<64x256xf32>
    %42 = arith.truncf %41 : vector<64x256xf32> to vector<64x256xbf16>
    %43 = vector.shape_cast %42 : vector<64x256xbf16> to vector<4x16x256xbf16>
    %cst_33 = arith.constant 0.000000e+00 : f32
    %44 = vector.broadcast %cst_33 : f32 to vector<4x16x16xf32>
    %45 = vector.extract_strided_slice %25 {offsets = [0, 0, 0], sizes = [4, 16, 128], strides = [1, 1, 1]} : vector<4x16x256xbf16> to vector<4x16x128xbf16>
    %46 = vector.extract_strided_slice %34 {offsets = [0, 0, 0], sizes = [4, 16, 128], strides = [1, 1, 1]} : vector<4x16x256xbf16> to vector<4x16x128xbf16>
    "tpu.trace_start"() <{level = 10 : i32, message = "bqd,bkd->bqk"}> : () -> ()
    %cst_34 = arith.constant dense<0.000000e+00> : vector<4x16x16xf32>
    %47 = tpu.matmul %45, %46, %cst_34 {dimension_numbers = #tpu.dot_dimension_numbers<[2], [2], [1], [1], [0, 0, 0, 1, 1, 1], [0], [0]>} : vector<4x16x128xbf16>, vector<4x16x128xbf16>, vector<4x16x16xf32> -> vector<4x16x16xf32>
    "tpu.trace_stop"() : () -> ()
    %cst_35 = arith.constant dense<0xFF800000> : vector<4x16xf32>
    %48 = vector.multi_reduction <maximumf>, %47, %cst_35 [2] : vector<4x16x16xf32> to vector<4x16xf32>
    %49 = vector.shape_cast %48 : vector<4x16xf32> to vector<4x16x1xf32>
    %50 = vector.broadcast %49 : vector<4x16x1xf32> to vector<4x16x16xf32>
    %51 = arith.subf %47, %50 : vector<4x16x16xf32>
    %52 = math.exp %51 : vector<4x16x16xf32>
    %cst_36 = arith.constant dense<0.000000e+00> : vector<4x16xf32>
    %53 = vector.multi_reduction <add>, %52, %cst_36 [2] : vector<4x16x16xf32> to vector<4x16xf32>
    %54 = vector.shape_cast %53 : vector<4x16xf32> to vector<4x16x1xf32>
    %55 = tpu.reciprocal %54 {approx = true} : vector<4x16x1xf32> -> vector<4x16x1xf32>
    %56 = vector.broadcast %55 : vector<4x16x1xf32> to vector<4x16x16xf32>
    %57 = arith.mulf %52, %56 : vector<4x16x16xf32>
    %cst_37 = arith.constant 1.000000e+00 : f32
    %58 = vector.broadcast %cst_37 : f32 to vector<4x16x1xf32>
    %59 = arith.divf %58, %54 : vector<4x16x1xf32>
    %60 = vector.broadcast %59 : vector<4x16x1xf32> to vector<4x16x16xf32>
    %61 = arith.mulf %52, %60 : vector<4x16x16xf32>
    %62 = arith.addf %44, %61 : vector<4x16x16xf32>
    %63 = arith.truncf %57 : vector<4x16x16xf32> to vector<4x16x16xbf16>
    %64 = vector.extract_strided_slice %43 {offsets = [0, 0, 0], sizes = [4, 16, 128], strides = [1, 1, 1]} : vector<4x16x256xbf16> to vector<4x16x128xbf16>
    "tpu.trace_start"() <{level = 10 : i32, message = "bqk,bkd->bqd"}> : () -> ()
    %cst_38 = arith.constant dense<0.000000e+00> : vector<4x16x128xf32>
    %65 = tpu.matmul %63, %64, %cst_38 {dimension_numbers = #tpu.dot_dimension_numbers<[2], [1], [1], [2], [0, 0, 0, 1, 1, 2], [0], [0]>} : vector<4x16x16xbf16>, vector<4x16x128xbf16>, vector<4x16x128xf32> -> vector<4x16x128xf32>
    "tpu.trace_stop"() : () -> ()
    %66 = arith.truncf %65 : vector<4x16x128xf32> to vector<4x16x128xbf16>
    %67 = vector.extract_strided_slice %25 {offsets = [0, 0, 128], sizes = [4, 16, 128], strides = [1, 1, 1]} : vector<4x16x256xbf16> to vector<4x16x128xbf16>
    %68 = vector.extract_strided_slice %34 {offsets = [0, 0, 128], sizes = [4, 16, 128], strides = [1, 1, 1]} : vector<4x16x256xbf16> to vector<4x16x128xbf16>
    "tpu.trace_start"() <{level = 10 : i32, message = "bqd,bkd->bqk"}> : () -> ()
    %cst_39 = arith.constant dense<0.000000e+00> : vector<4x16x16xf32>
    %69 = tpu.matmul %67, %68, %cst_39 {dimension_numbers = #tpu.dot_dimension_numbers<[2], [2], [1], [1], [0, 0, 0, 1, 1, 1], [0], [0]>} : vector<4x16x128xbf16>, vector<4x16x128xbf16>, vector<4x16x16xf32> -> vector<4x16x16xf32>
    "tpu.trace_stop"() : () -> ()
    %cst_40 = arith.constant dense<0xFF800000> : vector<4x16xf32>
    %70 = vector.multi_reduction <maximumf>, %69, %cst_40 [2] : vector<4x16x16xf32> to vector<4x16xf32>
    %71 = vector.shape_cast %70 : vector<4x16xf32> to vector<4x16x1xf32>
    %72 = vector.broadcast %71 : vector<4x16x1xf32> to vector<4x16x16xf32>
    %73 = arith.subf %69, %72 : vector<4x16x16xf32>
    %74 = math.exp %73 : vector<4x16x16xf32>
    %cst_41 = arith.constant dense<0.000000e+00> : vector<4x16xf32>
    %75 = vector.multi_reduction <add>, %74, %cst_41 [2] : vector<4x16x16xf32> to vector<4x16xf32>
    %76 = vector.shape_cast %75 : vector<4x16xf32> to vector<4x16x1xf32>
    %77 = tpu.reciprocal %76 {approx = true} : vector<4x16x1xf32> -> vector<4x16x1xf32>
    %78 = vector.broadcast %77 : vector<4x16x1xf32> to vector<4x16x16xf32>
    %79 = arith.mulf %74, %78 : vector<4x16x16xf32>
    %cst_42 = arith.constant 1.000000e+00 : f32
    %80 = vector.broadcast %cst_42 : f32 to vector<4x16x1xf32>
    %81 = arith.divf %80, %76 : vector<4x16x1xf32>
    %82 = vector.broadcast %81 : vector<4x16x1xf32> to vector<4x16x16xf32>
    %83 = arith.mulf %74, %82 : vector<4x16x16xf32>
    %84 = arith.addf %62, %83 : vector<4x16x16xf32>
    %85 = arith.truncf %79 : vector<4x16x16xf32> to vector<4x16x16xbf16>
    %86 = vector.extract_strided_slice %43 {offsets = [0, 0, 128], sizes = [4, 16, 128], strides = [1, 1, 1]} : vector<4x16x256xbf16> to vector<4x16x128xbf16>
    "tpu.trace_start"() <{level = 10 : i32, message = "bqk,bkd->bqd"}> : () -> ()
    %cst_43 = arith.constant dense<0.000000e+00> : vector<4x16x128xf32>
    %87 = tpu.matmul %85, %86, %cst_43 {dimension_numbers = #tpu.dot_dimension_numbers<[2], [1], [1], [2], [0, 0, 0, 1, 1, 2], [0], [0]>} : vector<4x16x16xbf16>, vector<4x16x128xbf16>, vector<4x16x128xf32> -> vector<4x16x128xf32>
    "tpu.trace_stop"() : () -> ()
    %88 = arith.truncf %87 : vector<4x16x128xf32> to vector<4x16x128xbf16>
    %89 = tpu.concatenate %66, %88 in 2 : vector<4x16x128xbf16>, vector<4x16x128xbf16> -> vector<4x16x256xbf16>
    %90 = vector.shape_cast %89 : vector<4x16x256xbf16> to vector<64x256xbf16>
    %c0_44 = arith.constant 0 : index
    %c0_45 = arith.constant 0 : index
    %c0_46 = arith.constant 0 : index
    %91 = vector.load %arg12[%c0_44, %c0_45, %c0_46] : memref<1x256x256xbf16, #tpu.memory_space<vmem>>, vector<1x256x256xbf16>
    %92 = vector.shape_cast %91 : vector<1x256x256xbf16> to vector<256x256xbf16>
    %cst_47 = arith.constant dense<0.000000e+00> : vector<64x256xf32>
    %93 = tpu.matmul %90, %92, %cst_47 {dimension_numbers = #tpu.dot_dimension_numbers<[1], [0], [0], [1], [0, 0, 1, 1], [], []>} : vector<64x256xbf16>, vector<256x256xbf16>, vector<64x256xf32> -> vector<64x256xf32>
    %c0_48 = arith.constant 0 : index
    %c0_49 = arith.constant 0 : index
    %c0_50 = arith.constant 0 : index
    %94 = vector.load %arg13[%c0_48, %c0_49, %c0_50] : memref<1x1x256xf32, #tpu.memory_space<vmem>>, vector<1x1x256xf32>
    %95 = vector.shape_cast %94 : vector<1x1x256xf32> to vector<1x256xf32>
    %96 = vector.broadcast %95 : vector<1x256xf32> to vector<64x256xf32>
    %97 = arith.addf %93, %96 : vector<64x256xf32>
    %98 = vector.shape_cast %97 : vector<64x256xf32> to vector<4x16x256xf32>
    %99 = arith.addf %3, %98 : vector<4x16x256xf32>
    %cst_51 = arith.constant dense<0.000000e+00> : vector<4x256xf32>
    %100 = vector.multi_reduction <add>, %99, %cst_51 [1] : vector<4x16x256xf32> to vector<4x256xf32>
    %101 = vector.shape_cast %100 : vector<4x256xf32> to vector<4x1x256xf32>
    %cst_52 = arith.constant 1.600000e+01 : f32
    %102 = vector.broadcast %cst_52 : f32 to vector<4x1x256xf32>
    %103 = arith.divf %101, %102 : vector<4x1x256xf32>
    %104 = vector.broadcast %103 : vector<4x1x256xf32> to vector<4x16x256xf32>
    %105 = arith.subf %99, %104 : vector<4x16x256xf32>
    %106 = arith.mulf %105, %105 : vector<4x16x256xf32>
    %cst_53 = arith.constant dense<0.000000e+00> : vector<4x256xf32>
    %107 = vector.multi_reduction <add>, %106, %cst_53 [1] : vector<4x16x256xf32> to vector<4x256xf32>
    %108 = vector.shape_cast %107 : vector<4x256xf32> to vector<4x1x256xf32>
    %cst_54 = arith.constant 1.600000e+01 : f32
    %109 = vector.broadcast %cst_54 : f32 to vector<4x1x256xf32>
    %110 = arith.divf %108, %109 : vector<4x1x256xf32>
    %111 = vector.broadcast %103 : vector<4x1x256xf32> to vector<4x16x256xf32>
    %112 = arith.subf %99, %111 : vector<4x16x256xf32>
    %cst_55 = arith.constant 9.99999974E-6 : f32
    %113 = vector.broadcast %cst_55 : f32 to vector<4x1x256xf32>
    %114 = arith.addf %110, %113 : vector<4x1x256xf32>
    %115 = math.rsqrt %114 : vector<4x1x256xf32>
    %116 = vector.broadcast %115 : vector<4x1x256xf32> to vector<4x16x256xf32>
    %117 = arith.mulf %112, %116 : vector<4x16x256xf32>
    %118 = vector.shape_cast %117 : vector<4x16x256xf32> to vector<64x256xf32>
    %119 = arith.truncf %118 : vector<64x256xf32> to vector<64x256xbf16>
    %c0_56 = arith.constant 0 : index
    %c0_57 = arith.constant 0 : index
    %c0_58 = arith.constant 0 : index
    %120 = vector.load %arg14[%c0_56, %c0_57, %c0_58] : memref<1x256x512xbf16, #tpu.memory_space<vmem>>, vector<1x256x512xbf16>
    %121 = vector.shape_cast %120 : vector<1x256x512xbf16> to vector<256x512xbf16>
    %cst_59 = arith.constant dense<0.000000e+00> : vector<64x512xf32>
    %122 = tpu.matmul %119, %121, %cst_59 {dimension_numbers = #tpu.dot_dimension_numbers<[1], [0], [0], [1], [0, 0, 1, 1], [], []>} : vector<64x256xbf16>, vector<256x512xbf16>, vector<64x512xf32> -> vector<64x512xf32>
    %c0_60 = arith.constant 0 : index
    %c0_61 = arith.constant 0 : index
    %c0_62 = arith.constant 0 : index
    %123 = vector.load %arg15[%c0_60, %c0_61, %c0_62] : memref<1x1x512xf32, #tpu.memory_space<vmem>>, vector<1x1x512xf32>
    %124 = vector.shape_cast %123 : vector<1x1x512xf32> to vector<1x512xf32>
    %125 = vector.broadcast %124 : vector<1x512xf32> to vector<64x512xf32>
    %126 = arith.addf %122, %125 : vector<64x512xf32>
    %cst_63 = arith.constant 0.000000e+00 : f32
    %127 = vector.broadcast %cst_63 : f32 to vector<64x512xf32>
    %128 = arith.cmpf ogt, %126, %127 : vector<64x512xf32>
    %cst_64 = arith.constant 2.000000e-01 : f32
    %129 = vector.broadcast %cst_64 : f32 to vector<64x512xf32>
    %130 = arith.mulf %129, %126 : vector<64x512xf32>
    %131 = arith.select %128, %126, %130 : vector<64x512xi1>, vector<64x512xf32>
    %132 = arith.truncf %131 : vector<64x512xf32> to vector<64x512xbf16>
    %c0_65 = arith.constant 0 : index
    %c0_66 = arith.constant 0 : index
    %c0_67 = arith.constant 0 : index
    %133 = vector.load %arg16[%c0_65, %c0_66, %c0_67] : memref<1x512x256xbf16, #tpu.memory_space<vmem>>, vector<1x512x256xbf16>
    %134 = vector.shape_cast %133 : vector<1x512x256xbf16> to vector<512x256xbf16>
    %cst_68 = arith.constant dense<0.000000e+00> : vector<64x256xf32>
    %135 = tpu.matmul %132, %134, %cst_68 {dimension_numbers = #tpu.dot_dimension_numbers<[1], [0], [0], [1], [0, 0, 1, 1], [], []>} : vector<64x512xbf16>, vector<512x256xbf16>, vector<64x256xf32> -> vector<64x256xf32>
    %c0_69 = arith.constant 0 : index
    %c0_70 = arith.constant 0 : index
    %c0_71 = arith.constant 0 : index
    %136 = vector.load %arg17[%c0_69, %c0_70, %c0_71] : memref<1x1x256xf32, #tpu.memory_space<vmem>>, vector<1x1x256xf32>
    %137 = vector.shape_cast %136 : vector<1x1x256xf32> to vector<1x256xf32>
    %138 = vector.broadcast %137 : vector<1x256xf32> to vector<64x256xf32>
    %139 = arith.addf %135, %138 : vector<64x256xf32>
    %140 = vector.shape_cast %139 : vector<64x256xf32> to vector<4x16x256xf32>
    %141 = arith.addf %117, %140 : vector<4x16x256xf32>
    %cst_72 = arith.constant dense<0.000000e+00> : vector<4x256xf32>
    %142 = vector.multi_reduction <add>, %141, %cst_72 [1] : vector<4x16x256xf32> to vector<4x256xf32>
    %143 = vector.shape_cast %142 : vector<4x256xf32> to vector<4x1x256xf32>
    %cst_73 = arith.constant 1.600000e+01 : f32
    %144 = vector.broadcast %cst_73 : f32 to vector<4x1x256xf32>
    %145 = arith.divf %143, %144 : vector<4x1x256xf32>
    %146 = vector.broadcast %145 : vector<4x1x256xf32> to vector<4x16x256xf32>
    %147 = arith.subf %141, %146 : vector<4x16x256xf32>
    %148 = arith.mulf %147, %147 : vector<4x16x256xf32>
    %cst_74 = arith.constant dense<0.000000e+00> : vector<4x256xf32>
    %149 = vector.multi_reduction <add>, %148, %cst_74 [1] : vector<4x16x256xf32> to vector<4x256xf32>
    %150 = vector.shape_cast %149 : vector<4x256xf32> to vector<4x1x256xf32>
    %cst_75 = arith.constant 1.600000e+01 : f32
    %151 = vector.broadcast %cst_75 : f32 to vector<4x1x256xf32>
    %152 = arith.divf %150, %151 : vector<4x1x256xf32>
    %153 = vector.broadcast %145 : vector<4x1x256xf32> to vector<4x16x256xf32>
    %154 = arith.subf %141, %153 : vector<4x16x256xf32>
    %cst_76 = arith.constant 9.99999974E-6 : f32
    %155 = vector.broadcast %cst_76 : f32 to vector<4x1x256xf32>
    %156 = arith.addf %152, %155 : vector<4x1x256xf32>
    %157 = math.rsqrt %156 : vector<4x1x256xf32>
    %158 = vector.broadcast %157 : vector<4x1x256xf32> to vector<4x16x256xf32>
    %159 = arith.mulf %154, %158 : vector<4x16x256xf32>
    %c0_77 = arith.constant 0 : index
    %c0_78 = arith.constant 0 : index
    %c0_79 = arith.constant 0 : index
    %160 = vector.load %arg21[%c0_77, %c0_78, %c0_79] : memref<4x16x256xf32, #tpu.memory_space<vmem>>, vector<4x16x256xf32>
    tpu.vector_store %arg21[%c0_77, %c0_78, %c0_79], %159 {strides = array<i32>} : memref<4x16x256xf32, #tpu.memory_space<vmem>>, vector<4x16x256xf32>,
    %c0_80 = arith.constant 0 : index
    %c0_81 = arith.constant 0 : index
    %c0_82 = arith.constant 0 : index
    %161 = vector.load %arg18[%c0_80, %c0_81, %c0_82] : memref<4x16x256xf32, #tpu.memory_space<vmem>>, vector<4x16x256xf32>
    tpu.vector_store %arg18[%c0_80, %c0_81, %c0_82], %159 {strides = array<i32>} : memref<4x16x256xf32, #tpu.memory_space<vmem>>, vector<4x16x256xf32>,
    %cst_83 = arith.constant 5.000000e-01 : f32
    %162 = vector.broadcast %cst_83 : f32 to vector<4x16x16xf32>
    %163 = arith.mulf %84, %162 : vector<4x16x16xf32>
    %c0_i32_84 = arith.constant 0 : i32
    %164 = arith.cmpi eq, %arg1, %c0_i32_84 : i32
    %165 = arith.extui %164 : i1 to i32
    %c0_i32_85 = arith.constant 0 : i32
    %166 = arith.cmpi ne, %165, %c0_i32_85 : i32
    scf.if %166 {
      %c0_87 = arith.constant 0 : index
      %c0_88 = arith.constant 0 : index
      %c0_89 = arith.constant 0 : index
      %170 = vector.load %arg19[%c0_87, %c0_88, %c0_89] : memref<4x16x16xf32, #tpu.memory_space<vmem>>, vector<4x16x16xf32>
      tpu.vector_store %arg19[%c0_87, %c0_88, %c0_89], %163 {strides = array<i32>} : memref<4x16x16xf32, #tpu.memory_space<vmem>>, vector<4x16x16xf32>,
    } else {
    }
    %c1_i32 = arith.constant 1 : i32
    %167 = arith.cmpi eq, %arg1, %c1_i32 : i32
    %168 = arith.extui %167 : i1 to i32
    %c0_i32_86 = arith.constant 0 : i32
    %169 = arith.cmpi ne, %168, %c0_i32_86 : i32
    scf.if %169 {
      %c0_87 = arith.constant 0 : index
      %c0_88 = arith.constant 0 : index
      %c0_89 = arith.constant 0 : index
      %170 = vector.load %arg20[%c0_87, %c0_88, %c0_89] : memref<4x16x16xf32, #tpu.memory_space<vmem>>, vector<4x16x16xf32>
      tpu.vector_store %arg20[%c0_87, %c0_88, %c0_89], %163 {strides = array<i32>} : memref<4x16x16xf32, #tpu.memory_space<vmem>>, vector<4x16x16xf32>,
    } else {
    }
    return
  }
  func.func @transform_0(%arg0: i32, %arg1: i32) -> (i32, i32, i32) {
    %c0_i32 = arith.constant 0 : i32
    %c0_i32_0 = arith.constant 0 : i32
    %c0_i32_1 = arith.constant 0 : i32
    return %arg0, %c0_i32, %c0_i32_0 : i32, i32, i32
  }
  func.func @transform_1(%arg0: i32, %arg1: i32) -> (i32, i32, i32) {
    %c0_i32 = arith.constant 0 : i32
    %c0_i32_0 = arith.constant 0 : i32
    %c0_i32_1 = arith.constant 0 : i32
    return %arg0, %c0_i32, %c0_i32_0 : i32, i32, i32
  }
  func.func @transform_2(%arg0: i32, %arg1: i32) -> (i32, i32, i32) {
    %c0_i32 = arith.constant 0 : i32
    %c0_i32_0 = arith.constant 0 : i32
    %c0_i32_1 = arith.constant 0 : i32
    return %arg0, %c0_i32, %c0_i32_0 : i32, i32, i32
  }
  func.func @transform_3(%arg0: i32, %arg1: i32) -> (i32, i32, i32) {
    %c0_i32 = arith.constant 0 : i32
    %c0_i32_0 = arith.constant 0 : i32
    %c0_i32_1 = arith.constant 0 : i32
    return %arg0, %c0_i32, %c0_i32_0 : i32, i32, i32
  }
  func.func @transform_4(%arg0: i32, %arg1: i32) -> (i32, i32, i32) {
    %c0_i32 = arith.constant 0 : i32
    %c0_i32_0 = arith.constant 0 : i32
    %c0_i32_1 = arith.constant 0 : i32
    return %arg1, %c0_i32, %c0_i32_0 : i32, i32, i32
  }
  func.func @transform_5(%arg0: i32, %arg1: i32) -> (i32, i32, i32) {
    %c0_i32 = arith.constant 0 : i32
    %c0_i32_0 = arith.constant 0 : i32
    %c0_i32_1 = arith.constant 0 : i32
    return %arg1, %c0_i32, %c0_i32_0 : i32, i32, i32
  }
  func.func @transform_6(%arg0: i32, %arg1: i32) -> (i32, i32, i32) {
    %c0_i32 = arith.constant 0 : i32
    %c0_i32_0 = arith.constant 0 : i32
    %c0_i32_1 = arith.constant 0 : i32
    return %arg1, %c0_i32, %c0_i32_0 : i32, i32, i32
  }
  func.func @transform_7(%arg0: i32, %arg1: i32) -> (i32, i32, i32) {
    %c0_i32 = arith.constant 0 : i32
    %c0_i32_0 = arith.constant 0 : i32
    %c0_i32_1 = arith.constant 0 : i32
    return %arg1, %c0_i32, %c0_i32_0 : i32, i32, i32
  }
  func.func @transform_8(%arg0: i32, %arg1: i32) -> (i32, i32, i32) {
    %c0_i32 = arith.constant 0 : i32
    %c0_i32_0 = arith.constant 0 : i32
    %c0_i32_1 = arith.constant 0 : i32
    return %arg1, %c0_i32, %c0_i32_0 : i32, i32, i32
  }
  func.func @transform_9(%arg0: i32, %arg1: i32) -> (i32, i32, i32) {
    %c0_i32 = arith.constant 0 : i32
    %c0_i32_0 = arith.constant 0 : i32
    %c0_i32_1 = arith.constant 0 : i32
    return %arg1, %c0_i32, %c0_i32_0 : i32, i32, i32
  }
  func.func @transform_10(%arg0: i32, %arg1: i32) -> (i32, i32, i32) {
    %c0_i32 = arith.constant 0 : i32
    %c0_i32_0 = arith.constant 0 : i32
    %c0_i32_1 = arith.constant 0 : i32
    return %arg1, %c0_i32, %c0_i32_0 : i32, i32, i32
  }
  func.func @transform_11(%arg0: i32, %arg1: i32) -> (i32, i32, i32) {
    %c0_i32 = arith.constant 0 : i32
    %c0_i32_0 = arith.constant 0 : i32
    %c0_i32_1 = arith.constant 0 : i32
    return %arg1, %c0_i32, %c0_i32_0 : i32, i32, i32
  }
  func.func @transform_12(%arg0: i32, %arg1: i32) -> (i32, i32, i32) {
    %c0_i32 = arith.constant 0 : i32
    %c0_i32_0 = arith.constant 0 : i32
    %c0_i32_1 = arith.constant 0 : i32
    return %arg1, %c0_i32, %c0_i32_0 : i32, i32, i32
  }
  func.func @transform_13(%arg0: i32, %arg1: i32) -> (i32, i32, i32) {
    %c0_i32 = arith.constant 0 : i32
    %c0_i32_0 = arith.constant 0 : i32
    %c0_i32_1 = arith.constant 0 : i32
    return %arg1, %c0_i32, %c0_i32_0 : i32, i32, i32
  }
  func.func @transform_14(%arg0: i32, %arg1: i32) -> (i32, i32, i32) {
    %c0_i32 = arith.constant 0 : i32
    %c0_i32_0 = arith.constant 0 : i32
    %c0_i32_1 = arith.constant 0 : i32
    return %arg1, %c0_i32, %c0_i32_0 : i32, i32, i32
  }
  func.func @transform_15(%arg0: i32, %arg1: i32) -> (i32, i32, i32) {
    %c0_i32 = arith.constant 0 : i32
    %c0_i32_0 = arith.constant 0 : i32
    %c0_i32_1 = arith.constant 0 : i32
    return %arg1, %c0_i32, %c0_i32_0 : i32, i32, i32
  }
  func.func @transform_16(%arg0: i32, %arg1: i32) -> (i32, i32, i32) {
    %c0_i32 = arith.constant 0 : i32
    %c0_i32_0 = arith.constant 0 : i32
    %c0_i32_1 = arith.constant 0 : i32
    return %arg0, %c0_i32, %c0_i32_0 : i32, i32, i32
  }
  func.func @transform_17(%arg0: i32, %arg1: i32) -> (i32, i32, i32) {
    %c0_i32 = arith.constant 0 : i32
    %c0_i32_0 = arith.constant 0 : i32
    %c0_i32_1 = arith.constant 0 : i32
    return %arg0, %c0_i32, %c0_i32_0 : i32, i32, i32
  }
  func.func @transform_18(%arg0: i32, %arg1: i32) -> (i32, i32, i32) {
    %c0_i32 = arith.constant 0 : i32
    %c0_i32_0 = arith.constant 0 : i32
    %c0_i32_1 = arith.constant 0 : i32
    return %arg0, %c0_i32, %c0_i32_0 : i32, i32, i32
  }
}

</mosaic_0001>

<bundles_post_ra>
// kernel: ttbs_forward.1
= control target key start
LH: loop header
LB: loop body
LE: loop exit
PB: predicated region body
PF: predicated region fallthrough
CT: control target
= control target key end

     0   :  { %s7866_s0 = inlined_call_operand.vmem [shape: f32[4,16,256], index: 0, kind: input, shape index: {}]   ;;  %s7867_s1 = inlined_call_operand.vmem [shape: f32[4,16,256], index: 1, kind: input, shape index: {}]   ;;  %s7868_s2 = inlined_call_operand.vmem [shape: f32[4,16,256], index: 2, kind: input, shape index: {}]   ;;  %s7869_s3 = inlined_call_operand.vmem [shape: f32[4,16,256], index: 3, kind: input, shape index: {}]   ;;  %s7870_s4 = inlined_call_operand.vmem [shape: bf16[2,256,256], index: 4, kind: input, shape index: {}]   ;;  %s7871_s5 = inlined_call_operand.vmem [shape: f32[2,1,256], index: 5, kind: input, shape index: {}]   ;;  %s7872_s6 = inlined_call_operand.vmem [shape: bf16[2,256,256], index: 6, kind: input, shape index: {}]   ;;  %s7873_s7 = inlined_call_operand.vmem [shape: f32[2,1,256], index: 7, kind: input, shape index: {}]   ;;  %s7874_s8 = inlined_call_operand.vmem [shape: bf16[2,256,256], index: 8, kind: input, shape index: {}]   ;;  %s7875_s9 = inlined_call_operand.vmem [shape: f32[2,1,256], index: 9, kind: input, shape index: {}]   ;;  %s7876_s10 = inlined_call_operand.vmem [shape: bf16[2,256,256], index: 10, kind: input, shape index: {}]   ;;  %s7877_s11 = inlined_call_operand.vmem [shape: f32[2,1,256], index: 11, kind: input, shape index: {}]   ;;  %s7878_s12 = inlined_call_operand.vmem [shape: bf16[2,256,512], index: 12, kind: input, shape index: {}]   ;;  %s7879_s13 = inlined_call_operand.vmem [shape: f32[2,1,512], index: 13, kind: input, shape index: {}]   ;;  %s7880_s14 = inlined_call_operand.vmem [shape: bf16[2,512,256], index: 14, kind: input, shape index: {}]   ;;  %s7881_s15 = inlined_call_operand.vmem [shape: f32[2,1,256], index: 15, kind: input, shape index: {}]   ;;  %s7882_s16 = inlined_call_operand.vmem [shape: f32[4,16,256], index: 16, kind: output, shape index: {0}]   ;;  %s7883_s17 = inlined_call_operand.hbm [shape: f32[4,16,16], index: 17, kind: output, shape index: {1}]   ;;  %s7884_s18 = inlined_call_operand.hbm [shape: f32[4,16,16], index: 18, kind: output, shape index: {2}]  }
   0x1   :  { %7908 = sst [smem:[#allocation34_spill]] %s7866_s0 }
   0x2   :  { %7909 = sst [smem:[#allocation35_spill]] %s7867_s1 }
   0x3   :  { %7910 = sst [smem:[#allocation36_spill]] %s7868_s2 }
   0x4   :  { %7911 = sst [smem:[#allocation37_spill]] %s7869_s3 }
   0x5   :  { %7912 = sst [smem:[#allocation38_spill]] %s7870_s4 }
   0x6   :  { %7913 = sst [smem:[#allocation39_spill]] %s7871_s5 }
   0x7   :  { %7914 = sst [smem:[#allocation40_spill]] %s7872_s6 }
   0x8   :  { %7915 = sst [smem:[#allocation41_spill]] %s7874_s8 }
   0x9   :  { %7916 = sst [smem:[#allocation42_spill]] %s7882_s16 }
   0xa   :  { %7917 = sst [smem:[#allocation43_spill]] %s7883_s17 }
   0xb   :  { %7918 = sst [smem:[#allocation44_spill]] %s7884_s18 }
   0xc   :  { %24 = vsyncpa [#allocation4], 0 }
   0xd   :  { %25 = vsyncpa [#allocation6], 0  ;;  %s6378_s27 = smov 0   ;;  %s6380_s28 = smov 0  }
   0xe   :  { %s6382_s29 = smov 0  }
   0xf LB: > { %7919 = sst [smem:[#allocation9_spill]] %s6271_s28  ;;  %s40_s0 = sadd.s32 1, %s6271_s28  ;;  %s6275_s29 = sphi %s6382_s29, %s31_s29   ;;  %s6271_s28 = sphi %s6380_s28, %s7996_s28   ;;  %s6267_s27 = sphi %s6378_s27, %s7995_s27  }
  0x10   : > { %7920 = sst [smem:[#allocation10_spill]] %s6275_s29  ;;  %p41_p0 = scmp.ge.s32.totalorder %s40_s0, 2 }
  0x11   : > { %p5163_p1 = scmp.ge.s32.totalorder %s6275_s29, 1  ;;  %p683_p2 = scmp.lt.s32.totalorder %s6275_s29, 3 }
  0x12   : > { %s7998_s0 = smov (%p41_p0, %s40_s0), 0 }
  0x13   : > { %7921 = sst [smem:[#allocation11_spill]] %s7998_s0  ;;  %p684_p3 = pnand %p5163_p1, %p683_p2 }
  0x15   : > { %687 = sbr.rel (%p684_p3) target bundleno = 2537 (0x9e9), region = 84 }
  0x1c   : > { %p839_p4 = scmp.lt.s32.totalorder %s6267_s27, 1  ;;  %s7922_s4 = sld [smem:[#allocation38_spill]] }
  0x1d   : > { %s7924_s6 = sld [smem:[#allocation40_spill]]  ;;  %s7925_s8 = sld [smem:[#allocation41_spill]] }
  0x1e   : > { %s840_s19 = scalar_select %p839_p4, %s6267_s27, 1 }
  0x1f   : > { %p5182_p5 = scmp.ne.s32.totalorder %s6267_s27, 0 }
  0x20   : > { %s5457_s1 = sshll.u32 %s840_s19, 8  ;;  %s6401_s20 = sshll.u32 %s840_s19, 1 }
  0x21   : > { %s6433_s25 = scalar_lea.vmem %s7876_s10, %s5457_s1  ;;  %s5461_s18 = sshll.u32 %s840_s19, 9 }
  0x22   : > { %s6406_s2 = scalar_lea.vmem %s7922_s4, %s5457_s1  ;;  %s5178_s28 = sshll.u32 %s840_s19, 2 }
  0x23   : > { %s6415_s0 = scalar_lea.vmem %s7924_s6, %s5457_s1  ;;  %s6424_s29 = scalar_lea.vmem %s7925_s8, %s5457_s1 }
  0x24   : > { %s6442_s17 = scalar_lea.vmem %s7878_s12, %s5461_s18  ;;  %s6447_s4 = scalar_lea.vmem %s7879_s13, %s5178_s28 }
  0x25   : > { %s6452_s1 = scalar_lea.vmem %s7880_s14, %s5461_s18  ;;  %906 = sbr.rel (%p5182_p5) target bundleno = 53 (0x35), region = 88 }
  0x26   : > { %s7926_s21 = sld [smem:[#allocation34_spill]] (!%p5182_p5) }
  0x2c   : > { %v907_v0 = vld [vmem:[%s7926_s21] sm:$0xff]  ;;  %v908_v1 = vld [vmem:[%s7926_s21 + $0x8] sm:$0xff]  ;;  %v909_v2 = vld [vmem:[%s7926_s21 + $0x10] sm:$0xff] }
  0x2d   : > { %923 = vst [vmem:[#allocation2] sm:$0xff] %v907_v0  ;;  %924 = vst [vmem:[#allocation2 + $0x8] sm:$0xff] %v908_v1  ;;  %v910_v3 = vld [vmem:[%s7926_s21 + $0x18] sm:$0xff]  ;;  %v911_v4 = vld [vmem:[%s7926_s21 + $0x20] sm:$0xff] }
  0x2e   : > { %925 = vst [vmem:[#allocation2 + $0x10] sm:$0xff] %v909_v2  ;;  %v912_v5 = vld [vmem:[%s7926_s21 + $0x28] sm:$0xff]  ;;  %926 = vst [vmem:[#allocation2 + $0x18] sm:$0xff] %v910_v3  ;;  %v913_v6 = vld [vmem:[%s7926_s21 + $0x30] sm:$0xff] }
  0x2f   : > { %927 = vst [vmem:[#allocation2 + $0x20] sm:$0xff] %v911_v4  ;;  %928 = vst [vmem:[#allocation2 + $0x28] sm:$0xff] %v912_v5  ;;  %v914_v7 = vld [vmem:[%s7926_s21 + $0x38] sm:$0xff]  ;;  %v915_v8 = vld [vmem:[%s7926_s21 + $0x40] sm:$0xff] }
  0x30   : > { %929 = vst [vmem:[#allocation2 + $0x30] sm:$0xff] %v913_v6  ;;  %930 = vst [vmem:[#allocation2 + $0x38] sm:$0xff] %v914_v7  ;;  %v916_v9 = vld [vmem:[%s7926_s21 + $0x48] sm:$0xff]  ;;  %v917_v10 = vld [vmem:[%s7926_s21 + $0x50] sm:$0xff] }
  0x31   : > { %931 = vst [vmem:[#allocation2 + $0x40] sm:$0xff] %v915_v8  ;;  %v918_v11 = vld [vmem:[%s7926_s21 + $0x58] sm:$0xff]  ;;  %932 = vst [vmem:[#allocation2 + $0x48] sm:$0xff] %v916_v9  ;;  %v919_v12 = vld [vmem:[%s7926_s21 + $0x60] sm:$0xff] }
  0x32   : > { %933 = vst [vmem:[#allocation2 + $0x50] sm:$0xff] %v917_v10  ;;  %934 = vst [vmem:[#allocation2 + $0x58] sm:$0xff] %v918_v11  ;;  %v920_v13 = vld [vmem:[%s7926_s21 + $0x68] sm:$0xff]  ;;  %v921_v14 = vld [vmem:[%s7926_s21 + $0x70] sm:$0xff] }
  0x33   : > { %935 = vst [vmem:[#allocation2 + $0x60] sm:$0xff] %v919_v12  ;;  %936 = vst [vmem:[#allocation2 + $0x68] sm:$0xff] %v920_v13  ;;  %v922_v15 = vld [vmem:[%s7926_s21 + $0x78] sm:$0xff] }
  0x34   : > { %937 = vst [vmem:[#allocation2 + $0x70] sm:$0xff] %v921_v14  ;;  %938 = vst [vmem:[#allocation2 + $0x78] sm:$0xff] %v922_v15 }
  0x35 PF: > { %v5697_v16 = vld [vmem:[%s6415_s0 + $0x4] ss:$8 sps:$4 sm:$0xff]   ;;  %v5699_v17 = vld [vmem:[%s6415_s0] ss:$8 sps:$4 sm:$0xff]   ;;  %v5700_v18 = vld [vmem:[%s6415_s0 + $0x14] ss:$8 sps:$4 sm:$0xff]   ;;  %s7933_s24 = scalar_lea.vmem %s7875_s9, %s6401_s20  ;;  %s7942_s5 = scalar_lea.vmem %s7877_s11, %s6401_s20 }
  0x36   : > { %1564 = vmatprep.subr.bf16.mxu1 %v5697_v16  ;;  %v5702_v19 = vld [vmem:[%s6406_s2 + $0x4] ss:$8 sps:$4 sm:$0xff]   ;;  %v5704_v20 = vld [vmem:[%s6415_s0 + $0x10] ss:$8 sps:$4 sm:$0xff]   ;;  %v5705_v21 = vld [vmem:[%s6406_s2] ss:$8 sps:$4 sm:$0xff]   ;;  %s7967_s19 = scalar_lea.vmem %s7881_s15, %s6401_s20 }
  0x37   : > { %1565 = vmatpush1.bf16.msra.mxu1 %v5699_v17  ;;  %v5706_v22 = vld [vmem:[%s6415_s0 + $0x24] ss:$8 sps:$4 sm:$0xff]   ;;  %1263 = vmatprep.subr.bf16.mxu0 %v5702_v19  ;;  %v5708_v23 = vld [vmem:[%s6406_s2 + $0x14] ss:$8 sps:$4 sm:$0xff]   ;;  %v5711_v24 = vld [vmem:[%s6406_s2 + $0x10] ss:$8 sps:$4 sm:$0xff]  }
  0x38   : > { %1566 = vmatprep.subr.bf16.mxu1 %v5700_v18  ;;  %1264 = vmatpush1.bf16.msra.mxu0 %v5705_v21  ;;  %v5710_v25 = vld [vmem:[%s6415_s0 + $0x20] ss:$8 sps:$4 sm:$0xff]   ;;  %v5712_v26 = vld [vmem:[%s6415_s0 + $0x34] ss:$8 sps:$4 sm:$0xff]   ;;  %v5714_v27 = vld [vmem:[%s6406_s2 + $0x24] ss:$8 sps:$4 sm:$0xff]  }
  0x39   : > { %1265 = vmatprep.subr.bf16.mxu0 %v5708_v23  ;;  %v5717_v28 = vld [vmem:[%s6406_s2 + $0x20] ss:$8 sps:$4 sm:$0xff]   ;;  %v5716_v29 = vld [vmem:[%s6415_s0 + $0x30] ss:$8 sps:$4 sm:$0xff]   ;;  %v5720_v30 = vld [vmem:[%s6406_s2 + $0x34] ss:$8 sps:$4 sm:$0xff]  }
  0x3a   : > { %v5718_v31 = vld [vmem:[%s6415_s0 + $0x44] ss:$8 sps:$4 sm:$0xff]   ;;  %v5722_v32 = vld [vmem:[%s6415_s0 + $0x40] ss:$8 sps:$4 sm:$0xff]   ;;  %v5723_v33 = vld [vmem:[%s6406_s2 + $0x30] ss:$8 sps:$4 sm:$0xff]  }
  0x3b   : > { %1567 = vmatpush1.bf16.msra.mxu1 %v5704_v20  ;;  %v5726_v34 = vld [vmem:[%s6406_s2 + $0x44] ss:$8 sps:$4 sm:$0xff]   ;;  %v5724_v35 = vld [vmem:[%s6415_s0 + $0x54] ss:$8 sps:$4 sm:$0xff]   ;;  %v5729_v36 = vld [vmem:[%s6406_s2 + $0x40] ss:$8 sps:$4 sm:$0xff]  }
  0x3c   : > { %1568 = vmatprep.subr.bf16.mxu1 %v5706_v22  ;;  %1266 = vmatpush1.bf16.msra.mxu0 %v5711_v24  ;;  %v5728_v37 = vld [vmem:[%s6415_s0 + $0x50] ss:$8 sps:$4 sm:$0xff]   ;;  %v5732_v38 = vld [vmem:[%s6406_s2 + $0x54] ss:$8 sps:$4 sm:$0xff]   ;;  %v5730_v39 = vld [vmem:[%s6415_s0 + $0x64] ss:$8 sps:$4 sm:$0xff]  }
  0x3d   : > { %1267 = vmatprep.subr.bf16.mxu0 %v5714_v27  ;;  %v5734_v40 = vld [vmem:[%s6415_s0 + $0x60] ss:$8 sps:$4 sm:$0xff]   ;;  %v5735_v41 = vld [vmem:[%s6406_s2 + $0x50] ss:$8 sps:$4 sm:$0xff]   ;;  %v5738_v42 = vld [vmem:[%s6406_s2 + $0x64] ss:$8 sps:$4 sm:$0xff]  }
  0x3e   : > { %v5736_v43 = vld [vmem:[%s6415_s0 + $0x74] ss:$8 sps:$4 sm:$0xff]   ;;  %v5741_v44 = vld [vmem:[%s6406_s2 + $0x60] ss:$8 sps:$4 sm:$0xff]   ;;  %v5740_v45 = vld [vmem:[%s6415_s0 + $0x70] ss:$8 sps:$4 sm:$0xff]  }
  0x3f   : > { %1569 = vmatpush1.bf16.msra.mxu1 %v5710_v25  ;;  %v5744_v46 = vld [vmem:[%s6406_s2 + $0x74] ss:$8 sps:$4 sm:$0xff]   ;;  %v5742_v47 = vld [vmem:[%s6415_s0 + $0x84] ss:$8 sps:$4 sm:$0xff]   ;;  %v5746_v48 = vld [vmem:[%s6415_s0 + $0x80] ss:$8 sps:$4 sm:$0xff]  }
  0x40   : > { %1570 = vmatprep.subr.bf16.mxu1 %v5712_v26  ;;  %1268 = vmatpush1.bf16.msra.mxu0 %v5717_v28  ;;  %v5747_v49 = vld [vmem:[%s6406_s2 + $0x70] ss:$8 sps:$4 sm:$0xff]   ;;  %v5750_v50 = vld [vmem:[%s6406_s2 + $0x84] ss:$8 sps:$4 sm:$0xff]   ;;  %v5748_v51 = vld [vmem:[%s6415_s0 + $0x94] ss:$8 sps:$4 sm:$0xff]  }
  0x41   : > { %1269 = vmatprep.subr.bf16.mxu0 %v5720_v30  ;;  %v5753_v52 = vld [vmem:[%s6406_s2 + $0x80] ss:$8 sps:$4 sm:$0xff]   ;;  %v5752_v53 = vld [vmem:[%s6415_s0 + $0x90] ss:$8 sps:$4 sm:$0xff]   ;;  %v5756_v54 = vld [vmem:[%s6406_s2 + $0x94] ss:$8 sps:$4 sm:$0xff]  }
  0x42   : > { %v5754_v55 = vld [vmem:[%s6415_s0 + $0xa4] ss:$8 sps:$4 sm:$0xff]   ;;  %v5758_v56 = vld [vmem:[%s6415_s0 + $0xa0] ss:$8 sps:$4 sm:$0xff]   ;;  %v5759_v57 = vld [vmem:[%s6406_s2 + $0x90] ss:$8 sps:$4 sm:$0xff]  }
  0x43   : > { %1571 = vmatpush1.bf16.msra.mxu1 %v5716_v29  ;;  %v5762_v58 = vld [vmem:[%s6406_s2 + $0xa4] ss:$8 sps:$4 sm:$0xff]   ;;  %v5760_v59 = vld [vmem:[%s6415_s0 + $0xb4] ss:$8 sps:$4 sm:$0xff]   ;;  %s7927_s22 = sld [smem:[#allocation37_spill]]  ;;  %s7928_s30 = sld [smem:[#allocation35_spill]] }
  0x44   : > { %1572 = vmatprep.subr.bf16.mxu1 %v5718_v31  ;;  %1270 = vmatpush1.bf16.msra.mxu0 %v5723_v33  ;;  %v5765_v62 = vld [vmem:[%s6406_s2 + $0xa0] ss:$8 sps:$4 sm:$0xff]   ;;  %v5764_v1 = vld [vmem:[%s6415_s0 + $0xb0] ss:$8 sps:$4 sm:$0xff]   ;;  %v5768_v2 = vld [vmem:[%s6406_s2 + $0xb4] ss:$8 sps:$4 sm:$0xff]  }
  0x45   : > { %1271 = vmatprep.subr.bf16.mxu0 %v5726_v34  ;;  %v5766_v5 = vld [vmem:[%s6415_s0 + $0xc4] ss:$8 sps:$4 sm:$0xff]   ;;  %v942_v8 = vld [vmem:[#allocation2 + $0x18] sm:$0xff]  ;;  %v5770_v12 = vld [vmem:[%s6415_s0 + $0xc0] ss:$8 sps:$4 sm:$0xff]   ;;  %s7929_s26 = sld [smem:[#allocation36_spill]] }
  0x46   : > { %v940_v7 = vld [vmem:[#allocation2 + $0x8] sm:$0xff]  ;;  %v5771_v9 = vld [vmem:[%s6406_s2 + $0xb0] ss:$8 sps:$4 sm:$0xff]   ;;  %v5772_v14 = vld [vmem:[%s6415_s0 + $0xd4] ss:$8 sps:$4 sm:$0xff]   ;;  %vm6278_vm0 = vmmov 0  }
  0x47   : > { %1573 = vmatpush1.bf16.msra.mxu1 %v5722_v32  ;;  %v5774_v13 = vld [vmem:[%s6406_s2 + $0xc4] ss:$8 sps:$4 sm:$0xff]   ;;  %v5777_v16 = vld [vmem:[%s6406_s2 + $0xc0] ss:$8 sps:$4 sm:$0xff]   ;;  %v5776_v17 = vld [vmem:[%s6415_s0 + $0xd0] ss:$8 sps:$4 sm:$0xff]  }
  0x48   : > { %1574 = vmatprep.subr.bf16.mxu1 %v5724_v35  ;;  %1272 = vmatpush1.bf16.msra.mxu0 %v5729_v36  ;;  %v5780_v18 = vld [vmem:[%s6406_s2 + $0xd4] ss:$8 sps:$4 sm:$0xff]   ;;  %v5778_v19 = vld [vmem:[%s6415_s0 + $0xe4] ss:$8 sps:$4 sm:$0xff]   ;;  %v5782_v20 = vld [vmem:[%s6415_s0 + $0xe0] ss:$8 sps:$4 sm:$0xff]  }
  0x49   : > { %1273 = vmatprep.subr.bf16.mxu0 %v5732_v38  ;;  %v956_v60 = vld [vmem:[%s7927_s22 + $0x8] sm:$0xff]  ;;  %v958_v61 = vld [vmem:[%s7927_s22 + $0x18] sm:$0xff]  ;;  %v955_v24 = vld [vmem:[%s7927_s22] sm:$0xff]  ;;  %s7931_s23 = sld [smem:[#allocation39_spill]]  ;;  %vm2094_vm1 = vcmask 130048  }
  0x4a   : > { %v996_v63 = vld [vmem:[%s7928_s30 + $0x8] sm:$0xff]  ;;  %v998_v0 = vld [vmem:[%s7928_s30 + $0x18] sm:$0xff]  ;;  %v972_v10 = vadd.f32 %v956_v60, %v940_v7  ;;  %v974_v11 = vadd.f32 %v958_v61, %v942_v8  ;;  %v957_v25 = vld [vmem:[%s7927_s22 + $0x10] sm:$0xff] }
  0x4b   : > { %1575 = vmatpush1.bf16.msra.mxu1 %v5728_v37  ;;  %v1012_v3 = vadd.f32 %v996_v63, %v956_v60  ;;  %v1014_v4 = vadd.f32 %v998_v0, %v958_v61  ;;  %v5783_v21 = vld [vmem:[%s6406_s2 + $0xd0] ss:$8 sps:$4 sm:$0xff]   ;;  %v5784_v22 = vld [vmem:[%s6415_s0 + $0xf4] ss:$8 sps:$4 sm:$0xff]   ;;  %v5786_v23 = vld [vmem:[%s6406_s2 + $0xe4] ss:$8 sps:$4 sm:$0xff]  }
  0x4c   : > { %1576 = vmatprep.subr.bf16.mxu1 %v5730_v39  ;;  %1274 = vmatpush1.bf16.msra.mxu0 %v5735_v41  ;;  %v988_v15 = vpack.c.bf16 %v974_v11, %v972_v10  ;;  %v995_v26 = vld [vmem:[%s7928_s30] sm:$0xff]  ;;  %v997_v27 = vld [vmem:[%s7928_s30 + $0x10] sm:$0xff]  ;;  %v960_v28 = vld [vmem:[%s7927_s22 + $0x28] sm:$0xff] }
  0x4d   : > { %1275 = vmatprep.subr.bf16.mxu0 %v5738_v42  ;;  %v1028_v6 = vpack.c.bf16 %v1014_v4, %v1012_v3  ;;  %v962_v29 = vld [vmem:[%s7927_s22 + $0x38] sm:$0xff]  ;;  %v1000_v30 = vld [vmem:[%s7928_s30 + $0x28] sm:$0xff]  ;;  %v1011_v35 = vadd.f32 %v995_v26, %v955_v24  ;;  %v1013_v36 = vadd.f32 %v997_v27, %v957_v25  ;;  %v939_v37 = vld [vmem:[#allocation2] sm:$0xff] }
  0x4e   : > { %1295 = vmatprep.mubr.bf16.mxu0 %v988_v15  ;;  %v1002_v31 = vld [vmem:[%s7928_s30 + $0x38] sm:$0xff]  ;;  %v5789_v33 = vld [vmem:[%s6406_s2 + $0xe0] ss:$8 sps:$4 sm:$0xff]   ;;  %v941_v38 = vld [vmem:[#allocation2 + $0x10] sm:$0xff]  ;;  %v1016_v39 = vadd.f32 %v1000_v30, %v960_v28 }
  0x4f   : > { %1577 = vmatpush1.bf16.msra.mxu1 %v5734_v40  ;;  %1596 = vmatprep.mubr.bf16.mxu1 %v1028_v6  ;;  %v5788_v32 = vld [vmem:[%s6415_s0 + $0xf0] ss:$8 sps:$4 sm:$0xff]   ;;  %v5790_v34 = vld [vmem:[%s6406_s2 + $0xf4] ss:$8 sps:$4 sm:$0xff]   ;;  %v1018_v40 = vadd.f32 %v1002_v31, %v962_v29  ;;  %v944_v41 = vld [vmem:[#allocation2 + $0x28] sm:$0xff]  ;;  %s7932_s3 = scalar_lea.vmem %s7931_s23, %s6401_s20 }
  0x50   : > { %1578 = vmatprep.subr.bf16.mxu1 %v5736_v43  ;;  %1276 = vmatpush1.bf16.msra.mxu0 %v5741_v44  ;;  %v946_v42 = vld [vmem:[#allocation2 + $0x38] sm:$0xff]  ;;  %v971_v44 = vadd.f32 %v955_v24, %v939_v37  ;;  %v945_v61 = vld [vmem:[#allocation2 + $0x30] sm:$0xff]  ;;  %v1003_v11 = vld [vmem:[%s7928_s30 + $0x40] sm:$0xff] }
  0x51   : > { %1277 = vmatprep.subr.bf16.mxu0 %v5744_v46  ;;  %v5792_v43 = vld [vmem:[%s6406_s2 + $0xf0] ss:$8 sps:$4 sm:$0xff]   ;;  %v959_v46 = vld [vmem:[%s7927_s22 + $0x20] sm:$0xff]  ;;  %v5798_v6 = vld [vmem:[%s6424_s29 + $0x14] ss:$8 sps:$4 sm:$0xff]   ;;  %s7972_s2 = sld [smem:[#allocation42_spill]] }
  0x52   : > { %v965_v10 = vld [vmem:[%s7927_s22 + $0x50] sm:$0xff]  ;;  %v5799_v30 = vld [vmem:[%s6424_s29 + $0x20] ss:$8 sps:$4 sm:$0xff]  }
  0x53   : > { %1579 = vmatpush1.bf16.msra.mxu1 %v5740_v45  ;;  %v973_v45 = vadd.f32 %v957_v25, %v941_v38  ;;  %v949_v25 = vld [vmem:[#allocation2 + $0x50] sm:$0xff]  ;;  %v967_v37 = vld [vmem:[%s7927_s22 + $0x60] sm:$0xff] }
  0x54   : > { %1580 = vmatprep.subr.bf16.mxu1 %v5742_v47  ;;  %1278 = vmatpush1.bf16.msra.mxu0 %v5747_v49  ;;  %v961_v47 = vld [vmem:[%s7927_s22 + $0x30] sm:$0xff] }
  0x55   : > { %1279 = vmatprep.subr.bf16.mxu0 %v5750_v50  ;;  %v1001_v49 = vld [vmem:[%s7928_s30 + $0x30] sm:$0xff]  ;;  %v1027_v50 = vpack.c.bf16 %v1013_v36, %v1011_v35  ;;  %v987_v60 = vpack.c.bf16 %v973_v45, %v971_v44  ;;  %v977_v8 = vadd.f32 %v961_v47, %v945_v61  ;;  %v981_v36 = vadd.f32 %v965_v10, %v949_v25  ;;  %v1039_v25 = vld [vmem:[%s7929_s26 + $0x20] sm:$0xff] }
  0x56   : > { %v1017_v63 = vadd.f32 %v1001_v49, %v961_v47  ;;  %v969_v38 = vld [vmem:[%s7927_s22 + $0x70] sm:$0xff]  ;;  %v951_v47 = vld [vmem:[#allocation2 + $0x60] sm:$0xff] }
  0x57   : > { %1581 = vmatpush1.bf16.msra.mxu1 %v5746_v48  ;;  %v999_v48 = vld [vmem:[%s7928_s30 + $0x20] sm:$0xff]  ;;  %v1009_v45 = vld [vmem:[%s7928_s30 + $0x70] sm:$0xff] }
  0x58   : > { %1582 = vmatprep.subr.bf16.mxu1 %v5748_v51  ;;  %1280 = vmatpush1.bf16.msra.mxu0 %v5753_v52  ;;  %v976_v51 = vadd.f32 %v960_v28, %v944_v41  ;;  %v978_v52 = vadd.f32 %v962_v29, %v946_v42  ;;  %v952_v29 = vld [vmem:[#allocation2 + $0x68] sm:$0xff] }
  0x59   : > { %1281 = vmatprep.subr.bf16.mxu0 %v5756_v54  ;;  %v966_v54 = vld [vmem:[%s7927_s22 + $0x58] sm:$0xff]  ;;  %v5805_v49 = vld [vmem:[%s6424_s29 + $0x40] ss:$8 sps:$4 sm:$0xff]  }
  0x5a   : > { %v990_v0 = vpack.c.bf16 %v978_v52, %v976_v51  ;;  %v5810_v51 = vld [vmem:[%s6424_s29 + $0x54] ss:$8 sps:$4 sm:$0xff]  }
  0x5b   : > { %1583 = vmatpush1.bf16.msra.mxu1 %v5752_v53  ;;  %v964_v53 = vld [vmem:[%s7927_s22 + $0x48] sm:$0xff] }
  0x5c   : > { %1584 = vmatprep.subr.bf16.mxu1 %v5754_v55  ;;  %1282 = vmatpush1.bf16.msra.mxu0 %v5759_v57  ;;  %v1030_v55 = vpack.c.bf16 %v1018_v40, %v1016_v39  ;;  %v5795_v57 = vld [vmem:[%s6424_s29 + $0x4] ss:$8 sps:$4 sm:$0xff]  }
  0x5d   : > { %1283 = vmatprep.subr.bf16.mxu0 %v5762_v58  ;;  %v943_v58 = vld [vmem:[#allocation2 + $0x20] sm:$0xff] }
  0x5e   : > { %v975_v7 = vadd.f32 %v959_v46, %v943_v58  ;;  %v1007_v40 = vld [vmem:[%s7928_s30 + $0x60] sm:$0xff] }
  0x5f   : > { %1585 = vmatpush1.bf16.msra.mxu1 %v5758_v56  ;;  %v1004_v56 = vld [vmem:[%s7928_s30 + $0x48] sm:$0xff]  ;;  %v1023_v52 = vadd.f32 %v1007_v40, %v967_v37  ;;  %v6277_v40 = vmov 0.0  }
  0x60   : > { %1586 = vmatprep.subr.bf16.mxu1 %v5760_v59  ;;  %1284 = vmatpush1.bf16.msra.mxu0 %v5765_v62  ;;  %v1006_v59 = vld [vmem:[%s7928_s30 + $0x58] sm:$0xff]  ;;  %v1015_v62 = vadd.f32 %v999_v48, %v959_v46  ;;  %v1020_v3 = vadd.f32 %v1004_v56, %v964_v53  ;;  %v989_v24 = vpack.c.bf16 %v977_v8, %v975_v7  ;;  %v5807_v46 = vld [vmem:[%s6424_s29 + $0x44] ss:$8 sps:$4 sm:$0xff]   ;;  %v953_v48 = vld [vmem:[#allocation2 + $0x70] sm:$0xff] }
  0x61   : > { %1285 = vmatprep.subr.bf16.mxu0 %v5768_v2  ;;  %v5793_v2 = vld [vmem:[%s6424_s29] ss:$8 sps:$4 sm:$0xff]   ;;  %v1022_v4 = vadd.f32 %v1006_v59, %v966_v54  ;;  %v983_v56 = vadd.f32 %v967_v37, %v951_v47  ;;  %v5813_v58 = vld [vmem:[%s6424_s29 + $0x64] ss:$8 sps:$4 sm:$0xff]   ;;  %v5826_v7 = vld [vmem:[%s6424_s29 + $0xb0] ss:$8 sps:$4 sm:$0xff]  }
  0x62   : > { %v5831_v8 = vld [vmem:[%s6424_s29 + $0xc4] ss:$8 sps:$4 sm:$0xff]  }
  0x63   : > { %1587 = vmatpush1.bf16.msra.mxu1 %v5764_v1  ;;  %v948_v1 = vld [vmem:[#allocation2 + $0x48] sm:$0xff]  ;;  %v1047_v37 = vld [vmem:[%s7929_s26 + $0x60] sm:$0xff] }
  0x64   : > { %1588 = vmatprep.subr.bf16.mxu1 %v5766_v5  ;;  %1286 = vmatpush1.bf16.msra.mxu0 %v5771_v9  ;;  %v950_v5 = vld [vmem:[#allocation2 + $0x58] sm:$0xff]  ;;  %v963_v9 = vld [vmem:[%s7927_s22 + $0x40] sm:$0xff] }
  0x65   : > { %1287 = vmatprep.subr.bf16.mxu0 %v5774_v13  ;;  %v1029_v13 = vpack.c.bf16 %v1017_v63, %v1015_v62  ;;  %v982_v15 = vadd.f32 %v966_v54, %v950_v5  ;;  %v1019_v26 = vadd.f32 %v1003_v11, %v963_v9  ;;  %v5816_v62 = vld [vmem:[%s6424_s29 + $0x74] ss:$8 sps:$4 sm:$0xff]   ;;  %v5814_v63 = vld [vmem:[%s6424_s29 + $0x70] ss:$8 sps:$4 sm:$0xff]   ;;  %v5823_v5 = vld [vmem:[%s6424_s29 + $0xa0] ss:$8 sps:$4 sm:$0xff]  }
  0x66   : > { %v5832_v11 = vld [vmem:[%s6424_s29 + $0xd0] ss:$8 sps:$4 sm:$0xff]  }
  0x67   : > { %1589 = vmatpush1.bf16.msra.mxu1 %v5770_v12  ;;  %v1005_v12 = vld [vmem:[%s7928_s30 + $0x50] sm:$0xff] }
  0x68   : > { %1590 = vmatprep.subr.bf16.mxu1 %v5772_v14  ;;  %1288 = vmatpush1.bf16.msra.mxu0 %v5777_v16  ;;  %v980_v14 = vadd.f32 %v964_v53, %v948_v1  ;;  %v968_v16 = vld [vmem:[%s7927_s22 + $0x68] sm:$0xff]  ;;  %v1021_v27 = vadd.f32 %v1005_v12, %v965_v10  ;;  %v1025_v53 = vadd.f32 %v1009_v45, %v969_v38  ;;  %v5834_v10 = vld [vmem:[%s6424_s29 + $0xd4] ss:$8 sps:$4 sm:$0xff]  }
  0x69   : > { %1289 = vmatprep.subr.bf16.mxu0 %v5780_v18  ;;  %v5796_v18 = vld [vmem:[%s6424_s29 + $0x10] ss:$8 sps:$4 sm:$0xff]   ;;  %v984_v41 = vadd.f32 %v968_v16, %v952_v29  ;;  %v5817_v1 = vld [vmem:[%s6424_s29 + $0x80] ss:$8 sps:$4 sm:$0xff]   ;;  %v5837_v12 = vld [vmem:[%s6424_s29 + $0xe4] ss:$8 sps:$4 sm:$0xff]  }
  0x6a   : > { %v992_v28 = vpack.c.bf16 %v982_v15, %v980_v14  ;;  %v1031_v39 = vpack.c.bf16 %v1021_v27, %v1019_v26  ;;  %v1033_v59 = vpack.c.bf16 %v1025_v53, %v1023_v52  ;;  %v5840_v14 = vld [vmem:[%s6424_s29 + $0xf4] ss:$8 sps:$4 sm:$0xff]   ;;  %v5838_v15 = vld [vmem:[%s6424_s29 + $0xf0] ss:$8 sps:$4 sm:$0xff]  }
  0x6b   : > { %1591 = vmatpush1.bf16.msra.mxu1 %v5776_v17  ;;  %v970_v17 = vld [vmem:[%s7927_s22 + $0x78] sm:$0xff]  ;;  %v1041_v26 = vld [vmem:[%s7929_s26 + $0x30] sm:$0xff] }
  0x6c   : > { %1592 = vmatprep.subr.bf16.mxu1 %v5778_v19  ;;  %1290 = vmatpush1.bf16.msra.mxu0 %v5783_v21  ;;  %v1032_v19 = vpack.c.bf16 %v1022_v4, %v1020_v3  ;;  %v5801_v21 = vld [vmem:[%s6424_s29 + $0x24] ss:$8 sps:$4 sm:$0xff]   ;;  %v5820_v3 = vld [vmem:[%s6424_s29 + $0x90] ss:$8 sps:$4 sm:$0xff]   ;;  %v1053_v27 = vpack.c.bf16 %v1041_v26, %v1039_v25 }
  0x6d   : > { %1291 = vmatprep.subr.bf16.mxu0 %v5786_v23  ;;  %v1010_v23 = vld [vmem:[%s7928_s30 + $0x78] sm:$0xff]  ;;  %v5825_v4 = vld [vmem:[%s6424_s29 + $0xa4] ss:$8 sps:$4 sm:$0xff]  }
  0x6e   : > { %v1046_v29 = vld [vmem:[%s7929_s26 + $0x58] sm:$0xff] }
  0x6f   : > { %1593 = vmatpush1.bf16.msra.mxu1 %v5782_v20  ;;  %v1008_v20 = vld [vmem:[%s7928_s30 + $0x68] sm:$0xff] }
  0x70   : > { %1594 = vmatprep.subr.bf16.mxu1 %v5784_v22  ;;  %1292 = vmatpush1.bf16.msra.mxu0 %v5789_v33  ;;  %v947_v22 = vld [vmem:[#allocation2 + $0x40] sm:$0xff]  ;;  %v1024_v31 = vadd.f32 %v1008_v20, %v968_v16  ;;  %v954_v33 = vld [vmem:[#allocation2 + $0x78] sm:$0xff]  ;;  %v1036_v16 = vld [vmem:[%s7929_s26 + $0x8] sm:$0xff] }
  0x71   : > { %1293 = vmatprep.subr.bf16.mxu0 %v5790_v34  ;;  %v5804_v34 = vld [vmem:[%s6424_s29 + $0x34] ss:$8 sps:$4 sm:$0xff]   ;;  %v979_v35 = vadd.f32 %v963_v9, %v947_v22  ;;  %v986_v42 = vadd.f32 %v970_v17, %v954_v33  ;;  %v5829_v9 = vld [vmem:[%s6424_s29 + $0xc0] ss:$8 sps:$4 sm:$0xff]  }
  0x72   : > { %v1037_v20 = vld [vmem:[%s7929_s26 + $0x10] sm:$0xff]  ;;  %v1040_v22 = vld [vmem:[%s7929_s26 + $0x28] sm:$0xff] }
  0x73   : > { %1595 = vmatpush1.bf16.msra.mxu1 %v5788_v32  ;;  %v1026_v32 = vadd.f32 %v1010_v23, %v970_v17  ;;  %v994_v54 = vpack.c.bf16 %v986_v42, %v984_v41  ;;  %v1038_v17 = vld [vmem:[%s7929_s26 + $0x18] sm:$0xff]  ;;  %v1093_v41 = vlaneseq }
  0x74   : > { %1294 = vmatpush1.bf16.msra.mxu0 %v5792_v43  ;;  %v5802_v43 = vld [vmem:[%s6424_s29 + $0x30] ss:$8 sps:$4 sm:$0xff]   ;;  %5495 = vmatprep.subr.bf16.mxu1 %v6277_v40 }
  0x75   : > { %1849 = vmatprep.subr.bf16.mxu0 %v5795_v57  ;;  %v1034_v44 = vpack.c.bf16 %v1026_v32, %v1024_v31  ;;  %v985_v57 = vadd.f32 %v969_v38, %v953_v48  ;;  %v1042_v23 = vld [vmem:[%s7929_s26 + $0x38] sm:$0xff]  ;;  %v1043_v31 = vld [vmem:[%s7929_s26 + $0x40] sm:$0xff]  ;;  %v1045_v32 = vld [vmem:[%s7929_s26 + $0x50] sm:$0xff]  ;;  %v6755_v42 = vshrl.u32 %v1093_v41, 7 }
  0x76   : > { %1597 = vmatmul.mubr.bf16.vlgmr.msra.gmra.mrb[0].mxu1 %v1027_v50  ;;  %v991_v50 = vpack.c.bf16 %v981_v36, %v979_v35  ;;  %v1055_v33 = vpack.c.bf16 %v1045_v32, %v1043_v31  ;;  %v1050_v35 = vld [vmem:[%s7929_s26 + $0x78] sm:$0xff]  ;;  %v1049_v38 = vld [vmem:[%s7929_s26 + $0x70] sm:$0xff] }
  0x77   : > { %1606 = vmatprep.mubr.bf16.mxu1 %v1030_v55  ;;  %1296 = vmatmul.mubr.bf16.vlgmr.msra.gmra.mrb[0].mxu0 %v987_v60  ;;  %v5808_v55 = vld [vmem:[%s6424_s29 + $0x50] ss:$8 sps:$4 sm:$0xff]   ;;  %v5811_v60 = vld [vmem:[%s6424_s29 + $0x60] ss:$8 sps:$4 sm:$0xff]   ;;  %v993_v61 = vpack.c.bf16 %v985_v57, %v983_v56  ;;  %v6766_v45 = vsub.s32 1, %v6755_v42 }
  0x78   : > { %1305 = vmatprep.mubr.bf16.mxu0 %v990_v0  ;;  %1850 = vmatpush1.bf16.msra.mxu0 %v5793_v2  ;;  %v5819_v0 = vld [vmem:[%s6424_s29 + $0x84] ss:$8 sps:$4 sm:$0xff]   ;;  %v5822_v2 = vld [vmem:[%s6424_s29 + $0x94] ss:$8 sps:$4 sm:$0xff]  }
  0x79   : > { %1851 = vmatprep.subr.bf16.mxu0 %v5798_v6  ;;  %v5828_v6 = vld [vmem:[%s6424_s29 + $0xb4] ss:$8 sps:$4 sm:$0xff]  }
  0x7c   : > { %1852 = vmatpush1.bf16.msra.mxu0 %v5796_v18  ;;  %v1052_v18 = vpack.c.bf16 %v1038_v17, %v1036_v16 }
  0x7d   : > { %1853 = vmatprep.subr.bf16.mxu0 %v5801_v21 }
  0x7e   : > { %1607 = vmatmul.mubr.bf16.gmra.mrb[4].mxu1 %v1029_v13  ;;  %v5835_v13 = vld [vmem:[%s6424_s29 + $0xe0] ss:$8 sps:$4 sm:$0xff]   ;;  %s7930_s29 = scalar_lea.vmem %s7873_s7, %s6401_s20 }
  0x7f   : > { %1616 = vmatprep.mubr.bf16.mxu1 %v1032_v19  ;;  %1306 = vmatmul.mubr.bf16.gmra.mrb[4].mxu0 %v989_v24  ;;  %v1035_v19 = vld [vmem:[%s7929_s26] sm:$0xff]  ;;  %v1054_v24 = vpack.c.bf16 %v1042_v23, %v1040_v22 }
  0x80   : > { %1315 = vmatprep.mubr.bf16.mxu0 %v992_v28  ;;  %1854 = vmatpush1.bf16.msra.mxu0 %v5799_v30  ;;  %v1051_v21 = vpack.c.bf16 %v1037_v20, %v1035_v19  ;;  %v1044_v28 = vld [vmem:[%s7929_s26 + $0x48] sm:$0xff] }
  0x81   : > { %1855 = vmatprep.subr.bf16.mxu0 %v5804_v34  ;;  %v1056_v30 = vpack.c.bf16 %v1046_v29, %v1044_v28  ;;  %v1048_v34 = vld [vmem:[%s7929_s26 + $0x68] sm:$0xff] }
  0x82   : > { %v1058_v36 = vpack.c.bf16 %v1050_v35, %v1048_v34 }
  0x84   : > { %1856 = vmatpush1.bf16.msra.mxu0 %v5802_v43  ;;  %v6758_v43 = vsub.s32 0, %v6755_v42 }
  0x85   : > { %1857 = vmatprep.subr.bf16.mxu0 %v5807_v46  ;;  %v1091_v46 = vld [vmem:[%s7932_s3] sm:$0x3] }
  0x86   : > { %1617 = vmatmul.mubr.bf16.gmra.mrb[8].mxu1 %v1031_v39  ;;  %v1057_v39 = vpack.c.bf16 %v1049_v38, %v1047_v37  ;;  %v6783_v52 = vrot.slane %v1091_v46, %v6766_v45 }
  0x87   : > { %1626 = vmatprep.mubr.bf16.mxu1 %v1034_v44  ;;  %1316 = vmatmul.mubr.bf16.gmra.mrb[8].mxu0 %v991_v50  ;;  %v1392_v44 = vld [vmem:[%s7930_s29] sm:$0x3]  ;;  %v6780_v50 = vrot.slane %v1091_v46, %v6758_v43 }
  0x88   : > { %1325 = vmatprep.mubr.bf16.mxu0 %v994_v54  ;;  %1858 = vmatpush1.bf16.msra.mxu0 %v5805_v49  ;;  %v6774_v47 = vrot.slane %v1392_v44, %v6758_v43  ;;  %v6777_v49 = vrot.slane %v1392_v44, %v6766_v45 }
  0x89   : > { %1859 = vmatprep.subr.bf16.mxu0 %v5810_v51 }
  0x8c   : > { %1860 = vmatpush1.bf16.msra.mxu0 %v5808_v55 }
  0x8d   : > { %1861 = vmatprep.subr.bf16.mxu0 %v5813_v58 }
  0x8e   : > { %1627 = vmatmul.mubr.bf16.gmra.mrb[12].mxu1 %v1033_v59 }
  0x8f   : > { %1326 = vmatmul.mubr.bf16.gmra.mrb[12].mxu0 %v993_v61  ;;  %5497 = vmatprep.mubr.msk.bf16.mxu1 %vm6278_vm0, %v6277_v40 }
  0x90   : > { %1862 = vmatpush1.bf16.msra.mxu0 %v5811_v60  ;;  %1881 = vmatprep.mubr.bf16.mxu0 %v1052_v18 }
  0x91   : > { %1863 = vmatprep.subr.bf16.mxu0 %v5816_v62 }
  0x94   : > { %1864 = vmatpush1.bf16.msra.mxu0 %v5814_v63 }
  0x95   : > { %1865 = vmatprep.subr.bf16.mxu0 %v5819_v0 }
  0x98   : > { %1866 = vmatpush1.bf16.msra.mxu0 %v5817_v1 }
  0x99   : > { %1867 = vmatprep.subr.bf16.mxu0 %v5822_v2 }
  0x9c   : > { %1868 = vmatpush1.bf16.msra.mxu0 %v5820_v3 }
  0x9d   : > { %1869 = vmatprep.subr.bf16.mxu0 %v5825_v4 }
  0xa0   : > { %1870 = vmatpush1.bf16.msra.mxu0 %v5823_v5 }
  0xa1   : > { %1871 = vmatprep.subr.bf16.mxu0 %v5828_v6 }
  0xa4   : > { %1872 = vmatpush1.bf16.msra.mxu0 %v5826_v7 }
  0xa5   : > { %1873 = vmatprep.subr.bf16.mxu0 %v5831_v8 }
  0xa8   : > { %1874 = vmatpush1.bf16.msra.mxu0 %v5829_v9 }
  0xa9   : > { %1875 = vmatprep.subr.bf16.mxu0 %v5834_v10 }
  0xac   : > { %1876 = vmatpush1.bf16.msra.mxu0 %v5832_v11 }
  0xad   : > { %1877 = vmatprep.subr.bf16.mxu0 %v5837_v12 }
  0xb0   : > { %1878 = vmatpush1.bf16.msra.mxu0 %v5835_v13 }
  0xb1   : > { %1879 = vmatprep.subr.bf16.mxu0 %v5840_v14 }
  0xb4   : > { %1880 = vmatpush1.bf16.msra.mxu0 %v5838_v15 }
  0xb5   : > { %5543 = vmatprep.subr.bf16.mxu0 %v6277_v40 }
  0xb7   : > { %1882 = vmatmul.mubr.bf16.vlgmr.msra.gmra.mrb[16].mxu0 %v1051_v21 }
  0xb8   : > { %1891 = vmatprep.mubr.bf16.mxu0 %v1054_v24 }
  0xbf   : > { %1892 = vmatmul.mubr.bf16.gmra.mrb[20].mxu0 %v1053_v27 }
  0xc0   : > { %1901 = vmatprep.mubr.bf16.mxu0 %v1056_v30 }
  0xc7   : > { %1902 = vmatmul.mubr.bf16.gmra.mrb[24].mxu0 %v1055_v33 }
  0xc8   : > { %1911 = vmatprep.mubr.bf16.mxu0 %v1058_v36 }
  0xcf   : > { %1912 = vmatmul.mubr.bf16.gmra.mrb[28].mxu0 %v1057_v39 }
  0xd0   : > { %5545 = vmatprep.mubr.msk.bf16.mxu0 %vm6278_vm0, %v6277_v40 }
 0x149   : > { %v1598_v48 = vpop.f32.mrb[0].mxu1 }
 0x14a   : > { %v1600_v51 = vpop.f32.mrb[1].mxu1  ;;  %v1599_v54 = vadd.f32 %v1598_v48, %v6774_v47  ;;  %v1297_v57 = vpop.f32.mrb[0].mxu0 }
 0x14b   : > { %v1602_v53 = vpop.f32.mrb[2].mxu1  ;;  %v1601_v58 = vadd.f32 %v1600_v51, %v6777_v49  ;;  %v1298_v60 = vadd.f32 %v1297_v57, %v6780_v50  ;;  %v1299_v61 = vpop.f32.mrb[1].mxu0 }
 0x14c   : > { %v1603_v55 = vadd.f32 %v1602_v53, %v6774_v47  ;;  %v1604_v56 = vpop.f32.mrb[3].mxu1  ;;  %v1300_v63 = vadd.f32 %v1299_v61, %v6783_v52  ;;  %v1301_v0 = vpop.f32.mrb[2].mxu0 }
 0x14d   : > { %v1605_v59 = vadd.f32 %v1604_v56, %v6777_v49  ;;  %v1336_v2 = vmul.f32 0.088388346, %v1298_v60  ;;  %v1302_v3 = vadd.f32 %v1301_v0, %v6780_v50  ;;  %v1303_v4 = vpop.f32.mrb[3].mxu0 }
 0x14e   : > { %v1637_v62 = vpack.c.bf16 %v1603_v55, %v1599_v54  ;;  %v1337_v5 = vmul.f32 0.088388346, %v1300_v63  ;;  %v1304_v6 = vadd.f32 %v1303_v4, %v6783_v52 }
 0x14f   : > { %v1638_v1 = vpack.c.bf16 %v1605_v59, %v1601_v58  ;;  %v1338_v7 = vmul.f32 0.088388346, %v1302_v3 }
 0x150   : > { %5496 = vmatpush3.bf16.xpose.msra.mxu1 %v1637_v62  ;;  %v1339_v10 = vmul.f32 0.088388346, %v1304_v6 }
 0x151   : > { %v1608_v8 = vpop.f32.mrb[4].mxu1  ;;  %5544 = vmatpush3.bf16.xpose.msra.mxu0 %v1638_v1  ;;  %5501 = vmatprep.subr.bf16.mxu1 %v6277_v40  ;;  %v1352_v11 = vpack.c.bf16 %v1338_v7, %v1336_v2 }
 0x152   : > { %v1610_v9 = vpop.f32.mrb[5].mxu1  ;;  %5555 = vmatprep.subr.bf16.mxu0 %v6277_v40  ;;  %v1609_v14 = vadd.f32 %v1608_v8, %v6774_v47  ;;  %v1353_v16 = vpack.c.bf16 %v1339_v10, %v1337_v5  ;;  %v1307_v17 = vpop.f32.mrb[4].mxu0 }
 0x153   : > { %v6796_v12 = vadd.f32 %v1610_v9, %v6777_v49  ;;  %v1612_v13 = vpop.f32.mrb[6].mxu1  ;;  %v1308_v19 = vadd.f32 %v1307_v17, %v6780_v50  ;;  %v1309_v20 = vpop.f32.mrb[5].mxu0 }
 0x154   : > { %v1613_v15 = vadd.f32 %v1612_v13, %v6774_v47  ;;  %v1614_v18 = vpop.f32.mrb[7].mxu1  ;;  %v1310_v23 = vadd.f32 %v1309_v20, %v6783_v52  ;;  %v1311_v24 = vpop.f32.mrb[6].mxu0 }
 0x155   : > { %v6802_v21 = vadd.f32 %v1614_v18, %v6777_v49  ;;  %v1340_v25 = vmul.f32 0.088388346, %v1308_v19  ;;  %v1312_v26 = vadd.f32 %v1311_v24, %v6780_v50  ;;  %v1313_v28 = vpop.f32.mrb[7].mxu0 }
 0x156   : > { %v1639_v22 = vpack.c.bf16 %v1613_v15, %v1609_v14  ;;  %v6808_v29 = vmul.f32 0.088388346, %v1310_v23  ;;  %v1314_v30 = vadd.f32 %v1313_v28, %v6783_v52 }
 0x157   : > { %5498 = vmatmul.mubr.bf16.vlgmr.msra.gmra.mrb[16].mxu1 %v1352_v11  ;;  %v1640_v27 = vpack.c.bf16 %v6802_v21, %v6796_v12  ;;  %v1342_v31 = vmul.f32 0.088388346, %v1312_v26 }
 0x158   : > { %5502 = vmatpush3.bf16.xpose.msra.mxu1 %v1639_v22  ;;  %5503 = vmatprep.mubr.msk.bf16.mxu1 %vm6278_vm0, %v6277_v40  ;;  %v6815_v35 = vmul.f32 0.088388346, %v1314_v30 }
 0x159   : > { %v1618_v32 = vpop.f32.mrb[8].mxu1  ;;  %5507 = vmatprep.subr.bf16.mxu1 %v6277_v40  ;;  %5546 = vmatmul.mubr.bf16.vlgmr.msra.gmra.mrb[32].mxu0 %v1353_v16  ;;  %v1354_v36 = vpack.c.bf16 %v1342_v31, %v1340_v25 }
 0x15a   : > { %v1619_v33 = vadd.f32 %v1618_v32, %v6774_v47  ;;  %v1620_v34 = vpop.f32.mrb[9].mxu1  ;;  %5557 = vmatprep.mubr.msk.bf16.mxu0 %vm6278_vm0, %v6277_v40  ;;  %v1355_v41 = vpack.c.bf16 %v6815_v35, %v6808_v29  ;;  %v1317_v44 = vpop.f32.mrb[8].mxu0 }
 0x15b   : > { %v1621_v37 = vadd.f32 %v1620_v34, %v6777_v49  ;;  %v1622_v38 = vpop.f32.mrb[10].mxu1  ;;  %v1318_v48 = vadd.f32 %v1317_v44, %v6780_v50  ;;  %v1319_v51 = vpop.f32.mrb[9].mxu0 }
 0x15c   : > { %v1623_v39 = vadd.f32 %v1622_v38, %v6774_v47  ;;  %v1624_v46 = vpop.f32.mrb[11].mxu1  ;;  %v1320_v55 = vadd.f32 %v1319_v51, %v6783_v52  ;;  %v1321_v56 = vpop.f32.mrb[10].mxu0 }
 0x15d   : > { %v1625_v53 = vadd.f32 %v1624_v46, %v6777_v49  ;;  %v1344_v57 = vmul.f32 0.088388346, %v1318_v48  ;;  %v1322_v58 = vadd.f32 %v1321_v56, %v6780_v50  ;;  %v1323_v60 = vpop.f32.mrb[11].mxu0 }
 0x15e   : > { %v1641_v54 = vpack.c.bf16 %v1623_v39, %v1619_v33  ;;  %v1345_v61 = vmul.f32 0.088388346, %v1320_v55  ;;  %v1324_v62 = vadd.f32 %v1323_v60, %v6783_v52 }
 0x15f   : > { %5504 = vmatmul.mubr.bf16.vlgmr.msra.gmra.mrb[20].mxu1 %v1354_v36  ;;  %v1642_v59 = vpack.c.bf16 %v1625_v53, %v1621_v37  ;;  %v1346_v63 = vmul.f32 0.088388346, %v1322_v58  ;;  %v1677_v53 = vld [vmem:[%s7933_s24] sm:$0x3] }
 0x160   : > { %5508 = vmatpush3.bf16.xpose.msra.mxu1 %v1641_v54  ;;  %5509 = vmatprep.mubr.msk.bf16.mxu1 %vm6278_vm0, %v6277_v40  ;;  %v1347_v3 = vmul.f32 0.088388346, %v1324_v62  ;;  %v1682_v54 = vrot.slane %v1677_v53, %v6758_v43  ;;  %v1686_v55 = vrot.slane %v1677_v53, %v6766_v45 }
 0x161   : > { %v1628_v0 = vpop.f32.mrb[12].mxu1  ;;  %5513 = vmatprep.subr.bf16.mxu1 %v6277_v40  ;;  %5556 = vmatpush3.bf16.xpose.msra.mxu0 %v1642_v59  ;;  %v1356_v4 = vpack.c.bf16 %v1346_v63, %v1344_v57 }
 0x162   : > { %v1629_v1 = vadd.f32 %v1628_v0, %v6774_v47  ;;  %v1630_v2 = vpop.f32.mrb[13].mxu1  ;;  %5567 = vmatprep.subr.bf16.mxu0 %v6277_v40  ;;  %v1357_v8 = vpack.c.bf16 %v1347_v3, %v1345_v61  ;;  %v1327_v9 = vpop.f32.mrb[12].mxu0 }
 0x163   : > { %v6834_v5 = vadd.f32 %v1630_v2, %v6777_v49  ;;  %v1632_v6 = vpop.f32.mrb[14].mxu1  ;;  %v1328_v11 = vadd.f32 %v1327_v9, %v6780_v50  ;;  %v1329_v13 = vpop.f32.mrb[13].mxu0 }
 0x164   : > { %v1633_v7 = vadd.f32 %v1632_v6, %v6774_v47  ;;  %v1634_v10 = vpop.f32.mrb[15].mxu1  ;;  %v1330_v16 = vadd.f32 %v1329_v13, %v6783_v52  ;;  %v1331_v17 = vpop.f32.mrb[14].mxu0 }
 0x165   : > { %v6839_v14 = vadd.f32 %v1634_v10, %v6777_v49  ;;  %v1348_v18 = vmul.f32 0.088388346, %v1328_v11  ;;  %v1332_v19 = vadd.f32 %v1331_v17, %v6780_v50  ;;  %v1333_v20 = vpop.f32.mrb[15].mxu0 }
 0x166   : > { %v1643_v15 = vpack.c.bf16 %v1633_v7, %v1629_v1  ;;  %v6845_v22 = vmul.f32 0.088388346, %v1330_v16  ;;  %v1334_v49 = vadd.f32 %v1333_v20, %v6783_v52 }
 0x167   : > { %5510 = vmatmul.mubr.bf16.vlgmr.msra.gmra.mrb[24].mxu1 %v1356_v4  ;;  %v1644_v47 = vpack.c.bf16 %v6839_v14, %v6834_v5  ;;  %v1350_v23 = vmul.f32 0.088388346, %v1332_v19 }
 0x168   : > { %5514 = vmatpush3.bf16.xpose.msra.mxu1 %v1643_v15  ;;  %5515 = vmatprep.mubr.msk.bf16.mxu1 %vm6278_vm0, %v6277_v40  ;;  %v6851_v24 = vmul.f32 0.088388346, %v1334_v49 }
 0x169   : > { %5558 = vmatmul.mubr.bf16.vlgmr.msra.gmra.mrb[36].mxu0 %v1357_v8  ;;  %5519 = vmatprep.subr.bf16.mxu1 %v6277_v40  ;;  %v1358_v50 = vpack.c.bf16 %v1350_v23, %v1348_v18 }
 0x16a   : > { %5569 = vmatprep.mubr.msk.bf16.mxu0 %vm6278_vm0, %v6277_v40  ;;  %v1359_v25 = vpack.c.bf16 %v6851_v24, %v6845_v22 }
 0x16f   : > { %5516 = vmatmul.mubr.bf16.vlgmr.msra.gmra.mrb[28].mxu1 %v1358_v50 }
 0x170   : > { %5521 = vmatprep.mubr.msk.bf16.mxu1 %vm6278_vm0, %v6277_v40 }
 0x18a   : > { %v1883_v26 = vpop.f32.mrb[16].mxu0 }
 0x18b   : > { %v1885_v52 = vpop.f32.mrb[17].mxu0  ;;  %v1884_v56 = vadd.f32 %v1883_v26, %v1682_v54 }
 0x18c   : > { %v1887_v28 = vpop.f32.mrb[18].mxu0  ;;  %v1886_v57 = vadd.f32 %v1885_v52, %v1686_v55 }
 0x18d   : > { %v1889_v30 = vpop.f32.mrb[19].mxu0  ;;  %v1888_v58 = vadd.f32 %v1887_v28, %v1682_v54 }
 0x18e   : > { %v1890_v59 = vadd.f32 %v1889_v30, %v1686_v55 }
 0x18f   : > { %v1922_v62 = vpack.c.bf16 %v1888_v58, %v1884_v56 }
 0x190   : > { %v1923_v63 = vpack.c.bf16 %v1890_v59, %v1886_v57 }
 0x191   : > { %5520 = vmatpush3.bf16.msra.mxu1 %v1922_v62 }
 0x192   : > { %v1893_v31 = vpop.f32.mrb[20].mxu0  ;;  %5568 = vmatpush3.bf16.msra.mxu0 %v1923_v63  ;;  %5525 = vmatprep.subr.bf16.mxu1 %v6277_v40 }
 0x193   : > { %v1895_v32 = vpop.f32.mrb[21].mxu0  ;;  %v6866_v60 = vadd.f32 %v1893_v31, %v1682_v54  ;;  %5579 = vmatprep.subr.bf16.mxu0 %v6277_v40 }
 0x194   : > { %v1897_v33 = vpop.f32.mrb[22].mxu0  ;;  %v6868_v61 = vadd.f32 %v1895_v32, %v1686_v55 }
 0x195   : > { %v1899_v34 = vpop.f32.mrb[23].mxu0  ;;  %v6870_v0 = vadd.f32 %v1897_v33, %v1682_v54 }
 0x196   : > { %v6872_v1 = vadd.f32 %v1899_v34, %v1686_v55 }
 0x197   : > { %v1924_v2 = vpack.c.bf16 %v6870_v0, %v6866_v60 }
 0x198   : > { %v1925_v3 = vpack.c.bf16 %v6872_v1, %v6868_v61 }
 0x19a   : > { %v1903_v36 = vpop.f32.mrb[24].mxu0 }
 0x19b   : > { %v1905_v37 = vpop.f32.mrb[25].mxu0  ;;  %v6878_v4 = vadd.f32 %v1903_v36, %v1682_v54 }
 0x19c   : > { %v1907_v38 = vpop.f32.mrb[26].mxu0  ;;  %v6880_v6 = vadd.f32 %v1905_v37, %v1686_v55 }
 0x19d   : > { %v1909_v39 = vpop.f32.mrb[27].mxu0  ;;  %v6883_v7 = vadd.f32 %v1907_v38, %v1682_v54 }
 0x19e   : > { %v6885_v8 = vadd.f32 %v1909_v39, %v1686_v55 }
 0x19f   : > { %v1926_v9 = vpack.c.bf16 %v6883_v7, %v6878_v4 }
 0x1a0   : > { %v1927_v10 = vpack.c.bf16 %v6885_v8, %v6880_v6 }
 0x1a2   : > { %v1913_v44 = vpop.f32.mrb[28].mxu0 }
 0x1a3   : > { %v1915_v46 = vpop.f32.mrb[29].mxu0  ;;  %v6892_v11 = vadd.f32 %v1913_v44, %v1682_v54 }
 0x1a4   : > { %v1917_v48 = vpop.f32.mrb[30].mxu0  ;;  %v6894_v13 = vadd.f32 %v1915_v46, %v1686_v55 }
 0x1a5   : > { %v1919_v51 = vpop.f32.mrb[31].mxu0  ;;  %v6896_v15 = vadd.f32 %v1917_v48, %v1682_v54 }
 0x1a6   : > { %v6898_v16 = vadd.f32 %v1919_v51, %v1686_v55 }
 0x1a7   : > { %v1928_v17 = vpack.c.bf16 %v6896_v15, %v6892_v11 }
 0x1a8   : > { %v1929_v18 = vpack.c.bf16 %v6898_v16, %v6894_v13 }
 0x22a   : > { %v1964_v19 = vpop.f32.mrb[16].mxu1 }
 0x22b   : > { %v2095_v20 = vsel %vm2094_vm1, %v1964_v19, -inf  ;;  %v5499_v49 = vpop.f32.mrb[17].mxu1 }
 0x22c   : > { %2096 = vmax.xlane.f32.xlu0 %v2095_v20  ;;  %v1967_v23 = vpop.f32.mrb[18].mxu1  ;;  %v6905_v50 = vpop.f32.mrb[32].mxu0 }
 0x22d   : > { %v5500_v26 = vpop.f32.mrb[19].mxu1  ;;  %v5547_v52 = vpop.f32.mrb[33].mxu0  ;;  %v2098_v30 = vsel %vm2094_vm1, %v1967_v23, -inf }
 0x22e   : > { %v6907_v28 = vpop.f32.mrb[34].mxu0 }
 0x22f   : > { %v5548_v31 = vpop.f32.mrb[35].mxu0 }
 0x230   : > { %2099 = vmax.xlane.f32.xlu0 %v2098_v30 }
 0x232   : > { %v2005_v32 = vpop.f32.mrb[20].mxu1 }
 0x233   : > { %v2101_v33 = vsel %vm2094_vm1, %v2005_v32, -inf  ;;  %v5505_v34 = vpop.f32.mrb[21].mxu1 }
 0x234   : > { %2102 = vmax.xlane.f32.xlu1 %v2101_v33  ;;  %v2008_v36 = vpop.f32.mrb[22].mxu1 }
 0x235   : > { %v5506_v37 = vpop.f32.mrb[23].mxu1  ;;  %v2104_v38 = vsel %vm2094_vm1, %v2008_v36, -inf }
 0x238   : > { %2105 = vmax.xlane.f32.xlu1 %v2104_v38 }
 0x23a   : > { %v2046_v39 = vpop.f32.mrb[24].mxu1 }
 0x23b   : > { %v5511_v44 = vpop.f32.mrb[25].mxu1  ;;  %v2107_v46 = vsel %vm2094_vm1, %v2046_v39, -inf }
 0x23c   : > { %2108 = vmax.xlane.f32.xlu0 %v2107_v46  ;;  %v2049_v48 = vpop.f32.mrb[26].mxu1  ;;  %v6913_v51 = vpop.f32.mrb[36].mxu0 }
 0x23d   : > { %v2110_v53 = vsel %vm2094_vm1, %v2049_v48, -inf  ;;  %v5512_v54 = vpop.f32.mrb[27].mxu1  ;;  %v5559_v55 = vpop.f32.mrb[37].mxu0 }
 0x23e   : > { %2111 = vmax.xlane.f32.xlu1 %v2110_v53  ;;  %v6916_v56 = vpop.f32.mrb[38].mxu0 }
 0x23f   : > { %v5560_v57 = vpop.f32.mrb[39].mxu0 }
 0x242   : > { %v2087_v58 = vpop.f32.mrb[28].mxu1 }
 0x243   : > { %v5517_v59 = vpop.f32.mrb[29].mxu1  ;;  %v2113_v62 = vsel %vm2094_vm1, %v2087_v58, -inf }
 0x244   : > { %2114 = vmax.xlane.f32.xlu0 %v2113_v62  ;;  %v2090_v63 = vpop.f32.mrb[30].mxu1 }
 0x245   : > { %v2116_v20 = vsel %vm2094_vm1, %v2090_v63, -inf  ;;  %v5518_v49 = vpop.f32.mrb[31].mxu1 }
 0x246   : > { %2117 = vmax.xlane.f32.xlu1 %v2116_v20 }
 0x2b9   : > { %v2097_v26 = vpop.xlane.xlu0 %2096 }
 0x2ba   : > { %v2119_v52 = vsub.f32 %v1964_v19, %v2097_v26 }
 0x2bc   : > { %v2127_v30 = vmul.f32 1.442695, %v2119_v52 }
 0x2bd   : > { %v2100_v31 = vpop.xlane.xlu0 %2099 }
 0x2be   : > { %6081 = vpow2.f32 %v2127_v30  ;;  %v2120_v33 = vsub.f32 %v1967_v23, %v2100_v31 }
 0x2c0   : > { %v2129_v34 = vmul.f32 1.442695, %v2120_v33 }
 0x2c1   : > { %v2103_v37 = vpop.xlane.xlu1 %2102 }
 0x2c2   : > { %6083 = vpow2.f32 %v2129_v34  ;;  %v2121_v38 = vsub.f32 %v2005_v32, %v2103_v37 }
 0x2c4   : > { %v2131_v44 = vmul.f32 1.442695, %v2121_v38 }
 0x2c5   : > { %v2106_v46 = vpop.xlane.xlu1 %2105 }
 0x2c6   : > { %6085 = vpow2.f32 %v2131_v44  ;;  %v2122_v53 = vsub.f32 %v2008_v36, %v2106_v46 }
 0x2c8   : > { %v6082_v54 = vpop.eup %6081  ;;  %v2133_v55 = vmul.f32 1.442695, %v2122_v53 }
 0x2c9   : > { %v2109_v57 = vpop.xlane.xlu0 %2108  ;;  %v2143_v59 = vsel %vm2094_vm1, %v6082_v54, 0.0 }
 0x2ca   : > { %6087 = vpow2.f32 %v2133_v55  ;;  %v2123_v62 = vsub.f32 %v2046_v39, %v2109_v57  ;;  %2144 = vadd.xlane.f32.xlu0 %v2143_v59 }
 0x2cb   : > { %v2112_v19 = vpop.xlane.xlu1 %2111 }
 0x2cc   : > { %v6084_v20 = vpop.eup %6083  ;;  %v2135_v49 = vmul.f32 1.442695, %v2123_v62  ;;  %v2124_v23 = vsub.f32 %v2049_v48, %v2112_v19  ;;  %v2563_v62 = vsel %vm2094_vm1, %v6905_v50, -inf  ;;  %v2566_v19 = vsel %vm2094_vm1, %v6907_v28, -inf }
 0x2cd   : > { %v2146_v26 = vsel %vm2094_vm1, %v6084_v20, 0.0 }
 0x2ce   : > { %6089 = vpow2.f32 %v2135_v49  ;;  %v2137_v32 = vmul.f32 1.442695, %v2124_v23  ;;  %2147 = vadd.xlane.f32.xlu1 %v2146_v26 }
 0x2d0   : > { %v6086_v52 = vpop.eup %6085  ;;  %6091 = vpow2.f32 %v2137_v32 }
 0x2d1   : > { %v2115_v36 = vpop.xlane.xlu0 %2114  ;;  %v2149_v30 = vsel %vm2094_vm1, %v6086_v52, 0.0 }
 0x2d2   : > { %v2125_v31 = vsub.f32 %v2087_v58, %v2115_v36  ;;  %2150 = vadd.xlane.f32.xlu0 %v2149_v30 }
 0x2d3   : > { %v2118_v33 = vpop.xlane.xlu1 %2117 }
 0x2d4   : > { %v6088_v34 = vpop.eup %6087  ;;  %v2139_v39 = vmul.f32 1.442695, %v2125_v31  ;;  %v2126_v37 = vsub.f32 %v2090_v63, %v2118_v33 }
 0x2d5   : > { %v2152_v38 = vsel %vm2094_vm1, %v6088_v34, 0.0 }
 0x2d6   : > { %6093 = vpow2.f32 %v2139_v39  ;;  %v2141_v48 = vmul.f32 1.442695, %v2126_v37  ;;  %2153 = vadd.xlane.f32.xlu1 %v2152_v38 }
 0x2d8   : > { %v6090_v44 = vpop.eup %6089  ;;  %6095 = vpow2.f32 %v2141_v48 }
 0x2d9   : > { %v2155_v46 = vsel %vm2094_vm1, %v6090_v44, 0.0 }
 0x2da   : > { %v6092_v53 = vpop.eup %6091  ;;  %2156 = vadd.xlane.f32.xlu0 %v2155_v46 }
 0x2db   : > { %v2158_v55 = vsel %vm2094_vm1, %v6092_v53, 0.0 }
 0x2dc   : > { %2159 = vadd.xlane.f32.xlu1 %v2158_v55 }
 0x2e0   : > { %v6094_v58 = vpop.eup %6093 }
 0x2e1   : > { %v2161_v57 = vsel %vm2094_vm1, %v6094_v58, 0.0 }
 0x2e2   : > { %v6096_v59 = vpop.eup %6095  ;;  %2162 = vadd.xlane.f32.xlu0 %v2161_v57 }
 0x2e3   : > { %v2164_v63 = vsel %vm2094_vm1, %v6096_v59, 0.0 }
 0x2e4   : > { %2165 = vadd.xlane.f32.xlu1 %v2164_v63 }
 0x2e6   : > { %2564 = vmax.xlane.f32.xlu0 %v2563_v62 }
 0x2e8   : > { %2567 = vmax.xlane.f32.xlu1 %v2566_v19 }
 0x357   : > { %v2145_v49 = vpop.xlane.xlu0 %2144 }
 0x358   : > { %6097 = vrcp.f32 %v2145_v49 }
 0x35b   : > { %v2148_v23 = vpop.xlane.xlu1 %2147 }
 0x35c   : > { %6099 = vrcp.f32 %v2148_v23 }
 0x35f   : > { %v2151_v26 = vpop.xlane.xlu0 %2150 }
 0x360   : > { %6101 = vrcp.f32 %v2151_v26 }
 0x362   : > { %v6098_v36 = vpop.eup %6097 }
 0x363   : > { %v2154_v32 = vpop.xlane.xlu1 %2153  ;;  %v6932_v31 = vmul.f32 %v6098_v36, %v6082_v54 }
 0x364   : > { %6103 = vrcp.f32 %v2154_v32 }
 0x366   : > { %v6100_v30 = vpop.eup %6099 }
 0x367   : > { %v6934_v33 = vmul.f32 %v6100_v30, %v6084_v20  ;;  %v2157_v39 = vpop.xlane.xlu0 %2156 }
 0x368   : > { %6105 = vrcp.f32 %v2157_v39 }
 0x369   : > { %v2160_v37 = vpop.xlane.xlu1 %2159  ;;  %v2215_v38 = vpack.c.bf16 %v6934_v33, %v6932_v31 }
 0x36a   : > { %6107 = vrcp.f32 %v2160_v37  ;;  %v6102_v48 = vpop.eup %6101 }
 0x36b   : > { %5522 = vmatmul.mubr.msk.bf16.vlgmr.msra.gmra.mrb[32].mxu1 %vm2094_vm1, %v2215_v38  ;;  %v6945_v20 = vmul.f32 %v6102_v48, %v6086_v52  ;;  %v2578_v48 = vsel %vm2094_vm1, %v6916_v56, -inf }
 0x36c   : > { %5526 = vmatpush3.bf16.msra.mxu1 %v1924_v2  ;;  %5527 = vmatprep.mubr.msk.bf16.mxu1 %vm6278_vm0, %v6277_v40 }
 0x36d   : > { %5531 = vmatprep.subr.bf16.mxu1 %v6277_v40 }
 0x36e   : > { %v6104_v54 = vpop.eup %6103 }
 0x36f   : > { %v6947_v46 = vmul.f32 %v6104_v54, %v6088_v34  ;;  %v2163_v55 = vpop.xlane.xlu0 %2162 }
 0x370   : > { %6109 = vrcp.f32 %v2163_v55 }
 0x371   : > { %v2166_v57 = vpop.xlane.xlu1 %2165  ;;  %v2216_v63 = vpack.c.bf16 %v6947_v46, %v6945_v20 }
 0x372   : > { %6111 = vrcp.f32 %v2166_v57  ;;  %v6106_v62 = vpop.eup %6105 }
 0x373   : > { %5528 = vmatmul.mubr.msk.bf16.vlgmr.msra.gmra.mrb[36].mxu1 %vm2094_vm1, %v2216_v63  ;;  %v6960_v2 = vmul.f32 %v6106_v62, %v6090_v44  ;;  %v2565_v11 = vpop.xlane.xlu0 %2564 }
 0x374   : > { %v6108_v60 = vpop.eup %6107  ;;  %5532 = vmatpush3.bf16.msra.mxu1 %v1926_v9  ;;  %5533 = vmatprep.mubr.msk.bf16.mxu1 %vm6278_vm0, %v6277_v40  ;;  %v2587_v44 = vsub.f32 %v6905_v50, %v2565_v11 }
 0x375   : > { %v6957_v0 = vmul.f32 %v6108_v60, %v6092_v53  ;;  %5537 = vmatprep.subr.bf16.mxu1 %v6277_v40  ;;  %v2568_v15 = vpop.xlane.xlu1 %2567 }
 0x376   : > { %v2595_v26 = vmul.f32 1.442695, %v2587_v44 }
 0x377   : > { %v2217_v52 = vpack.c.bf16 %v6957_v0, %v6960_v2 }
 0x378   : > { %6113 = vpow2.f32 %v2595_v26 }
 0x37a   : > { %v6110_v34 = vpop.eup %6109 }
 0x37b   : > { %5534 = vmatmul.mubr.msk.bf16.vlgmr.msra.gmra.mrb[40].mxu1 %vm2094_vm1, %v2217_v52  ;;  %v6973_v7 = vmul.f32 %v6110_v34, %v6094_v58 }
 0x37c   : > { %v6112_v19 = vpop.eup %6111  ;;  %5538 = vmatpush3.bf16.msra.mxu1 %v1928_v17  ;;  %5539 = vmatprep.mubr.msk.bf16.mxu1 %vm6278_vm0, %v6277_v40 }
 0x37d   : > { %v6970_v4 = vmul.f32 %v6112_v19, %v6096_v59  ;;  %5549 = vmatprep.subr.bf16.mxu1 %v6277_v40  ;;  %v2588_v59 = vsub.f32 %v6907_v28, %v2568_v15  ;;  %v2575_v28 = vsel %vm2094_vm1, %v6913_v51, -inf }
 0x37f   : > { %v2218_v9 = vpack.c.bf16 %v6970_v4, %v6973_v7  ;;  %v2597_v32 = vmul.f32 1.442695, %v2588_v59 }
 0x381   : > { %6115 = vpow2.f32 %v2597_v32 }
 0x382   : > { %v6114_v63 = vpop.eup %6113 }
 0x383   : > { %5540 = vmatmul.mubr.msk.bf16.vlgmr.msra.gmra.mrb[44].mxu1 %vm2094_vm1, %v2218_v9  ;;  %v2611_v19 = vsel %vm2094_vm1, %v6114_v63, 0.0 }
 0x384   : > { %5551 = vmatprep.mubr.msk.bf16.mxu1 %vm6278_vm0, %v6277_v40 }
 0x385   : > { %5550 = vmatpush3.bf16.xpose.msra.mxu1 %v1640_v27 }
 0x386   : > { %5561 = vmatprep.subr.bf16.mxu1 %v6277_v40 }
 0x38b   : > { %v6116_v34 = vpop.eup %6115 }
 0x38c   : > { %5552 = vmatmul.mubr.bf16.vlgmr.msra.gmra.mrb[48].mxu1 %v1355_v41  ;;  %v2614_v9 = vsel %vm2094_vm1, %v6116_v34, 0.0 }
 0x38d   : > { %5562 = vmatpush3.bf16.xpose.msra.mxu1 %v1644_v47  ;;  %5563 = vmatprep.mubr.msk.bf16.mxu1 %vm6278_vm0, %v6277_v40 }
 0x38e   : > { %5573 = vmatprep.subr.bf16.mxu1 %v6277_v40 }
 0x394   : > { %5564 = vmatmul.mubr.bf16.vlgmr.msra.gmra.mrb[52].mxu1 %v1359_v25 }
 0x395   : > { %5574 = vmatpush3.bf16.msra.mxu1 %v1925_v3  ;;  %5575 = vmatprep.mubr.msk.bf16.mxu1 %vm6278_vm0, %v6277_v40 }
 0x396   : > { %5585 = vmatprep.subr.bf16.mxu1 %v6277_v40 }
 0x43e   : > { %v7002_v12 = vpop.f32.mrb[32].mxu1 }
 0x43f   : > { %v5523_v21 = vpop.f32.mrb[33].mxu1 }
 0x440   : > { %v7004_v27 = vpop.f32.mrb[34].mxu1 }
 0x441   : > { %v2395_v29 = vpack.c.bf16 %v7004_v27, %v7002_v12  ;;  %v5524_v35 = vpop.f32.mrb[35].mxu1  ;;  %v5898_v12 = vld [vmem:[%s6442_s17 + $0x28] ss:$16 sps:$4 sm:$0xff]   ;;  %v5903_v27 = vld [vmem:[%s6442_s17 + $0x44] ss:$16 sps:$4 sm:$0xff]  }
 0x446   : > { %v7008_v41 = vpop.f32.mrb[36].mxu1 }
 0x447   : > { %v5529_v5 = vpop.f32.mrb[37].mxu1 }
 0x448   : > { %v7010_v14 = vpop.f32.mrb[38].mxu1 }
 0x449   : > { %v2396_v47 = vpack.c.bf16 %v7010_v14, %v7008_v41  ;;  %v5530_v22 = vpop.f32.mrb[39].mxu1  ;;  %v2899_v41 = vld [vmem:[%s7942_s5] sm:$0x3] }
 0x44a   : > { %v7198_v14 = vrot.slane %v2899_v41, %v6758_v43 }
 0x44e   : > { %v7014_v24 = vpop.f32.mrb[40].mxu1 }
 0x44f   : > { %v5535_v25 = vpop.f32.mrb[41].mxu1 }
 0x450   : > { %v7016_v61 = vpop.f32.mrb[42].mxu1 }
 0x451   : > { %v2397_v1 = vpack.c.bf16 %v7016_v61, %v7014_v24  ;;  %v5536_v3 = vpop.f32.mrb[43].mxu1 }
 0x456   : > { %v7020_v17 = vpop.f32.mrb[44].mxu1 }
 0x457   : > { %v5541_v53 = vpop.f32.mrb[45].mxu1 }
 0x458   : > { %v7023_v58 = vpop.f32.mrb[46].mxu1 }
 0x459   : > { %v2398_v49 = vpack.c.bf16 %v7023_v58, %v7020_v17  ;;  %v5542_v23 = vpop.f32.mrb[47].mxu1 }
 0x45f   : > { %v2474_v36 = vpop.f32.mrb[48].mxu1 }
 0x460   : > { %v5553_v30 = vpop.f32.mrb[49].mxu1  ;;  %v2569_v39 = vsel %vm2094_vm1, %v2474_v36, -inf }
 0x461   : > { %2570 = vmax.xlane.f32.xlu0 %v2569_v39  ;;  %v2477_v37 = vpop.f32.mrb[50].mxu1 }
 0x462   : > { %v5554_v50 = vpop.f32.mrb[51].mxu1  ;;  %v2572_v38 = vsel %vm2094_vm1, %v2477_v37, -inf }
 0x463   : > { %2573 = vmax.xlane.f32.xlu1 %v2572_v38 }
 0x465   : > { %2576 = vmax.xlane.f32.xlu0 %v2575_v28 }
 0x467   : > { %2579 = vmax.xlane.f32.xlu1 %v2578_v48  ;;  %v2556_v54 = vpop.f32.mrb[52].mxu1 }
 0x468   : > { %v5565_v55 = vpop.f32.mrb[53].mxu1  ;;  %v2581_v57 = vsel %vm2094_vm1, %v2556_v54, -inf }
 0x469   : > { %2582 = vmax.xlane.f32.xlu0 %v2581_v57  ;;  %v2559_v62 = vpop.f32.mrb[54].mxu1 }
 0x46a   : > { %v5566_v60 = vpop.f32.mrb[55].mxu1  ;;  %v2584_v52 = vsel %vm2094_vm1, %v2559_v62, -inf }
 0x46b   : > { %2585 = vmax.xlane.f32.xlu1 %v2584_v52 }
 0x46d   : > { %2612 = vadd.xlane.f32.xlu0 %v2611_v19 }
 0x46f   : > { %2615 = vadd.xlane.f32.xlu1 %v2614_v9 }
 0x4ee   : > { %v2571_v21 = vpop.xlane.xlu0 %2570 }
 0x4ef   : > { %v2589_v35 = vsub.f32 %v2474_v36, %v2571_v21 }
 0x4f0   : > { %v2574_v5 = vpop.xlane.xlu1 %2573 }
 0x4f1   : > { %v2599_v22 = vmul.f32 1.442695, %v2589_v35  ;;  %v2590_v25 = vsub.f32 %v2477_v37, %v2574_v5 }
 0x4f2   : > { %v2577_v3 = vpop.xlane.xlu0 %2576 }
 0x4f3   : > { %6117 = vpow2.f32 %v2599_v22  ;;  %v2601_v11 = vmul.f32 1.442695, %v2590_v25  ;;  %v2591_v15 = vsub.f32 %v6913_v51, %v2577_v3 }
 0x4f4   : > { %v2580_v44 = vpop.xlane.xlu1 %2579 }
 0x4f5   : > { %6119 = vpow2.f32 %v2601_v11  ;;  %v2603_v53 = vmul.f32 1.442695, %v2591_v15  ;;  %v2592_v59 = vsub.f32 %v6916_v56, %v2580_v44 }
 0x4f6   : > { %v2583_v23 = vpop.xlane.xlu0 %2582 }
 0x4f7   : > { %6121 = vpow2.f32 %v2603_v53  ;;  %v2605_v26 = vmul.f32 1.442695, %v2592_v59  ;;  %v2593_v32 = vsub.f32 %v2556_v54, %v2583_v23 }
 0x4f8   : > { %v2586_v30 = vpop.xlane.xlu1 %2585 }
 0x4f9   : > { %6123 = vpow2.f32 %v2605_v26  ;;  %v2607_v36 = vmul.f32 1.442695, %v2593_v32  ;;  %v2594_v39 = vsub.f32 %v2559_v62, %v2586_v30 }
 0x4fa   : > { %v2613_v50 = vpop.xlane.xlu0 %2612 }
 0x4fb   : > { %6125 = vpow2.f32 %v2607_v36  ;;  %v2609_v37 = vmul.f32 1.442695, %v2594_v39 }
 0x4fc   : > { %6127 = vrcp.f32 %v2613_v50  ;;  %v2616_v38 = vpop.xlane.xlu1 %2615 }
 0x4fd   : > { %v6118_v28 = vpop.eup %6117  ;;  %6129 = vpow2.f32 %v2609_v37 }
 0x4fe   : > { %6131 = vrcp.f32 %v2616_v38  ;;  %v2617_v51 = vsel %vm2094_vm1, %v6118_v28, 0.0 }
 0x4ff   : > { %v6120_v48 = vpop.eup %6119  ;;  %2618 = vadd.xlane.f32.xlu0 %v2617_v51 }
 0x500   : > { %v2620_v56 = vsel %vm2094_vm1, %v6120_v48, 0.0 }
 0x501   : > { %v6122_v55 = vpop.eup %6121  ;;  %2621 = vadd.xlane.f32.xlu1 %v2620_v56 }
 0x502   : > { %v2623_v54 = vsel %vm2094_vm1, %v6122_v55, 0.0 }
 0x503   : > { %v6124_v57 = vpop.eup %6123  ;;  %2624 = vadd.xlane.f32.xlu0 %v2623_v54 }
 0x504   : > { %v2626_v62 = vsel %vm2094_vm1, %v6124_v57, 0.0 }
 0x505   : > { %v6126_v60 = vpop.eup %6125  ;;  %2627 = vadd.xlane.f32.xlu1 %v2626_v62 }
 0x506   : > { %v6128_v52 = vpop.eup %6127  ;;  %v2629_v19 = vsel %vm2094_vm1, %v6126_v60, 0.0 }
 0x507   : > { %v6130_v9 = vpop.eup %6129  ;;  %v2643_v21 = vmul.f32 %v6128_v52, %v6114_v63  ;;  %2630 = vadd.xlane.f32.xlu0 %v2629_v19  ;;  %v5843_v63 = vld [vmem:[%s6433_s25 + $0x4] ss:$8 sps:$4 sm:$0xff]  }
 0x508   : > { %v6132_v35 = vpop.eup %6131  ;;  %v2632_v5 = vsel %vm2094_vm1, %v6130_v9, 0.0  ;;  %v5849_v19 = vld [vmem:[%s6433_s25 + $0x24] ss:$8 sps:$4 sm:$0xff]  }
 0x509   : > { %v2675_v22 = vadd.f32 %v2643_v21, %v6932_v31  ;;  %v2644_v25 = vmul.f32 %v6132_v35, %v6116_v34  ;;  %2633 = vadd.xlane.f32.xlu1 %v2632_v5  ;;  %v5850_v35 = vld [vmem:[%s6433_s25 + $0x30] ss:$8 sps:$4 sm:$0xff]   ;;  %v5853_v5 = vld [vmem:[%s6433_s25 + $0x40] ss:$8 sps:$4 sm:$0xff]  }
 0x50b   : > { %v7047_v3 = vmul.f32 0.5, %v2675_v22  ;;  %v2676_v11 = vadd.f32 %v2644_v25, %v6934_v33  ;;  %v2683_v15 = vpack.c.bf16 %v2644_v25, %v2643_v21  ;;  %v5858_v22 = vld [vmem:[%s6433_s25 + $0x54] ss:$8 sps:$4 sm:$0xff]   ;;  %v5856_v25 = vld [vmem:[%s6433_s25 + $0x50] ss:$8 sps:$4 sm:$0xff]  }
 0x50d   : > { %7934 = vst [vmem:[#allocation12_spill] sm:$0xff] %v7047_v3  ;;  %v7050_v44 = vmul.f32 0.5, %v2676_v11  ;;  %5570 = vmatmul.mubr.msk.bf16.vlgmr.msra.gmra.mrb[40].mxu0 %vm2094_vm1, %v2683_v15  ;;  %v5861_v11 = vld [vmem:[%s6433_s25 + $0x64] ss:$8 sps:$4 sm:$0xff]   ;;  %v5859_v15 = vld [vmem:[%s6433_s25 + $0x60] ss:$8 sps:$4 sm:$0xff]  }
 0x50e   : > { %5580 = vmatpush3.bf16.msra.mxu0 %v1927_v10  ;;  %5581 = vmatprep.mubr.msk.bf16.mxu0 %vm6278_vm0, %v6277_v40 }
 0x50f   : > { %7935 = vst [vmem:[#allocation13_spill] sm:$0xff] %v7050_v44  ;;  %3071 = vmatprep.subr.bf16.mxu0 %v5843_v63  ;;  %v5864_v63 = vld [vmem:[%s6433_s25 + $0x74] ss:$8 sps:$4 sm:$0xff]  }
 0x58c   : > { %v2619_v31 = vpop.xlane.xlu0 %2618 }
 0x58d   : > { %6133 = vrcp.f32 %v2619_v31  ;;  %v5862_v31 = vld [vmem:[%s6433_s25 + $0x70] ss:$8 sps:$4 sm:$0xff]  }
 0x58e   : > { %v2622_v34 = vpop.xlane.xlu1 %2621 }
 0x58f   : > { %6135 = vrcp.f32 %v2622_v34  ;;  %v5867_v34 = vld [vmem:[%s6433_s25 + $0x84] ss:$8 sps:$4 sm:$0xff]  }
 0x590   : > { %v2625_v53 = vpop.xlane.xlu0 %2624 }
 0x591   : > { %6137 = vrcp.f32 %v2625_v53  ;;  %v5865_v53 = vld [vmem:[%s6433_s25 + $0x80] ss:$8 sps:$4 sm:$0xff]  }
 0x592   : > { %v2628_v33 = vpop.xlane.xlu1 %2627 }
 0x593   : > { %6139 = vrcp.f32 %v2628_v33  ;;  %v5870_v33 = vld [vmem:[%s6433_s25 + $0x94] ss:$8 sps:$4 sm:$0xff]  }
 0x594   : > { %v2631_v59 = vpop.xlane.xlu0 %2630 }
 0x595   : > { %6141 = vrcp.f32 %v2631_v59  ;;  %v5868_v59 = vld [vmem:[%s6433_s25 + $0x90] ss:$8 sps:$4 sm:$0xff]  }
 0x596   : > { %v2634_v23 = vpop.xlane.xlu1 %2633 }
 0x597   : > { %v6134_v26 = vpop.eup %6133  ;;  %6143 = vrcp.f32 %v2634_v23  ;;  %v5873_v23 = vld [vmem:[%s6433_s25 + $0xa4] ss:$8 sps:$4 sm:$0xff]  }
 0x598   : > { %v2645_v6 = vmul.f32 %v6134_v26, %v6118_v28  ;;  %v5871_v26 = vld [vmem:[%s6433_s25 + $0xa0] ss:$8 sps:$4 sm:$0xff]  }
 0x599   : > { %v6136_v8 = vpop.eup %6135 }
 0x59a   : > { %v2677_v10 = vadd.f32 %v2645_v6, %v6945_v20  ;;  %v2646_v32 = vmul.f32 %v6136_v8, %v6120_v48  ;;  %v5841_v20 = vld [vmem:[%s6433_s25] ss:$8 sps:$4 sm:$0xff]   ;;  %v5874_v8 = vld [vmem:[%s6433_s25 + $0xb0] ss:$8 sps:$4 sm:$0xff]  }
 0x59b   : > { %v6138_v30 = vpop.eup %6137 }
 0x59c   : > { %v7060_v36 = vmul.f32 0.5, %v2677_v10  ;;  %v2678_v39 = vadd.f32 %v2646_v32, %v6947_v46  ;;  %v2647_v50 = vmul.f32 %v6138_v30, %v6122_v55  ;;  %v2684_v37 = vpack.c.bf16 %v2646_v32, %v2645_v6  ;;  %v5876_v6 = vld [vmem:[%s6433_s25 + $0xb4] ss:$8 sps:$4 sm:$0xff]   ;;  %v5879_v10 = vld [vmem:[%s6433_s25 + $0xc4] ss:$8 sps:$4 sm:$0xff]  }
 0x59d   : > { %v6140_v38 = vpop.eup %6139  ;;  %v5877_v32 = vld [vmem:[%s6433_s25 + $0xc0] ss:$8 sps:$4 sm:$0xff]   ;;  %v5882_v30 = vld [vmem:[%s6433_s25 + $0xd4] ss:$8 sps:$4 sm:$0xff]  }
 0x59e   : > { %7936 = vst [vmem:[#allocation14_spill] sm:$0xff] %v7060_v36  ;;  %v7063_v51 = vmul.f32 0.5, %v2678_v39  ;;  %v2679_v56 = vadd.f32 %v2647_v50, %v6960_v2  ;;  %v2648_v54 = vmul.f32 %v6140_v38, %v6124_v57  ;;  %5576 = vmatmul.mubr.msk.bf16.vlgmr.msra.gmra.mrb[56].mxu1 %vm2094_vm1, %v2684_v37  ;;  %v5846_v57 = vld [vmem:[%s6433_s25 + $0x14] ss:$8 sps:$4 sm:$0xff]   ;;  %v5880_v39 = vld [vmem:[%s6433_s25 + $0xd0] ss:$8 sps:$4 sm:$0xff]  }
 0x59f   : > { %v6142_v28 = vpop.eup %6141  ;;  %5586 = vmatpush3.bf16.msra.mxu1 %v1929_v18  ;;  %5587 = vmatprep.mubr.msk.bf16.mxu1 %vm6278_vm0, %v6277_v40  ;;  %v5844_v40 = vld [vmem:[%s6433_s25 + $0x10] ss:$8 sps:$4 sm:$0xff]   ;;  %v5883_v37 = vld [vmem:[%s6433_s25 + $0xe0] ss:$8 sps:$4 sm:$0xff]   ;;  %v5888_v38 = vld [vmem:[%s6433_s25 + $0xf4] ss:$8 sps:$4 sm:$0xff]  }
 0x5a0   : > { %7937 = vst [vmem:[#allocation15_spill] sm:$0xff] %v7063_v51  ;;  %v7073_v46 = vmul.f32 0.5, %v2679_v56  ;;  %v2680_v48 = vadd.f32 %v2648_v54, %v6957_v0  ;;  %v2649_v55 = vmul.f32 %v6142_v28, %v6126_v60  ;;  %v2685_v2 = vpack.c.bf16 %v2648_v54, %v2647_v50  ;;  %v5885_v50 = vld [vmem:[%s6433_s25 + $0xe4] ss:$8 sps:$4 sm:$0xff]   ;;  %v5886_v56 = vld [vmem:[%s6433_s25 + $0xf0] ss:$8 sps:$4 sm:$0xff]  }
 0x5a1   : > { %v6144_v62 = vpop.eup %6143  ;;  %v6185_v36 = vld [vmem:[#allocation2 + $0x40] sm:$0xff] }
 0x5a2   : > { %7938 = vst [vmem:[#allocation16_spill] sm:$0xff] %v7073_v46  ;;  %v7077_v52 = vmul.f32 0.5, %v2680_v48  ;;  %v2681_v13 = vadd.f32 %v2649_v55, %v6973_v7  ;;  %v2650_v16 = vmul.f32 %v6144_v62, %v6130_v9  ;;  %5582 = vmatmul.mubr.msk.bf16.vlgmr.msra.gmra.mrb[44].mxu0 %vm2094_vm1, %v2685_v2  ;;  %v5847_v7 = vld [vmem:[%s6433_s25 + $0x20] ss:$8 sps:$4 sm:$0xff]   ;;  %v5852_v9 = vld [vmem:[%s6433_s25 + $0x34] ss:$8 sps:$4 sm:$0xff]  }
 0x5a3   : > { %3072 = vmatpush1.bf16.msra.mxu0 %v5841_v20  ;;  %v5889_v2 = vld [vmem:[%s6442_s17] ss:$16 sps:$4 sm:$0xff]   ;;  %v5892_v62 = vld [vmem:[%s6442_s17 + $0x8] ss:$16 sps:$4 sm:$0xff]  }
 0x5a4   : > { %7939 = vst [vmem:[#allocation17_spill] sm:$0xff] %v7077_v52  ;;  %v7082_v18 = vmul.f32 0.5, %v2681_v13  ;;  %v2682_v0 = vadd.f32 %v2650_v16, %v6970_v4  ;;  %v2686_v60 = vpack.c.bf16 %v2650_v16, %v2649_v55  ;;  %3073 = vmatprep.subr.bf16.mxu0 %v5846_v57  ;;  %v5855_v4 = vld [vmem:[%s6433_s25 + $0x44] ss:$8 sps:$4 sm:$0xff]  }
 0x5a5   : > { %v5891_v57 = vld [vmem:[%s6442_s17 + $0x4] ss:$16 sps:$4 sm:$0xff]   ;;  %v5894_v13 = vld [vmem:[%s6442_s17 + $0xc] ss:$16 sps:$4 sm:$0xff]  }
 0x5a6   : > { %7940 = vst [vmem:[#allocation18_spill] sm:$0xff] %v7082_v18  ;;  %v7086_v21 = vmul.f32 0.5, %v2682_v0  ;;  %5588 = vmatmul.mubr.msk.bf16.vlgmr.msra.gmra.mrb[60].mxu1 %vm2094_vm1, %v2686_v60  ;;  %3767 = vmatprep.subr.bf16.mxu1 %v5891_v57  ;;  %v5897_v16 = vld [vmem:[%s6442_s17 + $0x24] ss:$16 sps:$4 sm:$0xff]   ;;  %v5895_v0 = vld [vmem:[%s6442_s17 + $0x20] ss:$16 sps:$4 sm:$0xff]  }
 0x5a7   : > { %3074 = vmatpush1.bf16.msra.mxu0 %v5844_v40  ;;  %3768 = vmatpush1.bf16.msra.mxu1 %v5889_v2  ;;  %v5900_v40 = vld [vmem:[%s6442_s17 + $0x2c] ss:$16 sps:$4 sm:$0xff]   ;;  %v5901_v60 = vld [vmem:[%s6442_s17 + $0x40] ss:$16 sps:$4 sm:$0xff]   ;;  %v5957_v2 = vld [vmem:[%s6442_s17 + $0x164] ss:$16 sps:$4 sm:$0xff]  }
 0x5a8   : > { %7941 = vst [vmem:[#allocation19_spill] sm:$0xff] %v7086_v21  ;;  %3075 = vmatprep.subr.bf16.mxu0 %v5849_v19  ;;  %3769 = vmatprep.subr.bf16.mxu1 %v5897_v16  ;;  %v5904_v19 = vld [vmem:[%s6442_s17 + $0x48] ss:$16 sps:$4 sm:$0xff]   ;;  %v5960_v57 = vld [vmem:[%s6442_s17 + $0x16c] ss:$16 sps:$4 sm:$0xff]  }
 0x5a9   : > { %v5963_v16 = vld [vmem:[%s6442_s17 + $0x184] ss:$16 sps:$4 sm:$0xff]  }
 0x5ab   : > { %3076 = vmatpush1.bf16.msra.mxu0 %v5847_v7  ;;  %3770 = vmatpush1.bf16.msra.mxu1 %v5895_v0  ;;  %v5909_v7 = vld [vmem:[%s6442_s17 + $0x64] ss:$16 sps:$4 sm:$0xff]   ;;  %v5961_v0 = vld [vmem:[%s6442_s17 + $0x180] ss:$16 sps:$4 sm:$0xff]  }
 0x5ac   : > { %3077 = vmatprep.subr.bf16.mxu0 %v5852_v9  ;;  %3771 = vmatprep.subr.bf16.mxu1 %v5903_v27  ;;  %v5912_v9 = vld [vmem:[%s6442_s17 + $0x6c] ss:$16 sps:$4 sm:$0xff]   ;;  %v5969_v27 = vld [vmem:[%s6442_s17 + $0x1a4] ss:$16 sps:$4 sm:$0xff]  }
 0x5af   : > { %3078 = vmatpush1.bf16.msra.mxu0 %v5850_v35  ;;  %3772 = vmatpush1.bf16.msra.mxu1 %v5901_v60  ;;  %v5907_v35 = vld [vmem:[%s6442_s17 + $0x60] ss:$16 sps:$4 sm:$0xff]  }
 0x5b0   : > { %3079 = vmatprep.subr.bf16.mxu0 %v5855_v4  ;;  %v5910_v4 = vld [vmem:[%s6442_s17 + $0x68] ss:$16 sps:$4 sm:$0xff]   ;;  %3773 = vmatprep.subr.bf16.mxu1 %v5909_v7  ;;  %v5967_v60 = vld [vmem:[%s6442_s17 + $0x1a0] ss:$16 sps:$4 sm:$0xff]   ;;  %v5975_v7 = vld [vmem:[%s6442_s17 + $0x1c4] ss:$16 sps:$4 sm:$0xff]  }
 0x5b3   : > { %3080 = vmatpush1.bf16.msra.mxu0 %v5853_v5  ;;  %3774 = vmatpush1.bf16.msra.mxu1 %v5907_v35  ;;  %v5915_v5 = vld [vmem:[%s6442_s17 + $0x84] ss:$16 sps:$4 sm:$0xff]   ;;  %v5973_v35 = vld [vmem:[%s6442_s17 + $0x1c0] ss:$16 sps:$4 sm:$0xff]  }
 0x5b4   : > { %3081 = vmatprep.subr.bf16.mxu0 %v5858_v22  ;;  %v5918_v22 = vld [vmem:[%s6442_s17 + $0x8c] ss:$16 sps:$4 sm:$0xff]   ;;  %3775 = vmatprep.subr.bf16.mxu1 %v5915_v5 }
 0x5b7   : > { %3082 = vmatpush1.bf16.msra.mxu0 %v5856_v25  ;;  %v5913_v25 = vld [vmem:[%s6442_s17 + $0x80] ss:$16 sps:$4 sm:$0xff]  }
 0x5b8   : > { %3083 = vmatprep.subr.bf16.mxu0 %v5861_v11  ;;  %v5916_v11 = vld [vmem:[%s6442_s17 + $0x88] ss:$16 sps:$4 sm:$0xff]   ;;  %3776 = vmatpush1.bf16.msra.mxu1 %v5913_v25  ;;  %v5981_v25 = vld [vmem:[%s6442_s17 + $0x1e4] ss:$16 sps:$4 sm:$0xff]  }
 0x5bb   : > { %3084 = vmatpush1.bf16.msra.mxu0 %v5859_v15  ;;  %v5921_v15 = vld [vmem:[%s6442_s17 + $0xa4] ss:$16 sps:$4 sm:$0xff]  }
 0x5bc   : > { %3085 = vmatprep.subr.bf16.mxu0 %v5864_v63  ;;  %v5924_v63 = vld [vmem:[%s6442_s17 + $0xac] ss:$16 sps:$4 sm:$0xff]   ;;  %3777 = vmatprep.subr.bf16.mxu1 %v5921_v15  ;;  %v5982_v15 = vld [vmem:[%s6442_s17 + $0x1e8] ss:$16 sps:$4 sm:$0xff]  }
 0x5bf   : > { %3086 = vmatpush1.bf16.msra.mxu0 %v5862_v31  ;;  %v5919_v31 = vld [vmem:[%s6442_s17 + $0xa0] ss:$16 sps:$4 sm:$0xff]  }
 0x5c0   : > { %3087 = vmatprep.subr.bf16.mxu0 %v5867_v34  ;;  %v5922_v34 = vld [vmem:[%s6442_s17 + $0xa8] ss:$16 sps:$4 sm:$0xff]   ;;  %3778 = vmatpush1.bf16.msra.mxu1 %v5919_v31 }
 0x5c3   : > { %3088 = vmatpush1.bf16.msra.mxu0 %v5865_v53  ;;  %v5927_v53 = vld [vmem:[%s6442_s17 + $0xc4] ss:$16 sps:$4 sm:$0xff]  }
 0x5c4   : > { %3089 = vmatprep.subr.bf16.mxu0 %v5870_v33  ;;  %v5930_v33 = vld [vmem:[%s6442_s17 + $0xcc] ss:$16 sps:$4 sm:$0xff]   ;;  %3779 = vmatprep.subr.bf16.mxu1 %v5927_v53 }
 0x5c7   : > { %3090 = vmatpush1.bf16.msra.mxu0 %v5868_v59  ;;  %v5925_v59 = vld [vmem:[%s6442_s17 + $0xc0] ss:$16 sps:$4 sm:$0xff]  }
 0x5c8   : > { %3091 = vmatprep.subr.bf16.mxu0 %v5873_v23  ;;  %v5928_v23 = vld [vmem:[%s6442_s17 + $0xc8] ss:$16 sps:$4 sm:$0xff]   ;;  %3780 = vmatpush1.bf16.msra.mxu1 %v5925_v59 }
 0x5cb   : > { %3092 = vmatpush1.bf16.msra.mxu0 %v5871_v26  ;;  %v5933_v26 = vld [vmem:[%s6442_s17 + $0xe4] ss:$16 sps:$4 sm:$0xff]  }
 0x5cc   : > { %3093 = vmatprep.subr.bf16.mxu0 %v5876_v6  ;;  %v5936_v6 = vld [vmem:[%s6442_s17 + $0xec] ss:$16 sps:$4 sm:$0xff]   ;;  %3781 = vmatprep.subr.bf16.mxu1 %v5933_v26 }
 0x5cf   : > { %3094 = vmatpush1.bf16.msra.mxu0 %v5874_v8  ;;  %v5931_v8 = vld [vmem:[%s6442_s17 + $0xe0] ss:$16 sps:$4 sm:$0xff]  }
 0x5d0   : > { %3095 = vmatprep.subr.bf16.mxu0 %v5879_v10  ;;  %v5934_v10 = vld [vmem:[%s6442_s17 + $0xe8] ss:$16 sps:$4 sm:$0xff]   ;;  %3782 = vmatpush1.bf16.msra.mxu1 %v5931_v8 }
 0x5d3   : > { %3096 = vmatpush1.bf16.msra.mxu0 %v5877_v32  ;;  %v5939_v32 = vld [vmem:[%s6442_s17 + $0x104] ss:$16 sps:$4 sm:$0xff]  }
 0x5d4   : > { %3097 = vmatprep.subr.bf16.mxu0 %v5882_v30  ;;  %v5942_v30 = vld [vmem:[%s6442_s17 + $0x10c] ss:$16 sps:$4 sm:$0xff]   ;;  %3783 = vmatprep.subr.bf16.mxu1 %v5939_v32 }
 0x5d7   : > { %3098 = vmatpush1.bf16.msra.mxu0 %v5880_v39  ;;  %v5937_v39 = vld [vmem:[%s6442_s17 + $0x100] ss:$16 sps:$4 sm:$0xff]  }
 0x5d8   : > { %3099 = vmatprep.subr.bf16.mxu0 %v5885_v50  ;;  %v5940_v50 = vld [vmem:[%s6442_s17 + $0x108] ss:$16 sps:$4 sm:$0xff]   ;;  %3784 = vmatpush1.bf16.msra.mxu1 %v5937_v39 }
 0x5db   : > { %3100 = vmatpush1.bf16.msra.mxu0 %v5883_v37  ;;  %v5945_v37 = vld [vmem:[%s6442_s17 + $0x124] ss:$16 sps:$4 sm:$0xff]  }
 0x5dc   : > { %3101 = vmatprep.subr.bf16.mxu0 %v5888_v38  ;;  %v5948_v38 = vld [vmem:[%s6442_s17 + $0x12c] ss:$16 sps:$4 sm:$0xff]   ;;  %3785 = vmatprep.subr.bf16.mxu1 %v5945_v37 }
 0x5df   : > { %3102 = vmatpush1.bf16.msra.mxu0 %v5886_v56  ;;  %v5943_v56 = vld [vmem:[%s6442_s17 + $0x120] ss:$16 sps:$4 sm:$0xff]  }
 0x5e0   : > { %v2724_v54 = vpop.f32.mrb[40].mxu0  ;;  %3840 = vmatprep.subr.bf16.mxu0 %v5894_v13  ;;  %3786 = vmatpush1.bf16.msra.mxu1 %v5943_v56  ;;  %v5958_v13 = vld [vmem:[%s6442_s17 + $0x168] ss:$16 sps:$4 sm:$0xff]  }
 0x5e1   : > { %v5571_v28 = vpop.f32.mrb[41].mxu0 }
 0x5e2   : > { %v2727_v20 = vpop.f32.mrb[42].mxu0  ;;  %v5951_v28 = vld [vmem:[%s6442_s17 + $0x144] ss:$16 sps:$4 sm:$0xff]  }
 0x5e3   : > { %v2863_v48 = vpack.c.bf16 %v2727_v20, %v2724_v54  ;;  %v5572_v55 = vpop.f32.mrb[43].mxu0  ;;  %v5946_v54 = vld [vmem:[%s6442_s17 + $0x128] ss:$16 sps:$4 sm:$0xff]   ;;  %v5954_v20 = vld [vmem:[%s6442_s17 + $0x14c] ss:$16 sps:$4 sm:$0xff]   ;;  %3787 = vmatprep.subr.bf16.mxu1 %v5951_v28 }
 0x5e4   : > { %v5952_v55 = vld [vmem:[%s6442_s17 + $0x148] ss:$16 sps:$4 sm:$0xff]  }
 0x5e5   : > { %3103 = vmatprep.mubr.bf16.mxu0 %v2863_v48  ;;  %v5949_v48 = vld [vmem:[%s6442_s17 + $0x140] ss:$16 sps:$4 sm:$0xff]  }
 0x5e6   : > { %3104 = vmatmul.mubr.bf16.vlgmr.msra.gmra.mrb[48].mxu0 %v2395_v29  ;;  %v5906_v29 = vld [vmem:[%s6442_s17 + $0x4c] ss:$16 sps:$4 sm:$0xff]   ;;  %3788 = vmatpush1.bf16.msra.mxu1 %v5949_v48 }
 0x5e7   : > { %3841 = vmatpush1.bf16.msra.mxu0 %v5892_v62  ;;  %v5955_v62 = vld [vmem:[%s6442_s17 + $0x160] ss:$16 sps:$4 sm:$0xff]   ;;  %3789 = vmatprep.subr.bf16.mxu1 %v5957_v2 }
 0x5e8   : > { %3842 = vmatprep.subr.bf16.mxu0 %v5900_v40  ;;  %v5966_v40 = vld [vmem:[%s6442_s17 + $0x18c] ss:$16 sps:$4 sm:$0xff]  }
 0x5ea   : > { %3790 = vmatpush1.bf16.msra.mxu1 %v5955_v62 }
 0x5eb   : > { %3843 = vmatpush1.bf16.msra.mxu0 %v5898_v12  ;;  %v5964_v12 = vld [vmem:[%s6442_s17 + $0x188] ss:$16 sps:$4 sm:$0xff]   ;;  %3791 = vmatprep.subr.bf16.mxu1 %v5963_v16 }
 0x5ec   : > { %3844 = vmatprep.subr.bf16.mxu0 %v5906_v29  ;;  %v5972_v29 = vld [vmem:[%s6442_s17 + $0x1ac] ss:$16 sps:$4 sm:$0xff]  }
 0x5ee   : > { %3792 = vmatpush1.bf16.msra.mxu1 %v5961_v0 }
 0x5ef   : > { %3845 = vmatpush1.bf16.msra.mxu0 %v5904_v19  ;;  %v5970_v19 = vld [vmem:[%s6442_s17 + $0x1a8] ss:$16 sps:$4 sm:$0xff]   ;;  %3793 = vmatprep.subr.bf16.mxu1 %v5969_v27 }
 0x5f0   : > { %3846 = vmatprep.subr.bf16.mxu0 %v5912_v9  ;;  %v5978_v9 = vld [vmem:[%s6442_s17 + $0x1cc] ss:$16 sps:$4 sm:$0xff]  }
 0x5f2   : > { %3794 = vmatpush1.bf16.msra.mxu1 %v5967_v60 }
 0x5f3   : > { %3847 = vmatpush1.bf16.msra.mxu0 %v5910_v4  ;;  %v5976_v4 = vld [vmem:[%s6442_s17 + $0x1c8] ss:$16 sps:$4 sm:$0xff]   ;;  %3795 = vmatprep.subr.bf16.mxu1 %v5975_v7 }
 0x5f4   : > { %3848 = vmatprep.subr.bf16.mxu0 %v5918_v22  ;;  %v5979_v22 = vld [vmem:[%s6442_s17 + $0x1e0] ss:$16 sps:$4 sm:$0xff]  }
 0x5f6   : > { %3796 = vmatpush1.bf16.msra.mxu1 %v5973_v35 }
 0x5f7   : > { %3849 = vmatpush1.bf16.msra.mxu0 %v5916_v11  ;;  %3797 = vmatprep.subr.bf16.mxu1 %v5981_v25 }
 0x5f8   : > { %3850 = vmatprep.subr.bf16.mxu0 %v5924_v63  ;;  %v5984_v63 = vld [vmem:[%s6442_s17 + $0x1ec] ss:$16 sps:$4 sm:$0xff]  }
 0x5fa   : > { %3798 = vmatpush1.bf16.msra.mxu1 %v5979_v22 }
 0x5fb   : > { %3851 = vmatpush1.bf16.msra.mxu0 %v5922_v34 }
 0x5fc   : > { %3852 = vmatprep.subr.bf16.mxu0 %v5930_v33 }
 0x5ff   : > { %3853 = vmatpush1.bf16.msra.mxu0 %v5928_v23 }
 0x600   : > { %3854 = vmatprep.subr.bf16.mxu0 %v5936_v6 }
 0x603   : > { %3855 = vmatpush1.bf16.msra.mxu0 %v5934_v10 }
 0x604   : > { %3856 = vmatprep.subr.bf16.mxu0 %v5942_v30 }
 0x607   : > { %3857 = vmatpush1.bf16.msra.mxu0 %v5940_v50 }
 0x608   : > { %3858 = vmatprep.subr.bf16.mxu0 %v5948_v38  ;;  %v6177_v38 = vld [vmem:[#allocation2] sm:$0xff] }
 0x60b   : > { %3859 = vmatpush1.bf16.msra.mxu0 %v5946_v54  ;;  %v6178_v54 = vld [vmem:[#allocation2 + $0x10] sm:$0xff] }
 0x60c   : > { %3860 = vmatprep.subr.bf16.mxu0 %v5954_v20  ;;  %v6179_v20 = vld [vmem:[#allocation2 + $0x8] sm:$0xff] }
 0x60f   : > { %3861 = vmatpush1.bf16.msra.mxu0 %v5952_v55  ;;  %v6180_v55 = vld [vmem:[#allocation2 + $0x18] sm:$0xff] }
 0x610   : > { %3862 = vmatprep.subr.bf16.mxu0 %v5960_v57 }
 0x613   : > { %3863 = vmatpush1.bf16.msra.mxu0 %v5958_v13 }
 0x614   : > { %3864 = vmatprep.subr.bf16.mxu0 %v5966_v40 }
 0x617   : > { %3865 = vmatpush1.bf16.msra.mxu0 %v5964_v12 }
 0x618   : > { %3866 = vmatprep.subr.bf16.mxu0 %v5972_v29 }
 0x61b   : > { %3867 = vmatpush1.bf16.msra.mxu0 %v5970_v19 }
 0x61c   : > { %3868 = vmatprep.subr.bf16.mxu0 %v5978_v9 }
 0x61f   : > { %3869 = vmatpush1.bf16.msra.mxu0 %v5976_v4 }
 0x620   : > { %3870 = vmatprep.subr.bf16.mxu0 %v5984_v63 }
 0x623   : > { %3871 = vmatpush1.bf16.msra.mxu0 %v5982_v15 }
 0x671   : > { %v2768_v5 = vpop.f32.mrb[56].mxu1 }
 0x672   : > { %v5577_v11 = vpop.f32.mrb[57].mxu1 }
 0x673   : > { %v2771_v31 = vpop.f32.mrb[58].mxu1 }
 0x674   : > { %v2864_v34 = vpack.c.bf16 %v2771_v31, %v2768_v5  ;;  %v5578_v53 = vpop.f32.mrb[59].mxu1 }
 0x675   : > { %v2812_v33 = vpop.f32.mrb[44].mxu0 }
 0x676   : > { %v5583_v59 = vpop.f32.mrb[45].mxu0  ;;  %3113 = vmatprep.mubr.bf16.mxu0 %v2864_v34 }
 0x677   : > { %v2815_v23 = vpop.f32.mrb[46].mxu0  ;;  %3114 = vmatmul.mubr.bf16.gmra.mrb[52].mxu0 %v2396_v47  ;;  %v7201_v47 = vrot.slane %v2899_v41, %v6766_v45 }
 0x678   : > { %v2865_v26 = vpack.c.bf16 %v2815_v23, %v2812_v33  ;;  %v5584_v6 = vpop.f32.mrb[47].mxu0 }
 0x679   : > { %v2856_v8 = vpop.f32.mrb[60].mxu1 }
 0x67a   : > { %v5589_v10 = vpop.f32.mrb[61].mxu1  ;;  %3123 = vmatprep.mubr.bf16.mxu0 %v2865_v26 }
 0x67b   : > { %v2859_v32 = vpop.f32.mrb[62].mxu1 }
 0x67c   : > { %v2866_v30 = vpack.c.bf16 %v2859_v32, %v2856_v8  ;;  %v5590_v39 = vpop.f32.mrb[63].mxu1 }
 0x67f   : > { %3124 = vmatmul.mubr.bf16.gmra.mrb[56].mxu0 %v2397_v1 }
 0x680   : > { %3133 = vmatprep.mubr.bf16.mxu0 %v2866_v30 }
 0x687   : > { %3134 = vmatmul.mubr.bf16.gmra.mrb[60].mxu0 %v2398_v49 }
 0x6b9   : > { %v3105_v50 = vpop.f32.mrb[48].mxu0 }
 0x6ba   : > { %v3106_v24 = vadd.f32 %v3105_v50, %v7198_v14  ;;  %v3107_v61 = vpop.f32.mrb[49].mxu0 }
 0x6bb   : > { %v3108_v1 = vadd.f32 %v3107_v61, %v7201_v47  ;;  %v3109_v37 = vpop.f32.mrb[50].mxu0 }
 0x6bc   : > { %v3110_v17 = vadd.f32 %v3109_v37, %v7198_v14  ;;  %v3111_v58 = vpop.f32.mrb[51].mxu0  ;;  %v3144_v56 = vadd.f32 %v6177_v38, %v3106_v24 }
 0x6bd   : > { %v3112_v49 = vadd.f32 %v3111_v58, %v7201_v47  ;;  %v3145_v48 = vadd.f32 %v6179_v20, %v3108_v1 }
 0x6be   : > { %v3146_v28 = vadd.f32 %v6178_v54, %v3110_v17 }
 0x6bf   : > { %v3147_v2 = vadd.f32 %v6180_v55, %v3112_v49 }
 0x6c0   : > { %v3160_v57 = vadd.f32 %v3146_v28, %v3144_v56 }
 0x6c1   : > { %v3167_v62 = vadd.f32 %v3147_v2, %v3145_v48 }
 0x6c2   : > { %v3161_v13 = vrot.slane %v3160_v57, 4 }
 0x6c3   : > { %v3168_v16 = vrot.slane %v3167_v62, 4 }
 0x6c4   : > { %v3162_v40 = vadd.f32 %v3161_v13, %v3160_v57  ;;  %v5987_v57 = vld [vmem:[%s6452_s1 + $0x4] ss:$8 sps:$4 sm:$0xff]  }
 0x6c5   : > { %v3169_v0 = vadd.f32 %v3168_v16, %v3167_v62  ;;  %v7222_v62 = vld [vmem:[%s6452_s1 + $0x100] ss:$8 sps:$4 sm:$0xff]   ;;  %v7225_v13 = vld [vmem:[%s6452_s1 + $0x104] ss:$8 sps:$4 sm:$0xff]   ;;  %4421 = vmatprep.subr.bf16.mxu1 %v5987_v57  ;;  %v5991_v16 = vld [vmem:[%s6452_s1 + $0x10] ss:$8 sps:$4 sm:$0xff]  }
 0x6c6   : > { %v3163_v12 = vrot.slane %v3162_v40, 2  ;;  %4494 = vmatprep.subr.bf16.mxu0 %v7225_v13  ;;  %v6059_v57 = vld [vmem:[%s6452_s1 + $0xc4] ss:$8 sps:$4 sm:$0xff]  }
 0x6c7   : > { %v3170_v27 = vrot.slane %v3169_v0, 2 }
 0x6c8   : > { %v3164_v29 = vadd.f32 %v3163_v12, %v3162_v40  ;;  %v5993_v40 = vld [vmem:[%s6452_s1 + $0x14] ss:$8 sps:$4 sm:$0xff]  }
 0x6c9   : > { %v3171_v60 = vadd.f32 %v3170_v27, %v3169_v0  ;;  %v7232_v0 = vld [vmem:[%s6452_s1 + $0x110] ss:$8 sps:$4 sm:$0xff]   ;;  %v7235_v12 = vld [vmem:[%s6452_s1 + $0x114] ss:$8 sps:$4 sm:$0xff]   ;;  %v5999_v27 = vld [vmem:[%s6452_s1 + $0x24] ss:$8 sps:$4 sm:$0xff]  }
 0x6ca   : > { %v3165_v19 = vrot.slane %v3164_v29, 1 }
 0x6cb   : > { %v3172_v7 = vrot.slane %v3171_v60, 1 }
 0x6cc   : > { %v3166_v9 = vadd.f32 %v3165_v19, %v3164_v29  ;;  %v7239_v29 = vld [vmem:[%s6452_s1 + $0x124] ss:$8 sps:$4 sm:$0xff]   ;;  %v7245_v19 = vld [vmem:[%s6452_s1 + $0x120] ss:$8 sps:$4 sm:$0xff]  }
 0x6cd   : > { %v3173_v35 = vadd.f32 %v3172_v7, %v3171_v60  ;;  %v5997_v60 = vld [vmem:[%s6452_s1 + $0x20] ss:$8 sps:$4 sm:$0xff]   ;;  %v6005_v7 = vld [vmem:[%s6452_s1 + $0x34] ss:$8 sps:$4 sm:$0xff]  }
 0x6ce   : > { %v3217_v4 = vmul.f32 0.0625, %v3166_v9  ;;  %v7250_v9 = vld [vmem:[%s6452_s1 + $0x134] ss:$8 sps:$4 sm:$0xff]  }
 0x6cf   : > { %v3218_v5 = vmul.f32 0.0625, %v3173_v35  ;;  %v6003_v35 = vld [vmem:[%s6452_s1 + $0x30] ss:$8 sps:$4 sm:$0xff]  }
 0x6d0   : > { %v3225_v22 = vsub.f32 %v3144_v56, %v3217_v4  ;;  %v3227_v25 = vsub.f32 %v3146_v28, %v3217_v4  ;;  %v7255_v4 = vld [vmem:[%s6452_s1 + $0x130] ss:$8 sps:$4 sm:$0xff]  }
 0x6d1   : > { %v3228_v11 = vsub.f32 %v3147_v2, %v3218_v5  ;;  %v3226_v15 = vsub.f32 %v3145_v48, %v3218_v5  ;;  %v5985_v2 = vld [vmem:[%s6452_s1] ss:$8 sps:$4 sm:$0xff]   ;;  %v6011_v5 = vld [vmem:[%s6452_s1 + $0x44] ss:$8 sps:$4 sm:$0xff]  }
 0x6d2   : > { %v3241_v63 = vmul.f32 %v3225_v22, %v3225_v22  ;;  %v3243_v31 = vmul.f32 %v3227_v25, %v3227_v25 }
 0x6d3   : > { %v3244_v34 = vmul.f32 %v3228_v11, %v3228_v11  ;;  %v3242_v53 = vmul.f32 %v3226_v15, %v3226_v15 }
 0x6d4   : > { %v3257_v33 = vadd.f32 %v3243_v31, %v3241_v63  ;;  %v7270_v63 = vld [vmem:[%s6452_s1 + $0x154] ss:$8 sps:$4 sm:$0xff]   ;;  %v6015_v31 = vld [vmem:[%s6452_s1 + $0x50] ss:$8 sps:$4 sm:$0xff]  }
 0x6d5   : > { %v3264_v59 = vadd.f32 %v3244_v34, %v3242_v53  ;;  %v7275_v34 = vld [vmem:[%s6452_s1 + $0x150] ss:$8 sps:$4 sm:$0xff]   ;;  %v6023_v53 = vld [vmem:[%s6452_s1 + $0x64] ss:$8 sps:$4 sm:$0xff]  }
 0x6d6   : > { %v3258_v23 = vrot.slane %v3257_v33, 4 }
 0x6d7   : > { %v3265_v26 = vrot.slane %v3264_v59, 4 }
 0x6d8   : > { %v3259_v6 = vadd.f32 %v3258_v23, %v3257_v33  ;;  %v7280_v33 = vld [vmem:[%s6452_s1 + $0x164] ss:$8 sps:$4 sm:$0xff]   ;;  %v7285_v23 = vld [vmem:[%s6452_s1 + $0x160] ss:$8 sps:$4 sm:$0xff]  }
 0x6d9   : > { %v3266_v8 = vadd.f32 %v3265_v26, %v3264_v59  ;;  %v6021_v59 = vld [vmem:[%s6452_s1 + $0x60] ss:$8 sps:$4 sm:$0xff]   ;;  %v6029_v26 = vld [vmem:[%s6452_s1 + $0x74] ss:$8 sps:$4 sm:$0xff]  }
 0x6da   : > { %v3260_v10 = vrot.slane %v3259_v6, 2 }
 0x6db   : > { %v3267_v32 = vrot.slane %v3266_v8, 2 }
 0x6dc   : > { %v3261_v30 = vadd.f32 %v3260_v10, %v3259_v6  ;;  %v7290_v6 = vld [vmem:[%s6452_s1 + $0x174] ss:$8 sps:$4 sm:$0xff]   ;;  %v7295_v10 = vld [vmem:[%s6452_s1 + $0x170] ss:$8 sps:$4 sm:$0xff]  }
 0x6dd   : > { %v3268_v39 = vadd.f32 %v3267_v32, %v3266_v8  ;;  %v6027_v8 = vld [vmem:[%s6452_s1 + $0x70] ss:$8 sps:$4 sm:$0xff]   ;;  %v6035_v32 = vld [vmem:[%s6452_s1 + $0x84] ss:$8 sps:$4 sm:$0xff]  }
 0x6de   : > { %v3262_v41 = vrot.slane %v3261_v30, 1 }
 0x6df   : > { %v3269_v50 = vrot.slane %v3268_v39, 1 }
 0x6e0   : > { %v3263_v24 = vadd.f32 %v3262_v41, %v3261_v30  ;;  %v7300_v30 = vld [vmem:[%s6452_s1 + $0x184] ss:$8 sps:$4 sm:$0xff]   ;;  %v7305_v41 = vld [vmem:[%s6452_s1 + $0x180] ss:$8 sps:$4 sm:$0xff]  }
 0x6e1   : > { %v3270_v61 = vadd.f32 %v3269_v50, %v3268_v39  ;;  %v6033_v39 = vld [vmem:[%s6452_s1 + $0x80] ss:$8 sps:$4 sm:$0xff]   ;;  %v6041_v50 = vld [vmem:[%s6452_s1 + $0x94] ss:$8 sps:$4 sm:$0xff]  }
 0x6e2   : > { %v3313_v1 = vmul.f32 0.0625, %v3263_v24  ;;  %v7310_v24 = vld [vmem:[%s6452_s1 + $0x194] ss:$8 sps:$4 sm:$0xff]  }
 0x6e3   : > { %v3314_v37 = vmul.f32 0.0625, %v3270_v61  ;;  %v6039_v61 = vld [vmem:[%s6452_s1 + $0x90] ss:$8 sps:$4 sm:$0xff]  }
 0x6e4   : > { %v3321_v17 = vadd.f32 1e-05, %v3313_v1  ;;  %v7315_v1 = vld [vmem:[%s6452_s1 + $0x190] ss:$8 sps:$4 sm:$0xff]  }
 0x6e5   : > { %v3322_v58 = vadd.f32 1e-05, %v3314_v37  ;;  %v6047_v37 = vld [vmem:[%s6452_s1 + $0xa4] ss:$8 sps:$4 sm:$0xff]  }
 0x6e6   : > { %6145 = vrsqrt.f32 %v3321_v17  ;;  %v7320_v17 = vld [vmem:[%s6452_s1 + $0x1a4] ss:$8 sps:$4 sm:$0xff]  }
 0x6e7   : > { %6147 = vrsqrt.f32 %v3322_v58  ;;  %v6045_v58 = vld [vmem:[%s6452_s1 + $0xa0] ss:$8 sps:$4 sm:$0xff]  }
 0x6f0   : > { %v6146_v49 = vpop.eup %6145 }
 0x6f1   : > { %v6148_v38 = vpop.eup %6147  ;;  %v7207_v56 = vmul.f32 %v6146_v49, %v3227_v25  ;;  %v7209_v54 = vmul.f32 %v6146_v49, %v3225_v22  ;;  %v7260_v22 = vld [vmem:[%s6452_s1 + $0x144] ss:$8 sps:$4 sm:$0xff]   ;;  %v6009_v25 = vld [vmem:[%s6452_s1 + $0x40] ss:$8 sps:$4 sm:$0xff]  }
 0x6f2   : > { %v7211_v28 = vmul.f32 %v6148_v38, %v3226_v15  ;;  %v7213_v20 = vmul.f32 %v6148_v38, %v3228_v11  ;;  %v7265_v11 = vld [vmem:[%s6452_s1 + $0x140] ss:$8 sps:$4 sm:$0xff]   ;;  %v6017_v15 = vld [vmem:[%s6452_s1 + $0x54] ss:$8 sps:$4 sm:$0xff]  }
 0x6f3   : > { %7943 = vst [vmem:[#allocation20_spill] sm:$0xff] %v7207_v56  ;;  %7944 = vst [vmem:[#allocation21_spill] sm:$0xff] %v7209_v54  ;;  %v3353_v55 = vpack.c.bf16 %v7207_v56, %v7209_v54  ;;  %v7325_v49 = vld [vmem:[%s6452_s1 + $0x1a0] ss:$8 sps:$4 sm:$0xff]   ;;  %v6053_v38 = vld [vmem:[%s6452_s1 + $0xb4] ss:$8 sps:$4 sm:$0xff]  }
 0x6f4   : > { %7945 = vst [vmem:[#allocation22_spill] sm:$0xff] %v7211_v28  ;;  %7946 = vst [vmem:[#allocation23_spill] sm:$0xff] %v7213_v20  ;;  %v3354_v48 = vpack.c.bf16 %v7213_v20, %v7211_v28 }
 0x6f6   : > { %3799 = vmatprep.mubr.bf16.mxu1 %v3354_v48  ;;  %3872 = vmatprep.mubr.bf16.mxu0 %v3354_v48  ;;  %v7330_v48 = vld [vmem:[%s6452_s1 + $0x1b4] ss:$8 sps:$4 sm:$0xff]  }
 0x6f7   : > { %3800 = vmatmul.mubr.bf16.vlgmr.msra.gmra.mrb[64].mxu1 %v3353_v55  ;;  %3873 = vmatmul.mubr.bf16.vlgmr.msra.gmra.mrb[64].mxu0 %v3353_v55  ;;  %7947 = vst [vmem:[#allocation24_spill] sm:$0xff] %v7330_v48  ;;  %v6051_v55 = vld [vmem:[%s6452_s1 + $0xb0] ss:$8 sps:$4 sm:$0xff]  }
 0x6f8   : > { %4422 = vmatpush1.bf16.msra.mxu1 %v5985_v2  ;;  %4495 = vmatpush1.bf16.msra.mxu0 %v7222_v62  ;;  %v7335_v2 = vld [vmem:[%s6452_s1 + $0x1b0] ss:$8 sps:$4 sm:$0xff]  }
 0x6f9   : > { %4423 = vmatprep.subr.bf16.mxu1 %v5993_v40  ;;  %4496 = vmatprep.subr.bf16.mxu0 %v7235_v12  ;;  %7948 = vst [vmem:[#allocation25_spill] sm:$0xff] %v7335_v2  ;;  %v6057_v40 = vld [vmem:[%s6452_s1 + $0xc0] ss:$8 sps:$4 sm:$0xff]  }
 0x6fc   : > { %4424 = vmatpush1.bf16.msra.mxu1 %v5991_v16  ;;  %4497 = vmatpush1.bf16.msra.mxu0 %v7232_v0  ;;  %v7340_v16 = vld [vmem:[%s6452_s1 + $0x1c4] ss:$8 sps:$4 sm:$0xff]  }
 0x6fd   : > { %4425 = vmatprep.subr.bf16.mxu1 %v5999_v27  ;;  %4498 = vmatprep.subr.bf16.mxu0 %v7239_v29  ;;  %7949 = vst [vmem:[#allocation26_spill] sm:$0xff] %v7340_v16  ;;  %v7345_v27 = vld [vmem:[%s6452_s1 + $0x1c0] ss:$8 sps:$4 sm:$0xff]  }
 0x6fe   : > { %7950 = vst [vmem:[#allocation27_spill] sm:$0xff] %v7345_v27 }
 0x700   : > { %4426 = vmatpush1.bf16.msra.mxu1 %v5997_v60  ;;  %4499 = vmatpush1.bf16.msra.mxu0 %v7245_v19  ;;  %v6065_v60 = vld [vmem:[%s6452_s1 + $0xd4] ss:$8 sps:$4 sm:$0xff]  }
 0x701   : > { %4427 = vmatprep.subr.bf16.mxu1 %v6005_v7  ;;  %4500 = vmatprep.subr.bf16.mxu0 %v7250_v9  ;;  %v7351_v7 = vld [vmem:[%s6452_s1 + $0x1d4] ss:$8 sps:$4 sm:$0xff]  }
 0x702   : > { %7951 = vst [vmem:[#allocation28_spill] sm:$0xff] %v7351_v7 }
 0x704   : > { %4428 = vmatpush1.bf16.msra.mxu1 %v6003_v35  ;;  %4501 = vmatpush1.bf16.msra.mxu0 %v7255_v4 }
 0x705   : > { %4429 = vmatprep.subr.bf16.mxu1 %v6011_v5  ;;  %4502 = vmatprep.subr.bf16.mxu0 %v7260_v22  ;;  %v6063_v5 = vld [vmem:[%s6452_s1 + $0xd0] ss:$8 sps:$4 sm:$0xff]  }
 0x708   : > { %4430 = vmatpush1.bf16.msra.mxu1 %v6009_v25  ;;  %4503 = vmatpush1.bf16.msra.mxu0 %v7265_v11  ;;  %v7355_v25 = vld [vmem:[%s6452_s1 + $0x1d0] ss:$8 sps:$4 sm:$0xff]  }
 0x709   : > { %4431 = vmatprep.subr.bf16.mxu1 %v6017_v15  ;;  %4504 = vmatprep.subr.bf16.mxu0 %v7270_v63  ;;  %7952 = vst [vmem:[#allocation29_spill] sm:$0xff] %v7355_v25 }
 0x70c   : > { %4432 = vmatpush1.bf16.msra.mxu1 %v6015_v31  ;;  %4505 = vmatpush1.bf16.msra.mxu0 %v7275_v34 }
 0x70d   : > { %4433 = vmatprep.subr.bf16.mxu1 %v6023_v53  ;;  %4506 = vmatprep.subr.bf16.mxu0 %v7280_v33 }
 0x710   : > { %4434 = vmatpush1.bf16.msra.mxu1 %v6021_v59  ;;  %4507 = vmatpush1.bf16.msra.mxu0 %v7285_v23 }
 0x711   : > { %4435 = vmatprep.subr.bf16.mxu1 %v6029_v26  ;;  %4508 = vmatprep.subr.bf16.mxu0 %v7290_v6 }
 0x714   : > { %4436 = vmatpush1.bf16.msra.mxu1 %v6027_v8  ;;  %4509 = vmatpush1.bf16.msra.mxu0 %v7295_v10 }
 0x715   : > { %4437 = vmatprep.subr.bf16.mxu1 %v6035_v32  ;;  %4510 = vmatprep.subr.bf16.mxu0 %v7300_v30 }
 0x718   : > { %4438 = vmatpush1.bf16.msra.mxu1 %v6033_v39  ;;  %4511 = vmatpush1.bf16.msra.mxu0 %v7305_v41  ;;  %v6071_v39 = vld [vmem:[%s6452_s1 + $0xe4] ss:$8 sps:$4 sm:$0xff]  }
 0x719   : > { %4439 = vmatprep.subr.bf16.mxu1 %v6041_v50  ;;  %4512 = vmatprep.subr.bf16.mxu0 %v7310_v24  ;;  %v7365_v50 = vld [vmem:[%s6452_s1 + $0x1e4] ss:$8 sps:$4 sm:$0xff]  }
 0x71a   : > { %7953 = vst [vmem:[#allocation30_spill] sm:$0xff] %v7365_v50 }
 0x71c   : > { %4440 = vmatpush1.bf16.msra.mxu1 %v6039_v61  ;;  %4513 = vmatpush1.bf16.msra.mxu0 %v7315_v1  ;;  %v6181_v61 = vld [vmem:[#allocation2 + $0x20] sm:$0xff] }
 0x71d   : > { %4441 = vmatprep.subr.bf16.mxu1 %v6047_v37  ;;  %4514 = vmatprep.subr.bf16.mxu0 %v7320_v17 }
 0x720   : > { %4442 = vmatpush1.bf16.msra.mxu1 %v6045_v58  ;;  %4515 = vmatpush1.bf16.msra.mxu0 %v7325_v49  ;;  %v6182_v58 = vld [vmem:[#allocation2 + $0x30] sm:$0xff] }
 0x721   : > { %4443 = vmatprep.subr.bf16.mxu1 %v6053_v38  ;;  %4516 = vmatprep.subr.bf16.mxu0 %v7330_v48 }
 0x724   : > { %4444 = vmatpush1.bf16.msra.mxu1 %v6051_v55  ;;  %4517 = vmatpush1.bf16.msra.mxu0 %v7335_v2  ;;  %v6069_v55 = vld [vmem:[%s6452_s1 + $0xe0] ss:$8 sps:$4 sm:$0xff]  }
 0x725   : > { %4445 = vmatprep.subr.bf16.mxu1 %v6059_v57  ;;  %4518 = vmatprep.subr.bf16.mxu0 %v7340_v16  ;;  %v7373_v57 = vld [vmem:[%s6452_s1 + $0x1e0] ss:$8 sps:$4 sm:$0xff]  }
 0x726   : > { %7954 = vst [vmem:[#allocation31_spill] sm:$0xff] %v7373_v57 }
 0x728   : > { %4446 = vmatpush1.bf16.msra.mxu1 %v6057_v40  ;;  %4519 = vmatpush1.bf16.msra.mxu0 %v7345_v27  ;;  %v6183_v40 = vld [vmem:[#allocation2 + $0x28] sm:$0xff] }
 0x729   : > { %4447 = vmatprep.subr.bf16.mxu1 %v6065_v60  ;;  %4520 = vmatprep.subr.bf16.mxu0 %v7351_v7  ;;  %v6191_v27 = vld [vmem:[#allocation2 + $0x68] sm:$0xff] }
 0x72c   : > { %4448 = vmatpush1.bf16.msra.mxu1 %v6063_v5  ;;  %4521 = vmatpush1.bf16.msra.mxu0 %v7355_v25 }
 0x72d   : > { %4449 = vmatprep.subr.bf16.mxu1 %v6071_v39  ;;  %4522 = vmatprep.subr.bf16.mxu0 %v7365_v50  ;;  %v6075_v39 = vld [vmem:[%s6452_s1 + $0xf0] ss:$8 sps:$4 sm:$0xff]  }
 0x730   : > { %4450 = vmatpush1.bf16.msra.mxu1 %v6069_v55  ;;  %4523 = vmatpush1.bf16.msra.mxu0 %v7373_v57  ;;  %v6189_v57 = vld [vmem:[#allocation2 + $0x60] sm:$0xff] }
 0x74a   : > { %v3115_v35 = vpop.f32.mrb[52].mxu0 }
 0x74b   : > { %v3116_v15 = vadd.f32 %v3115_v35, %v7198_v14  ;;  %v3117_v31 = vpop.f32.mrb[53].mxu0  ;;  %v6184_v35 = vld [vmem:[#allocation2 + $0x38] sm:$0xff] }
 0x74c   : > { %v3118_v53 = vadd.f32 %v3117_v31, %v7201_v47  ;;  %v3119_v59 = vpop.f32.mrb[54].mxu0 }
 0x74d   : > { %v3120_v26 = vadd.f32 %v3119_v59, %v7198_v14  ;;  %v3121_v8 = vpop.f32.mrb[55].mxu0  ;;  %v7367_v37 = vadd.f32 %v6181_v61, %v3116_v15 }
 0x74e   : > { %v3122_v32 = vadd.f32 %v3121_v8, %v7201_v47  ;;  %v7375_v60 = vadd.f32 %v6183_v40, %v3118_v53  ;;  %v7387_v53 = vld [vmem:[%s6452_s1 + $0x1f4] ss:$8 sps:$4 sm:$0xff]  }
 0x74f   : > { %v7369_v38 = vadd.f32 %v6182_v58, %v3120_v26  ;;  %v6077_v26 = vld [vmem:[%s6452_s1 + $0xf4] ss:$8 sps:$4 sm:$0xff]   ;;  %7955 = vst [vmem:[#allocation32_spill] sm:$0xff] %v7387_v53  ;;  %v7392_v58 = vld [vmem:[%s6452_s1 + $0x1f0] ss:$8 sps:$4 sm:$0xff]   ;;  %4524 = vmatprep.subr.bf16.mxu0 %v7387_v53 }
 0x750   : > { %v7377_v5 = vadd.f32 %v6184_v35, %v3122_v32  ;;  %7956 = vst [vmem:[#allocation33_spill] sm:$0xff] %v7392_v58  ;;  %4451 = vmatprep.subr.bf16.mxu1 %v6077_v26  ;;  %4525 = vmatpush1.bf16.msra.mxu0 %v7392_v58 }
 0x751   : > { %v3174_v15 = vadd.f32 %v7369_v38, %v7367_v37  ;;  %4452 = vmatpush1.bf16.msra.mxu1 %v6075_v39 }
 0x752   : > { %v3181_v31 = vadd.f32 %v7377_v5, %v7375_v60  ;;  %v3125_v59 = vpop.f32.mrb[56].mxu0  ;;  %5591 = vmatprep.subr.bf16.mxu1 %v7225_v13 }
 0x753   : > { %v3175_v8 = vrot.slane %v3174_v15, 4  ;;  %v3126_v32 = vadd.f32 %v3125_v59, %v7198_v14  ;;  %v3127_v61 = vpop.f32.mrb[57].mxu0 }
 0x754   : > { %v3182_v40 = vrot.slane %v3181_v31, 4  ;;  %v3128_v35 = vadd.f32 %v3127_v61, %v7201_v47  ;;  %v3129_v55 = vpop.f32.mrb[58].mxu0  ;;  %v6186_v61 = vld [vmem:[#allocation2 + $0x50] sm:$0xff] }
 0x755   : > { %v3176_v21 = vadd.f32 %v3175_v8, %v3174_v15  ;;  %v3130_v18 = vadd.f32 %v3129_v55, %v7198_v14  ;;  %v3131_v52 = vpop.f32.mrb[59].mxu0  ;;  %v7400_v44 = vadd.f32 %v6185_v36, %v3126_v32  ;;  %v6187_v15 = vld [vmem:[#allocation2 + $0x48] sm:$0xff]  ;;  %v6188_v55 = vld [vmem:[#allocation2 + $0x58] sm:$0xff] }
 0x756   : > { %v3183_v46 = vadd.f32 %v3182_v40, %v3181_v31  ;;  %v3132_v59 = vadd.f32 %v3131_v52, %v7201_v47  ;;  %v7404_v8 = vadd.f32 %v6187_v15, %v3128_v35 }
 0x757   : > { %v3177_v51 = vrot.slane %v3176_v21, 2  ;;  %v7402_v26 = vadd.f32 %v6186_v61, %v3130_v18 }
 0x758   : > { %v3184_v3 = vrot.slane %v3183_v46, 2  ;;  %v7406_v39 = vadd.f32 %v6188_v55, %v3132_v59 }
 0x759   : > { %v3178_v20 = vadd.f32 %v3177_v51, %v3176_v21  ;;  %v3188_v52 = vadd.f32 %v7402_v26, %v7400_v44 }
 0x75a   : > { %v3185_v31 = vadd.f32 %v3184_v3, %v3183_v46  ;;  %v3195_v13 = vadd.f32 %v7406_v39, %v7404_v8  ;;  %v3135_v36 = vpop.f32.mrb[60].mxu0 }
 0x75b   : > { %v3179_v32 = vrot.slane %v3178_v20, 1  ;;  %v3189_v40 = vrot.slane %v3188_v52, 4  ;;  %v3136_v18 = vadd.f32 %v3135_v36, %v7198_v14  ;;  %v3137_v61 = vpop.f32.mrb[61].mxu0  ;;  %v6190_v36 = vld [vmem:[#allocation2 + $0x70] sm:$0xff] }
 0x75c   : > { %v3186_v28 = vrot.slane %v3185_v31, 1  ;;  %v3196_v35 = vrot.slane %v3195_v13, 4  ;;  %v3138_v15 = vadd.f32 %v3137_v61, %v7201_v47  ;;  %v3139_v59 = vpop.f32.mrb[62].mxu0 }
 0x75d   : > { %v3180_v55 = vadd.f32 %v3179_v32, %v3178_v20  ;;  %v3190_v51 = vadd.f32 %v3189_v40, %v3188_v52  ;;  %v3140_v21 = vadd.f32 %v3139_v59, %v7198_v14  ;;  %v3141_v56 = vpop.f32.mrb[63].mxu0  ;;  %v7416_v50 = vadd.f32 %v6189_v57, %v3136_v18  ;;  %v6192_v52 = vld [vmem:[#allocation2 + $0x78] sm:$0xff] }
 0x75e   : > { %v3187_v3 = vadd.f32 %v3186_v28, %v3185_v31  ;;  %v3197_v46 = vadd.f32 %v3196_v35, %v3195_v13  ;;  %v3142_v54 = vadd.f32 %v3141_v56, %v7201_v47  ;;  %v7420_v20 = vadd.f32 %v6191_v27, %v3138_v15 }
 0x75f   : > { %v3219_v58 = vmul.f32 0.0625, %v3180_v55  ;;  %v3191_v53 = vrot.slane %v3190_v51, 2  ;;  %v7418_v25 = vadd.f32 %v6190_v36, %v3140_v21 }
 0x760   : > { %v3220_v7 = vmul.f32 0.0625, %v3187_v3  ;;  %v3198_v61 = vrot.slane %v3197_v46, 2  ;;  %v3159_v14 = vadd.f32 %v6192_v52, %v3142_v54 }
 0x761   : > { %v7423_v28 = vsub.f32 %v7369_v38, %v3219_v58  ;;  %v3192_v31 = vadd.f32 %v3191_v53, %v3190_v51  ;;  %v3202_v47 = vadd.f32 %v7418_v25, %v7416_v50  ;;  %v7428_v56 = vsub.f32 %v7367_v37, %v3219_v58 }
 0x762   : > { %v7431_v57 = vsub.f32 %v7377_v5, %v3220_v7  ;;  %v3199_v13 = vadd.f32 %v3198_v61, %v3197_v46  ;;  %v3209_v32 = vadd.f32 %v3159_v14, %v7420_v20  ;;  %v7435_v27 = vsub.f32 %v7375_v60, %v3220_v7 }
 0x763   : > { %v3247_v54 = vmul.f32 %v7423_v28, %v7423_v28  ;;  %v3193_v38 = vrot.slane %v3192_v31, 1  ;;  %v3203_v53 = vrot.slane %v3202_v47, 4  ;;  %v3245_v40 = vmul.f32 %v7428_v56, %v7428_v56 }
 0x764   : > { %v3248_v37 = vmul.f32 %v7431_v57, %v7431_v57  ;;  %v3200_v58 = vrot.slane %v3199_v13, 1  ;;  %v3210_v5 = vrot.slane %v3209_v32, 4  ;;  %v3246_v18 = vmul.f32 %v7435_v27, %v7435_v27 }
 0x765   : > { %v3194_v35 = vadd.f32 %v3193_v38, %v3192_v31  ;;  %v3204_v15 = vadd.f32 %v3203_v53, %v3202_v47  ;;  %v3271_v7 = vadd.f32 %v3247_v54, %v3245_v40 }
 0x766   : > { %v3201_v60 = vadd.f32 %v3200_v58, %v3199_v13  ;;  %v3211_v59 = vadd.f32 %v3210_v5, %v3209_v32  ;;  %v3278_v55 = vadd.f32 %v3248_v37, %v3246_v18 }
 0x767   : > { %v3221_v51 = vmul.f32 0.0625, %v3194_v35  ;;  %v3205_v21 = vrot.slane %v3204_v15, 2  ;;  %v3272_v3 = vrot.slane %v3271_v7, 4 }
 0x768   : > { %v3222_v46 = vmul.f32 0.0625, %v3201_v60  ;;  %v3212_v36 = vrot.slane %v3211_v59, 2  ;;  %v3279_v61 = vrot.slane %v3278_v55, 4 }
 0x769   : > { %v7446_v52 = vsub.f32 %v7402_v26, %v3221_v51  ;;  %v3206_v16 = vadd.f32 %v3205_v21, %v3204_v15  ;;  %v3273_v2 = vadd.f32 %v3272_v3, %v3271_v7  ;;  %v7449_v48 = vsub.f32 %v7400_v44, %v3221_v51 }
 0x76a   : > { %v7452_v31 = vsub.f32 %v7406_v39, %v3222_v46  ;;  %v3213_v47 = vadd.f32 %v3212_v36, %v3211_v59  ;;  %v3280_v13 = vadd.f32 %v3279_v61, %v3278_v55  ;;  %v7455_v32 = vsub.f32 %v7404_v8, %v3222_v46 }
 0x76b   : > { %v3251_v54 = vmul.f32 %v7446_v52, %v7446_v52  ;;  %v3207_v38 = vrot.slane %v3206_v16, 1  ;;  %v3274_v53 = vrot.slane %v3273_v2, 2  ;;  %v3249_v26 = vmul.f32 %v7449_v48, %v7449_v48 }
 0x76c   : > { %v3252_v44 = vmul.f32 %v7452_v31, %v7452_v31  ;;  %v3214_v40 = vrot.slane %v3213_v47, 1  ;;  %v3281_v37 = vrot.slane %v3280_v13, 2  ;;  %v3250_v39 = vmul.f32 %v7455_v32, %v7455_v32 }
 0x76d   : > { %v3208_v58 = vadd.f32 %v3207_v38, %v3206_v16  ;;  %v3275_v5 = vadd.f32 %v3274_v53, %v3273_v2  ;;  %v3285_v8 = vadd.f32 %v3251_v54, %v3249_v26 }
 0x76e   : > { %v3215_v18 = vadd.f32 %v3214_v40, %v3213_v47  ;;  %v3282_v35 = vadd.f32 %v3281_v37, %v3280_v13  ;;  %v3292_v15 = vadd.f32 %v3252_v44, %v3250_v39 }
 0x76f   : > { %v3223_v7 = vmul.f32 0.0625, %v3208_v58  ;;  %v3276_v60 = vrot.slane %v3275_v5, 1  ;;  %v3286_v59 = vrot.slane %v3285_v8, 4 }
 0x770   : > { %v3224_v55 = vmul.f32 0.0625, %v3215_v18  ;;  %v3283_v51 = vrot.slane %v3282_v35, 1  ;;  %v3293_v21 = vrot.slane %v3292_v15, 4 }
 0x771   : > { %v7466_v3 = vsub.f32 %v7418_v25, %v3223_v7  ;;  %v3277_v46 = vadd.f32 %v3276_v60, %v3275_v5  ;;  %v3287_v36 = vadd.f32 %v3286_v59, %v3285_v8  ;;  %v7469_v61 = vsub.f32 %v7416_v50, %v3223_v7 }
 0x772   : > { %v7471_v16 = vsub.f32 %v3159_v14, %v3224_v55  ;;  %v3284_v2 = vadd.f32 %v3283_v51, %v3282_v35  ;;  %v3294_v47 = vadd.f32 %v3293_v21, %v3292_v15  ;;  %v7474_v13 = vsub.f32 %v7420_v20, %v3224_v55 }
 0x773   : > { %v3255_v54 = vmul.f32 %v7466_v3, %v7466_v3  ;;  %v3315_v38 = vmul.f32 0.0625, %v3277_v46  ;;  %v3288_v53 = vrot.slane %v3287_v36, 2  ;;  %v3253_v25 = vmul.f32 %v7469_v61, %v7469_v61 }
 0x774   : > { %v3256_v26 = vmul.f32 %v7471_v16, %v7471_v16  ;;  %v3316_v50 = vmul.f32 0.0625, %v3284_v2  ;;  %v3295_v44 = vrot.slane %v3294_v47, 2  ;;  %v3254_v14 = vmul.f32 %v7474_v13, %v7474_v13 }
 0x775   : > { %v3323_v40 = vadd.f32 1e-05, %v3315_v38  ;;  %v3289_v37 = vadd.f32 %v3288_v53, %v3287_v36  ;;  %v3299_v20 = vadd.f32 %v3255_v54, %v3253_v25 }
 0x776   : > { %v3324_v39 = vadd.f32 1e-05, %v3316_v50  ;;  %v3296_v58 = vadd.f32 %v3295_v44, %v3294_v47  ;;  %v3306_v5 = vadd.f32 %v3256_v26, %v3254_v14 }
 0x777   : > { %6149 = vrsqrt.f32 %v3323_v40  ;;  %v3290_v8 = vrot.slane %v3289_v37, 1  ;;  %v3300_v18 = vrot.slane %v3299_v20, 4 }
 0x778   : > { %6151 = vrsqrt.f32 %v3324_v39  ;;  %v3297_v35 = vrot.slane %v3296_v58, 1  ;;  %v3307_v15 = vrot.slane %v3306_v5, 4 }
 0x779   : > { %v3291_v7 = vadd.f32 %v3290_v8, %v3289_v37  ;;  %v3301_v60 = vadd.f32 %v3300_v18, %v3299_v20 }
 0x77a   : > { %v3298_v59 = vadd.f32 %v3297_v35, %v3296_v58  ;;  %v3308_v55 = vadd.f32 %v3307_v15, %v3306_v5 }
 0x77b   : > { %v3317_v51 = vmul.f32 0.0625, %v3291_v7  ;;  %v3302_v21 = vrot.slane %v3301_v60, 2 }
 0x77c   : > { %v3318_v46 = vmul.f32 0.0625, %v3298_v59  ;;  %v3309_v2 = vrot.slane %v3308_v55, 2 }
 0x77d   : > { %v3325_v38 = vadd.f32 1e-05, %v3317_v51  ;;  %v3303_v36 = vadd.f32 %v3302_v21, %v3301_v60 }
 0x77e   : > { %v3326_v54 = vadd.f32 1e-05, %v3318_v46  ;;  %v3310_v53 = vadd.f32 %v3309_v2, %v3308_v55 }
 0x77f   : > { %6153 = vrsqrt.f32 %v3325_v38  ;;  %v3304_v47 = vrot.slane %v3303_v36, 1  ;;  %v3441_v38 = vsub.s32 3, %v6755_v42 }
 0x780   : > { %6155 = vrsqrt.f32 %v3326_v54  ;;  %v3311_v25 = vrot.slane %v3310_v53, 1 }
 0x781   : > { %v6150_v26 = vpop.eup %6149  ;;  %v3305_v50 = vadd.f32 %v3304_v47, %v3303_v36 }
 0x782   : > { %v6152_v44 = vpop.eup %6151  ;;  %v7485_v14 = vmul.f32 %v6150_v26, %v7428_v56  ;;  %v7488_v40 = vmul.f32 %v6150_v26, %v7423_v28  ;;  %v3312_v37 = vadd.f32 %v3311_v25, %v3310_v53 }
 0x783   : > { %v7491_v20 = vmul.f32 %v6152_v44, %v7435_v27  ;;  %v7494_v39 = vmul.f32 %v6152_v44, %v7431_v57  ;;  %v3319_v58 = vmul.f32 0.0625, %v3305_v50 }
 0x784   : > { %v3320_v5 = vmul.f32 0.0625, %v3312_v37  ;;  %v3355_v56 = vpack.c.bf16 %v7488_v40, %v7485_v14 }
 0x785   : > { %v3356_v8 = vpack.c.bf16 %v7494_v39, %v7491_v20  ;;  %v3327_v18 = vadd.f32 1e-05, %v3319_v58 }
 0x786   : > { %v3328_v35 = vadd.f32 1e-05, %v3320_v5 }
 0x787   : > { %3809 = vmatprep.mubr.bf16.mxu1 %v3356_v8  ;;  %3882 = vmatprep.mubr.bf16.mxu0 %v3356_v8  ;;  %6157 = vrsqrt.f32 %v3327_v18 }
 0x788   : > { %3810 = vmatmul.mubr.bf16.gmra.mrb[68].mxu1 %v3355_v56  ;;  %3883 = vmatmul.mubr.bf16.gmra.mrb[68].mxu0 %v3355_v56  ;;  %6159 = vrsqrt.f32 %v3328_v35 }
 0x789   : > { %v6154_v28 = vpop.eup %6153 }
 0x78a   : > { %v6156_v27 = vpop.eup %6155  ;;  %v7501_v57 = vmul.f32 %v6154_v28, %v7449_v48  ;;  %v7504_v15 = vmul.f32 %v6154_v28, %v7446_v52 }
 0x78b   : > { %v7507_v7 = vmul.f32 %v6156_v27, %v7455_v32  ;;  %v7510_v60 = vmul.f32 %v6156_v27, %v7452_v31 }
 0x78c   : > { %v3357_v55 = vpack.c.bf16 %v7504_v15, %v7501_v57 }
 0x78d   : > { %v3358_v59 = vpack.c.bf16 %v7510_v60, %v7507_v7 }
 0x78f   : > { %3819 = vmatprep.mubr.bf16.mxu1 %v3358_v59  ;;  %3892 = vmatprep.mubr.bf16.mxu0 %v3358_v59 }
 0x790   : > { %3820 = vmatmul.mubr.bf16.gmra.mrb[72].mxu1 %v3357_v55  ;;  %3893 = vmatmul.mubr.bf16.gmra.mrb[72].mxu0 %v3357_v55 }
 0x791   : > { %v6158_v48 = vpop.eup %6157 }
 0x792   : > { %v6160_v52 = vpop.eup %6159  ;;  %v7517_v51 = vmul.f32 %v6158_v48, %v7469_v61  ;;  %v7520_v32 = vmul.f32 %v6158_v48, %v7466_v3  ;;  %v3437_v61 = vsub.s32 2, %v6755_v42  ;;  %v3425_v3 = vld [vmem:[%s6447_s4] sm:$0xf] }
 0x793   : > { %v7523_v31 = vmul.f32 %v6160_v52, %v7474_v13  ;;  %v7526_v21 = vmul.f32 %v6160_v52, %v7471_v16  ;;  %v7536_v13 = vrot.slane %v3425_v3, %v6758_v43  ;;  %v7541_v36 = vrot.slane %v3425_v3, %v6766_v45 }
 0x794   : > { %v3359_v2 = vpack.c.bf16 %v7520_v32, %v7517_v51  ;;  %v7538_v16 = vrot.slane %v3425_v3, %v3437_v61  ;;  %v7543_v54 = vrot.slane %v3425_v3, %v3441_v38 }
 0x795   : > { %v3360_v46 = vpack.c.bf16 %v7526_v21, %v7523_v31 }
 0x797   : > { %3829 = vmatprep.mubr.bf16.mxu1 %v3360_v46  ;;  %3902 = vmatprep.mubr.bf16.mxu0 %v3360_v46 }
 0x798   : > { %3830 = vmatmul.mubr.bf16.gmra.mrb[76].mxu1 %v3359_v2  ;;  %3903 = vmatmul.mubr.bf16.gmra.mrb[76].mxu0 %v3359_v2 }
 0x7ca   : > { %v3801_v53 = vpop.f32.mrb[64].mxu1  ;;  %v3874_v47 = vpop.f32.mrb[64].mxu0 }
 0x7cb   : > { %v3802_v25 = vadd.f32 %v3801_v53, %v7536_v13  ;;  %v3875_v26 = vadd.f32 %v3874_v47, %v7538_v16  ;;  %v3803_v50 = vpop.f32.mrb[65].mxu1  ;;  %v3876_v44 = vpop.f32.mrb[65].mxu0 }
 0x7cc   : > { %v3804_v42 = vadd.f32 %v3803_v50, %v7541_v36  ;;  %v3877_v37 = vadd.f32 %v3876_v44, %v7543_v54  ;;  %v3805_v58 = vpop.f32.mrb[66].mxu1  ;;  %v3878_v5 = vpop.f32.mrb[66].mxu0 }
 0x7cd   : > { %vm3913_vm2 = vcmp.gt.f32.partialorder %v3802_v25, 0.0  ;;  %v3945_v8 = vmul.f32 0.2, %v3802_v25  ;;  %vm3915_vm3 = vcmp.gt.f32.partialorder %v3875_v26, 0.0  ;;  %v3947_v18 = vmul.f32 0.2, %v3875_v26 }
 0x7ce   : > { %vm3914_vm4 = vcmp.gt.f32.partialorder %v3804_v42, 0.0  ;;  %v3946_v56 = vmul.f32 0.2, %v3804_v42  ;;  %vm3916_vm5 = vcmp.gt.f32.partialorder %v3877_v37, 0.0  ;;  %v3948_v35 = vmul.f32 0.2, %v3877_v37 }
 0x7cf   : > { %v3806_v28 = vadd.f32 %v3805_v58, %v7536_v13  ;;  %v3879_v27 = vadd.f32 %v3878_v5, %v7538_v16  ;;  %v3807_v59 = vpop.f32.mrb[67].mxu1  ;;  %v3880_v55 = vpop.f32.mrb[67].mxu0  ;;  %v3977_v48 = vsel %vm3913_vm2, %v3802_v25, %v3945_v8  ;;  %v3979_v52 = vsel %vm3915_vm3, %v3875_v26, %v3947_v18 }
 0x7d0   : > { %v3808_v46 = vadd.f32 %v3807_v59, %v7541_v36  ;;  %v3881_v2 = vadd.f32 %v3880_v55, %v7543_v54  ;;  %v3978_v44 = vsel %vm3914_vm4, %v3804_v42, %v3946_v56  ;;  %v3980_v58 = vsel %vm3916_vm5, %v3877_v37, %v3948_v35 }
 0x7d1   : > { %vm3917_vm6 = vcmp.gt.f32.partialorder %v3806_v28, 0.0  ;;  %v3949_v61 = vmul.f32 0.2, %v3806_v28  ;;  %vm3919_vm7 = vcmp.gt.f32.partialorder %v3879_v27, 0.0  ;;  %v3951_v3 = vmul.f32 0.2, %v3879_v27 }
 0x7d2   : > { %vm3918_vm8 = vcmp.gt.f32.partialorder %v3808_v46, 0.0  ;;  %v3950_v38 = vmul.f32 0.2, %v3808_v46  ;;  %vm3920_vm9 = vcmp.gt.f32.partialorder %v3881_v2, 0.0  ;;  %v3952_v53 = vmul.f32 0.2, %v3881_v2 }
 0x7d3   : > { %v3981_v47 = vsel %vm3917_vm6, %v3806_v28, %v3949_v61  ;;  %v3983_v50 = vsel %vm3919_vm7, %v3879_v27, %v3951_v3 }
 0x7d4   : > { %v4009_v25 = vpack.c.bf16 %v3981_v47, %v3977_v48  ;;  %v4011_v26 = vpack.c.bf16 %v3983_v50, %v3979_v52  ;;  %v3982_v5 = vsel %vm3918_vm8, %v3808_v46, %v3950_v38  ;;  %v3984_v8 = vsel %vm3920_vm9, %v3881_v2, %v3952_v53 }
 0x7d5   : > { %v4010_v18 = vpack.c.bf16 %v3982_v5, %v3978_v44  ;;  %v4012_v59 = vpack.c.bf16 %v3984_v8, %v3980_v58 }
 0x7d7   : > { %4453 = vmatprep.mubr.bf16.mxu1 %v4010_v18  ;;  %4526 = vmatprep.mubr.bf16.mxu0 %v4012_v59 }
 0x7d8   : > { %4454 = vmatmul.mubr.bf16.vlgmr.msra.gmra.mrb[80].mxu1 %v4009_v25  ;;  %4527 = vmatmul.mubr.bf16.vlgmr.msra.gmra.mrb[80].mxu0 %v4011_v26 }
 0x7d9   : > { %5607 = vmatpush1.bf16.msra.mxu1 %v7222_v62  ;;  %v7957_v62 = vld [vmem:[#allocation24_spill] sm:$0xff] }
 0x7da   : > { %5592 = vmatprep.subr.bf16.mxu1 %v7235_v12  ;;  %v7959_v12 = vld [vmem:[#allocation26_spill] sm:$0xff] }
 0x7dd   : > { %5608 = vmatpush1.bf16.msra.mxu1 %v7232_v0  ;;  %v7958_v0 = vld [vmem:[#allocation25_spill] sm:$0xff] }
 0x7de   : > { %5593 = vmatprep.subr.bf16.mxu1 %v7239_v29  ;;  %v7960_v29 = vld [vmem:[#allocation27_spill] sm:$0xff] }
 0x7e1   : > { %5609 = vmatpush1.bf16.msra.mxu1 %v7245_v19  ;;  %v7961_v19 = vld [vmem:[#allocation28_spill] sm:$0xff] }
 0x7e2   : > { %5594 = vmatprep.subr.bf16.mxu1 %v7250_v9  ;;  %v7962_v9 = vld [vmem:[#allocation29_spill] sm:$0xff] }
 0x7e5   : > { %5610 = vmatpush1.bf16.msra.mxu1 %v7255_v4  ;;  %v7963_v4 = vld [vmem:[#allocation30_spill] sm:$0xff] }
 0x7e6   : > { %5595 = vmatprep.subr.bf16.mxu1 %v7260_v22  ;;  %v7964_v22 = vld [vmem:[#allocation31_spill] sm:$0xff] }
 0x7e9   : > { %5611 = vmatpush1.bf16.msra.mxu1 %v7265_v11  ;;  %v7965_v11 = vld [vmem:[#allocation32_spill] sm:$0xff] }
 0x7ea   : > { %5596 = vmatprep.subr.bf16.mxu1 %v7270_v63  ;;  %v7966_v63 = vld [vmem:[#allocation33_spill] sm:$0xff] }
 0x7ed   : > { %5612 = vmatpush1.bf16.msra.mxu1 %v7275_v34 }
 0x7ee   : > { %5597 = vmatprep.subr.bf16.mxu1 %v7280_v33 }
 0x7f1   : > { %5613 = vmatpush1.bf16.msra.mxu1 %v7285_v23 }
 0x7f2   : > { %5598 = vmatprep.subr.bf16.mxu1 %v7290_v6 }
 0x7f5   : > { %5614 = vmatpush1.bf16.msra.mxu1 %v7295_v10 }
 0x7f6   : > { %5599 = vmatprep.subr.bf16.mxu1 %v7300_v30 }
 0x7f9   : > { %5615 = vmatpush1.bf16.msra.mxu1 %v7305_v41 }
 0x7fa   : > { %5600 = vmatprep.subr.bf16.mxu1 %v7310_v24 }
 0x7fd   : > { %5616 = vmatpush1.bf16.msra.mxu1 %v7315_v1 }
 0x7fe   : > { %5601 = vmatprep.subr.bf16.mxu1 %v7320_v17 }
 0x801   : > { %5617 = vmatpush1.bf16.msra.mxu1 %v7325_v49 }
 0x802   : > { %5602 = vmatprep.subr.bf16.mxu1 %v7957_v62 }
 0x805   : > { %5618 = vmatpush1.bf16.msra.mxu1 %v7958_v0 }
 0x806   : > { %5603 = vmatprep.subr.bf16.mxu1 %v7959_v12 }
 0x809   : > { %5619 = vmatpush1.bf16.msra.mxu1 %v7960_v29 }
 0x80a   : > { %5604 = vmatprep.subr.bf16.mxu1 %v7961_v19 }
 0x80d   : > { %5620 = vmatpush1.bf16.msra.mxu1 %v7962_v9 }
 0x80e   : > { %5605 = vmatprep.subr.bf16.mxu1 %v7963_v4 }
 0x811   : > { %5621 = vmatpush1.bf16.msra.mxu1 %v7964_v22 }
 0x812   : > { %5606 = vmatprep.subr.bf16.mxu1 %v7965_v11 }
 0x815   : > { %5622 = vmatpush1.bf16.msra.mxu1 %v7966_v63 }
 0x85b   : > { %v3811_v34 = vpop.f32.mrb[68].mxu1  ;;  %v3884_v33 = vpop.f32.mrb[68].mxu0 }
 0x85c   : > { %v3812_v23 = vadd.f32 %v3811_v34, %v7536_v13  ;;  %v3885_v6 = vadd.f32 %v3884_v33, %v7538_v16  ;;  %v3813_v10 = vpop.f32.mrb[69].mxu1  ;;  %v3886_v30 = vpop.f32.mrb[69].mxu0 }
 0x85d   : > { %v3814_v41 = vadd.f32 %v3813_v10, %v7541_v36  ;;  %v3887_v24 = vadd.f32 %v3886_v30, %v7543_v54  ;;  %v3815_v1 = vpop.f32.mrb[70].mxu1  ;;  %v3888_v17 = vpop.f32.mrb[70].mxu0 }
 0x85e   : > { %vm3921_vm10 = vcmp.gt.f32.partialorder %v3812_v23, 0.0  ;;  %v3953_v49 = vmul.f32 0.2, %v3812_v23  ;;  %vm3923_vm11 = vcmp.gt.f32.partialorder %v3885_v6, 0.0  ;;  %v3955_v42 = vmul.f32 0.2, %v3885_v6 }
 0x85f   : > { %vm3922_vm12 = vcmp.gt.f32.partialorder %v3814_v41, 0.0  ;;  %v3954_v37 = vmul.f32 0.2, %v3814_v41  ;;  %vm3924_vm13 = vcmp.gt.f32.partialorder %v3887_v24, 0.0  ;;  %v3956_v56 = vmul.f32 0.2, %v3887_v24 }
 0x860   : > { %v3816_v35 = vadd.f32 %v3815_v1, %v7536_v13  ;;  %v3889_v28 = vadd.f32 %v3888_v17, %v7538_v16  ;;  %v3817_v27 = vpop.f32.mrb[71].mxu1  ;;  %v3890_v55 = vpop.f32.mrb[71].mxu0  ;;  %v3985_v46 = vsel %vm3921_vm10, %v3812_v23, %v3953_v49  ;;  %v3987_v2 = vsel %vm3923_vm11, %v3885_v6, %v3955_v42 }
 0x861   : > { %v3818_v48 = vadd.f32 %v3817_v27, %v7541_v36  ;;  %v3891_v52 = vadd.f32 %v3890_v55, %v7543_v54  ;;  %v3986_v44 = vsel %vm3922_vm12, %v3814_v41, %v3954_v37  ;;  %v3988_v58 = vsel %vm3924_vm13, %v3887_v24, %v3956_v56 }
 0x862   : > { %vm3925_vm14 = vcmp.gt.f32.partialorder %v3816_v35, 0.0  ;;  %v3957_v61 = vmul.f32 0.2, %v3816_v35  ;;  %vm3927_vm15 = vcmp.gt.f32.partialorder %v3889_v28, 0.0  ;;  %v3959_v3 = vmul.f32 0.2, %v3889_v28 }
 0x863   : > { %vm3926_vm0 = vcmp.gt.f32.partialorder %v3818_v48, 0.0  ;;  %v3958_v38 = vmul.f32 0.2, %v3818_v48  ;;  %vm3928_vm2 = vcmp.gt.f32.partialorder %v3891_v52, 0.0  ;;  %v3960_v53 = vmul.f32 0.2, %v3891_v52 }
 0x864   : > { %v3821_v47 = vpop.f32.mrb[72].mxu1  ;;  %v3894_v50 = vpop.f32.mrb[72].mxu0  ;;  %v3989_v25 = vsel %vm3925_vm14, %v3816_v35, %v3957_v61  ;;  %v3991_v26 = vsel %vm3927_vm15, %v3889_v28, %v3959_v3 }
 0x865   : > { %v3822_v5 = vadd.f32 %v3821_v47, %v7536_v13  ;;  %v3895_v8 = vadd.f32 %v3894_v50, %v7538_v16  ;;  %v3823_v18 = vpop.f32.mrb[73].mxu1  ;;  %v3896_v59 = vpop.f32.mrb[73].mxu0  ;;  %v3990_v62 = vsel %vm3926_vm0, %v3818_v48, %v3958_v38  ;;  %v3992_v0 = vsel %vm3928_vm2, %v3891_v52, %v3960_v53 }
 0x866   : > { %v3824_v12 = vadd.f32 %v3823_v18, %v7541_v36  ;;  %v3897_v29 = vadd.f32 %v3896_v59, %v7543_v54  ;;  %v3825_v19 = vpop.f32.mrb[74].mxu1  ;;  %v3898_v9 = vpop.f32.mrb[74].mxu0  ;;  %v4014_v4 = vpack.c.bf16 %v3990_v62, %v3986_v44  ;;  %v4016_v22 = vpack.c.bf16 %v3992_v0, %v3988_v58 }
 0x867   : > { %vm3929_vm3 = vcmp.gt.f32.partialorder %v3822_v5, 0.0  ;;  %v3961_v11 = vmul.f32 0.2, %v3822_v5  ;;  %vm3931_vm4 = vcmp.gt.f32.partialorder %v3895_v8, 0.0  ;;  %v3963_v63 = vmul.f32 0.2, %v3895_v8 }
 0x868   : > { %vm3930_vm5 = vcmp.gt.f32.partialorder %v3824_v12, 0.0  ;;  %v3962_v34 = vmul.f32 0.2, %v3824_v12  ;;  %vm3932_vm6 = vcmp.gt.f32.partialorder %v3897_v29, 0.0  ;;  %v3964_v33 = vmul.f32 0.2, %v3897_v29  ;;  %4463 = vmatprep.mubr.bf16.mxu1 %v4014_v4  ;;  %4536 = vmatprep.mubr.bf16.mxu0 %v4016_v22 }
 0x869   : > { %v7600_v23 = vsel %vm3931_vm4, %v3895_v8, %v3963_v63  ;;  %v3826_v6 = vadd.f32 %v3825_v19, %v7536_v13  ;;  %v3899_v10 = vadd.f32 %v3898_v9, %v7538_v16  ;;  %v3827_v30 = vpop.f32.mrb[75].mxu1  ;;  %v3900_v41 = vpop.f32.mrb[75].mxu0  ;;  %v4013_v24 = vpack.c.bf16 %v3989_v25, %v3985_v46 }
 0x86a   : > { %v3828_v1 = vadd.f32 %v3827_v30, %v7541_v36  ;;  %v3901_v17 = vadd.f32 %v3900_v41, %v7543_v54  ;;  %v4015_v49 = vpack.c.bf16 %v3991_v26, %v3987_v2  ;;  %v3994_v42 = vsel %vm3930_vm5, %v3824_v12, %v3962_v34 }
 0x86b   : > { %vm3933_vm7 = vcmp.gt.f32.partialorder %v3826_v6, 0.0  ;;  %v3965_v37 = vmul.f32 0.2, %v3826_v6  ;;  %vm3935_vm8 = vcmp.gt.f32.partialorder %v3899_v10, 0.0  ;;  %v3967_v56 = vmul.f32 0.2, %v3899_v10  ;;  %4464 = vmatmul.mubr.bf16.gmra.mrb[84].mxu1 %v4013_v24 }
 0x86c   : > { %vm3934_vm9 = vcmp.gt.f32.partialorder %v3828_v1, 0.0  ;;  %v3966_v35 = vmul.f32 0.2, %v3828_v1  ;;  %vm3936_vm10 = vcmp.gt.f32.partialorder %v3901_v17, 0.0  ;;  %v3968_v28 = vmul.f32 0.2, %v3901_v17  ;;  %4537 = vmatmul.mubr.bf16.gmra.mrb[84].mxu0 %v4015_v49 }
 0x86d   : > { %v3999_v27 = vsel %vm3935_vm8, %v3899_v10, %v3967_v56  ;;  %v3831_v55 = vpop.f32.mrb[76].mxu1  ;;  %v3904_v48 = vpop.f32.mrb[76].mxu0  ;;  %v3993_v52 = vsel %vm3929_vm3, %v3822_v5, %v3961_v11  ;;  %v3997_v46 = vsel %vm3933_vm7, %v3826_v6, %v3965_v37  ;;  %v3996_v61 = vsel %vm3932_vm6, %v3897_v29, %v3964_v33  ;;  %v4089_v37 = vld [vmem:[%s7967_s19] sm:$0x3] }
 0x86e   : > { %v4019_v2 = vpack.c.bf16 %v3999_v27, %v7600_v23  ;;  %v3832_v3 = vadd.f32 %v3831_v55, %v7536_v13  ;;  %v3905_v38 = vadd.f32 %v3904_v48, %v7538_v16  ;;  %v3833_v53 = vpop.f32.mrb[77].mxu1  ;;  %v3906_v47 = vpop.f32.mrb[77].mxu0  ;;  %v3998_v50 = vsel %vm3934_vm9, %v3828_v1, %v3966_v35 }
 0x86f   : > { %v3834_v44 = vadd.f32 %v3833_v53, %v7541_v36  ;;  %v3907_v58 = vadd.f32 %v3906_v47, %v7543_v54  ;;  %v3835_v25 = vpop.f32.mrb[78].mxu1  ;;  %v3908_v26 = vpop.f32.mrb[78].mxu0  ;;  %v4018_v5 = vpack.c.bf16 %v3998_v50, %v3994_v42  ;;  %v4017_v8 = vpack.c.bf16 %v3997_v46, %v3993_v52 }
 0x870   : > { %vm3937_vm11 = vcmp.gt.f32.partialorder %v3832_v3, 0.0  ;;  %v3969_v18 = vmul.f32 0.2, %v3832_v3  ;;  %vm3939_vm12 = vcmp.gt.f32.partialorder %v3905_v38, 0.0  ;;  %v3971_v59 = vmul.f32 0.2, %v3905_v38 }
 0x871   : > { %vm3938_vm13 = vcmp.gt.f32.partialorder %v3834_v44, 0.0  ;;  %v3970_v62 = vmul.f32 0.2, %v3834_v44  ;;  %vm3940_vm14 = vcmp.gt.f32.partialorder %v3907_v58, 0.0  ;;  %v3972_v0 = vmul.f32 0.2, %v3907_v58  ;;  %4473 = vmatprep.mubr.bf16.mxu1 %v4018_v5 }
 0x872   : > { %v3836_v12 = vadd.f32 %v3835_v25, %v7536_v13  ;;  %v3909_v29 = vadd.f32 %v3908_v26, %v7538_v16  ;;  %v3837_v19 = vpop.f32.mrb[79].mxu1  ;;  %v3910_v9 = vpop.f32.mrb[79].mxu0  ;;  %v4001_v4 = vsel %vm3937_vm11, %v3832_v3, %v3969_v18  ;;  %v4000_v22 = vsel %vm3936_vm10, %v3901_v17, %v3968_v28  ;;  %v7969_v26 = vld [vmem:[#allocation20_spill] sm:$0xff] }
 0x873   : > { %v3838_v11 = vadd.f32 %v3837_v19, %v7541_v36  ;;  %v3911_v63 = vadd.f32 %v3910_v9, %v7543_v54  ;;  %4474 = vmatmul.mubr.bf16.gmra.mrb[88].mxu1 %v4017_v8  ;;  %v4002_v34 = vsel %vm3938_vm13, %v3834_v44, %v3970_v62  ;;  %v4020_v33 = vpack.c.bf16 %v4000_v22, %v3996_v61  ;;  %v7970_v8 = vld [vmem:[#allocation22_spill] sm:$0xff] }
 0x874   : > { %vm3941_vm15 = vcmp.gt.f32.partialorder %v3836_v12, 0.0  ;;  %v3973_v23 = vmul.f32 0.2, %v3836_v12  ;;  %vm3943_vm0 = vcmp.gt.f32.partialorder %v3909_v29, 0.0  ;;  %v3975_v6 = vmul.f32 0.2, %v3909_v29 }
 0x875   : > { %vm3942_vm2 = vcmp.gt.f32.partialorder %v3838_v11, 0.0  ;;  %v3974_v13 = vmul.f32 0.2, %v3838_v11  ;;  %vm3944_vm3 = vcmp.gt.f32.partialorder %v3911_v63, 0.0  ;;  %v3976_v16 = vmul.f32 0.2, %v3911_v63 }
 0x876   : > { %v4005_v10 = vsel %vm3941_vm15, %v3836_v12, %v3973_v23  ;;  %v4004_v30 = vsel %vm3940_vm14, %v3907_v58, %v3972_v0  ;;  %v4003_v41 = vsel %vm3939_vm12, %v3905_v38, %v3971_v59  ;;  %v4007_v36 = vsel %vm3943_vm0, %v3909_v29, %v3975_v6  ;;  %v7968_v58 = vld [vmem:[#allocation21_spill] sm:$0xff]  ;;  %v7971_v59 = vld [vmem:[#allocation23_spill] sm:$0xff] }
 0x877   : > { %v4006_v24 = vsel %vm3942_vm2, %v3838_v11, %v3974_v13  ;;  %v4021_v54 = vpack.c.bf16 %v4005_v10, %v4001_v4  ;;  %v4008_v1 = vsel %vm3944_vm3, %v3911_v63, %v3976_v16  ;;  %v4023_v17 = vpack.c.bf16 %v4007_v36, %v4003_v41 }
 0x878   : > { %v4022_v49 = vpack.c.bf16 %v4006_v24, %v4002_v34  ;;  %v4024_v42 = vpack.c.bf16 %v4008_v1, %v4004_v30  ;;  %v7627_v56 = vrot.slane %v4089_v37, %v6758_v43  ;;  %v7630_v35 = vrot.slane %v4089_v37, %v6766_v45 }
 0x87a   : > { %4483 = vmatprep.mubr.bf16.mxu1 %v4022_v49 }
 0x87b   : > { %4484 = vmatmul.mubr.bf16.gmra.mrb[92].mxu1 %v4021_v54 }
 0x87c   : > { %4546 = vmatprep.mubr.bf16.mxu1 %v4020_v33 }
 0x883   : > { %4547 = vmatmul.mubr.bf16.vlgmr.msra.gmra.mrb[88].mxu1 %v4019_v2 }
 0x884   : > { %4556 = vmatprep.mubr.bf16.mxu1 %v4024_v42 }
 0x88b   : > { %4557 = vmatmul.mubr.bf16.gmra.mrb[92].mxu1 %v4023_v17 }
 0x8ab   : > { %v4455_v28 = vpop.f32.mrb[80].mxu1  ;;  %v4528_v27 = vpop.f32.mrb[80].mxu0 }
 0x8ac   : > { %v4456_v55 = vadd.f32 %v4455_v28, %v7627_v56  ;;  %v4457_v48 = vpop.f32.mrb[81].mxu1  ;;  %v4530_v52 = vpop.f32.mrb[81].mxu0 }
 0x8ad   : > { %v4458_v46 = vadd.f32 %v4457_v48, %v7630_v35  ;;  %v4459_v61 = vpop.f32.mrb[82].mxu1  ;;  %v4532_v2 = vpop.f32.mrb[82].mxu0 }
 0x8ae   : > { %v4529_v3 = vadd.f32 %v4528_v27, %v4456_v55  ;;  %v4460_v38 = vadd.f32 %v4459_v61, %v7627_v56  ;;  %v4461_v53 = vpop.f32.mrb[83].mxu1  ;;  %v4534_v47 = vpop.f32.mrb[83].mxu0 }
 0x8af   : > { %v4531_v43 = vadd.f32 %v4530_v52, %v4458_v46  ;;  %v4462_v50 = vadd.f32 %v4461_v53, %v7630_v35 }
 0x8b0   : > { %v4533_v45 = vadd.f32 %v4532_v2, %v4460_v38  ;;  %v4567_v25 = vadd.f32 %v4529_v3, %v7968_v58 }
 0x8b1   : > { %v4535_v44 = vadd.f32 %v4534_v47, %v4462_v50  ;;  %v4568_v18 = vadd.f32 %v4531_v43, %v7970_v8 }
 0x8b2   : > { %v4569_v5 = vadd.f32 %v4533_v45, %v7969_v26 }
 0x8b3   : > { %v4570_v62 = vadd.f32 %v4535_v44, %v7971_v59 }
 0x8b4   : > { %v4583_v0 = vadd.f32 %v4569_v5, %v4567_v25 }
 0x8b5   : > { %v4590_v12 = vadd.f32 %v4570_v62, %v4568_v18 }
 0x8b6   : > { %v4584_v29 = vrot.slane %v4583_v0, 4 }
 0x8b7   : > { %v4591_v19 = vrot.slane %v4590_v12, 4 }
 0x8b8   : > { %v4585_v9 = vadd.f32 %v4584_v29, %v4583_v0 }
 0x8b9   : > { %v4592_v4 = vadd.f32 %v4591_v19, %v4590_v12 }
 0x8ba   : > { %v4586_v22 = vrot.slane %v4585_v9, 2 }
 0x8bb   : > { %v4593_v11 = vrot.slane %v4592_v4, 2 }
 0x8bc   : > { %v4587_v63 = vadd.f32 %v4586_v22, %v4585_v9 }
 0x8bd   : > { %v4594_v34 = vadd.f32 %v4593_v11, %v4592_v4 }
 0x8be   : > { %v4588_v33 = vrot.slane %v4587_v63, 1 }
 0x8bf   : > { %v4595_v23 = vrot.slane %v4594_v34, 1 }
 0x8c0   : > { %v4589_v6 = vadd.f32 %v4588_v33, %v4587_v63 }
 0x8c1   : > { %v4596_v13 = vadd.f32 %v4595_v23, %v4594_v34 }
 0x8c2   : > { %v4639_v16 = vmul.f32 0.0625, %v4589_v6 }
 0x8c3   : > { %v4640_v10 = vmul.f32 0.0625, %v4596_v13 }
 0x8c4   : > { %v4647_v30 = vsub.f32 %v4567_v25, %v4639_v16  ;;  %v4649_v41 = vsub.f32 %v4569_v5, %v4639_v16 }
 0x8c5   : > { %v4648_v36 = vsub.f32 %v4568_v18, %v4640_v10  ;;  %v4650_v24 = vsub.f32 %v4570_v62, %v4640_v10 }
 0x8c6   : > { %v4663_v54 = vmul.f32 %v4647_v30, %v4647_v30  ;;  %v4665_v1 = vmul.f32 %v4649_v41, %v4649_v41 }
 0x8c7   : > { %v4664_v17 = vmul.f32 %v4648_v36, %v4648_v36  ;;  %v4666_v49 = vmul.f32 %v4650_v24, %v4650_v24 }
 0x8c8   : > { %v4679_v42 = vadd.f32 %v4665_v1, %v4663_v54 }
 0x8c9   : > { %v4686_v37 = vadd.f32 %v4666_v49, %v4664_v17 }
 0x8ca   : > { %v4680_v28 = vrot.slane %v4679_v42, 4 }
 0x8cb   : > { %v4687_v27 = vrot.slane %v4686_v37, 4 }
 0x8cc   : > { %v4681_v55 = vadd.f32 %v4680_v28, %v4679_v42 }
 0x8cd   : > { %v4688_v48 = vadd.f32 %v4687_v27, %v4686_v37 }
 0x8ce   : > { %v4682_v52 = vrot.slane %v4681_v55, 2 }
 0x8cf   : > { %v4689_v46 = vrot.slane %v4688_v48, 2 }
 0x8d0   : > { %v4683_v61 = vadd.f32 %v4682_v52, %v4681_v55 }
 0x8d1   : > { %v4690_v2 = vadd.f32 %v4689_v46, %v4688_v48 }
 0x8d2   : > { %v4684_v3 = vrot.slane %v4683_v61, 1 }
 0x8d3   : > { %v4691_v38 = vrot.slane %v4690_v2, 1 }
 0x8d4   : > { %v4685_v53 = vadd.f32 %v4684_v3, %v4683_v61 }
 0x8d5   : > { %v4692_v47 = vadd.f32 %v4691_v38, %v4690_v2 }
 0x8d6   : > { %v4735_v43 = vmul.f32 0.0625, %v4685_v53 }
 0x8d7   : > { %v4736_v50 = vmul.f32 0.0625, %v4692_v47 }
 0x8d8   : > { %v4743_v45 = vadd.f32 1e-05, %v4735_v43 }
 0x8d9   : > { %v4744_v44 = vadd.f32 1e-05, %v4736_v50 }
 0x8da   : > { %6161 = vrsqrt.f32 %v4743_v45 }
 0x8db   : > { %6163 = vrsqrt.f32 %v4744_v44 }
 0x8e4   : > { %v6162_v58 = vpop.eup %6161 }
 0x8e5   : > { %v6164_v25 = vpop.eup %6163  ;;  %v4759_v26 = vmul.f32 %v6162_v58, %v4647_v30  ;;  %v4761_v5 = vmul.f32 %v6162_v58, %v4649_v41 }
 0x8e6   : > { %v4760_v8 = vmul.f32 %v6164_v25, %v4648_v36  ;;  %v4762_v18 = vmul.f32 %v6164_v25, %v4650_v24 }
 0x8e7   : > { %4775 = vst [vmem:[#allocation2] sm:$0xff] %v4759_v26  ;;  %4777 = vst [vmem:[#allocation2 + $0x10] sm:$0xff] %v4761_v5 }
 0x8e8   : > { %4791 = vst [vmem:[%s7972_s2] sm:$0xff] %v4759_v26  ;;  %4793 = vst [vmem:[%s7972_s2 + $0x10] sm:$0xff] %v4761_v5 }
 0x8e9   : > { %4776 = vst [vmem:[#allocation2 + $0x8] sm:$0xff] %v4760_v8  ;;  %4778 = vst [vmem:[#allocation2 + $0x18] sm:$0xff] %v4762_v18 }
 0x8ea   : > { %4792 = vst [vmem:[%s7972_s2 + $0x8] sm:$0xff] %v4760_v8  ;;  %4794 = vst [vmem:[%s7972_s2 + $0x18] sm:$0xff] %v4762_v18 }
 0x93e   : > { %v4465_v59 = vpop.f32.mrb[84].mxu1 }
 0x93f   : > { %v4466_v62 = vadd.f32 %v4465_v59, %v7627_v56  ;;  %v4538_v0 = vpop.f32.mrb[84].mxu0  ;;  %v4467_v12 = vpop.f32.mrb[85].mxu1 }
 0x940   : > { %v4468_v29 = vadd.f32 %v4467_v12, %v7630_v35  ;;  %v4540_v19 = vpop.f32.mrb[85].mxu0  ;;  %v4469_v9 = vpop.f32.mrb[86].mxu1 }
 0x941   : > { %v4539_v4 = vadd.f32 %v4538_v0, %v4466_v62  ;;  %v4470_v22 = vadd.f32 %v4469_v9, %v7627_v56  ;;  %v4542_v11 = vpop.f32.mrb[86].mxu0  ;;  %v4471_v63 = vpop.f32.mrb[87].mxu1 }
 0x942   : > { %v4541_v34 = vadd.f32 %v4540_v19, %v4468_v29  ;;  %v4472_v33 = vadd.f32 %v4471_v63, %v7630_v35  ;;  %v4544_v23 = vpop.f32.mrb[87].mxu0 }
 0x943   : > { %v4543_v6 = vadd.f32 %v4542_v11, %v4470_v22  ;;  %v4571_v16 = vadd.f32 %v4539_v4, %v7485_v14 }
 0x944   : > { %v4545_v13 = vadd.f32 %v4544_v23, %v4472_v33  ;;  %v4572_v30 = vadd.f32 %v4541_v34, %v7491_v20 }
 0x945   : > { %v4573_v10 = vadd.f32 %v4543_v6, %v7488_v40 }
 0x946   : > { %v4574_v41 = vadd.f32 %v4545_v13, %v7494_v39 }
 0x947   : > { %v4597_v36 = vadd.f32 %v4573_v10, %v4571_v16 }
 0x948   : > { %v4604_v24 = vadd.f32 %v4574_v41, %v4572_v30 }
 0x949   : > { %v4598_v54 = vrot.slane %v4597_v36, 4 }
 0x94a   : > { %v4605_v1 = vrot.slane %v4604_v24, 4 }
 0x94b   : > { %v4599_v17 = vadd.f32 %v4598_v54, %v4597_v36 }
 0x94c   : > { %v4606_v49 = vadd.f32 %v4605_v1, %v4604_v24 }
 0x94d   : > { %v4600_v42 = vrot.slane %v4599_v17, 2 }
 0x94e   : > { %v4607_v37 = vrot.slane %v4606_v49, 2 }
 0x94f   : > { %v4601_v28 = vadd.f32 %v4600_v42, %v4599_v17 }
 0x950   : > { %v4608_v27 = vadd.f32 %v4607_v37, %v4606_v49 }
 0x951   : > { %v4602_v55 = vrot.slane %v4601_v28, 1 }
 0x952   : > { %v4609_v48 = vrot.slane %v4608_v27, 1 }
 0x953   : > { %v4603_v52 = vadd.f32 %v4602_v55, %v4601_v28 }
 0x954   : > { %v4610_v14 = vadd.f32 %v4609_v48, %v4608_v27 }
 0x955   : > { %v4641_v46 = vmul.f32 0.0625, %v4603_v52 }
 0x956   : > { %v4642_v40 = vmul.f32 0.0625, %v4610_v14  ;;  %v4548_v61 = vpop.f32.mrb[88].mxu1 }
 0x957   : > { %v7660_v20 = vsub.f32 %v4571_v16, %v4641_v46  ;;  %v7662_v39 = vsub.f32 %v4573_v10, %v4641_v46  ;;  %v5639_v2 = vadd.f32 %v4548_v61, %v7627_v56  ;;  %v4550_v3 = vpop.f32.mrb[89].mxu1 }
 0x958   : > { %v7665_v38 = vsub.f32 %v4572_v30, %v4642_v40  ;;  %v7667_v53 = vsub.f32 %v4574_v41, %v4642_v40  ;;  %v5640_v47 = vadd.f32 %v4550_v3, %v7630_v35  ;;  %v4552_v43 = vpop.f32.mrb[90].mxu1 }
 0x959   : > { %v4667_v50 = vmul.f32 %v7660_v20, %v7660_v20  ;;  %v4669_v45 = vmul.f32 %v7662_v39, %v7662_v39  ;;  %v5641_v44 = vadd.f32 %v4552_v43, %v7627_v56  ;;  %v4554_v58 = vpop.f32.mrb[91].mxu1  ;;  %v4575_v18 = vadd.f32 %v5639_v2, %v7501_v57 }
 0x95a   : > { %v4668_v25 = vmul.f32 %v7665_v38, %v7665_v38  ;;  %v4670_v26 = vmul.f32 %v7667_v53, %v7667_v53  ;;  %v5642_v5 = vadd.f32 %v4554_v58, %v7630_v35  ;;  %v4576_v0 = vadd.f32 %v5640_v47, %v7507_v7 }
 0x95b   : > { %v4693_v8 = vadd.f32 %v4669_v45, %v4667_v50  ;;  %v4577_v59 = vadd.f32 %v5641_v44, %v7504_v15 }
 0x95c   : > { %v4700_v62 = vadd.f32 %v4670_v26, %v4668_v25  ;;  %v4578_v12 = vadd.f32 %v5642_v5, %v7510_v60 }
 0x95d   : > { %v4694_v29 = vrot.slane %v4693_v8, 4  ;;  %v4611_v19 = vadd.f32 %v4577_v59, %v4575_v18 }
 0x95e   : > { %v4701_v9 = vrot.slane %v4700_v62, 4  ;;  %v4618_v4 = vadd.f32 %v4578_v12, %v4576_v0  ;;  %v4558_v22 = vpop.f32.mrb[92].mxu1 }
 0x95f   : > { %v4695_v11 = vadd.f32 %v4694_v29, %v4693_v8  ;;  %v4612_v63 = vrot.slane %v4611_v19, 4  ;;  %v5643_v34 = vadd.f32 %v4558_v22, %v7627_v56  ;;  %v4560_v33 = vpop.f32.mrb[93].mxu1 }
 0x960   : > { %v4702_v23 = vadd.f32 %v4701_v9, %v4700_v62  ;;  %v4619_v6 = vrot.slane %v4618_v4, 4  ;;  %v5644_v57 = vadd.f32 %v4560_v33, %v7630_v35  ;;  %v4562_v15 = vpop.f32.mrb[94].mxu1 }
 0x961   : > { %v4696_v13 = vrot.slane %v4695_v11, 2  ;;  %v4613_v16 = vadd.f32 %v4612_v63, %v4611_v19  ;;  %v5645_v7 = vadd.f32 %v4562_v15, %v7627_v56  ;;  %v4564_v60 = vpop.f32.mrb[95].mxu1  ;;  %v4579_v54 = vadd.f32 %v5643_v34, %v7517_v51 }
 0x962   : > { %v4703_v10 = vrot.slane %v4702_v23, 2  ;;  %v4620_v30 = vadd.f32 %v4619_v6, %v4618_v4  ;;  %v5646_v41 = vadd.f32 %v4564_v60, %v7630_v35  ;;  %v4580_v42 = vadd.f32 %v5644_v57, %v7523_v31 }
 0x963   : > { %v4697_v36 = vadd.f32 %v4696_v13, %v4695_v11  ;;  %v4614_v24 = vrot.slane %v4613_v16, 2  ;;  %v4581_v1 = vadd.f32 %v5645_v7, %v7520_v32 }
 0x964   : > { %v4704_v17 = vadd.f32 %v4703_v10, %v4702_v23  ;;  %v4621_v49 = vrot.slane %v4620_v30, 2  ;;  %v4582_v37 = vadd.f32 %v5646_v41, %v7526_v21 }
 0x965   : > { %v4698_v28 = vrot.slane %v4697_v36, 1  ;;  %v4615_v27 = vadd.f32 %v4614_v24, %v4613_v16  ;;  %v4625_v56 = vadd.f32 %v4581_v1, %v4579_v54 }
 0x966   : > { %v4705_v55 = vrot.slane %v4704_v17, 1  ;;  %v4622_v48 = vadd.f32 %v4621_v49, %v4620_v30  ;;  %v4632_v52 = vadd.f32 %v4582_v37, %v4580_v42 }
 0x967   : > { %v4699_v14 = vadd.f32 %v4698_v28, %v4697_v36  ;;  %v4616_v35 = vrot.slane %v4615_v27, 1  ;;  %v4626_v46 = vrot.slane %v4625_v56, 4 }
 0x968   : > { %v4706_v40 = vadd.f32 %v4705_v55, %v4704_v17  ;;  %v4623_v61 = vrot.slane %v4622_v48, 1  ;;  %v4633_v51 = vrot.slane %v4632_v52, 4 }
 0x969   : > { %v4737_v2 = vmul.f32 0.0625, %v4699_v14  ;;  %v4617_v32 = vadd.f32 %v4616_v35, %v4615_v27  ;;  %v4627_v3 = vadd.f32 %v4626_v46, %v4625_v56 }
 0x96a   : > { %v4738_v47 = vmul.f32 0.0625, %v4706_v40  ;;  %v4624_v43 = vadd.f32 %v4623_v61, %v4622_v48  ;;  %v4634_v31 = vadd.f32 %v4633_v51, %v4632_v52 }
 0x96b   : > { %v4745_v50 = vadd.f32 1e-05, %v4737_v2  ;;  %v4643_v21 = vmul.f32 0.0625, %v4617_v32  ;;  %v4628_v45 = vrot.slane %v4627_v3, 2 }
 0x96c   : > { %v4746_v44 = vadd.f32 1e-05, %v4738_v47  ;;  %v4644_v58 = vmul.f32 0.0625, %v4624_v43  ;;  %v4635_v25 = vrot.slane %v4634_v31, 2 }
 0x96d   : > { %6165 = vrsqrt.f32 %v4745_v50  ;;  %v7692_v26 = vsub.f32 %v4575_v18, %v4643_v21  ;;  %v7694_v5 = vsub.f32 %v4577_v59, %v4643_v21  ;;  %v4629_v8 = vadd.f32 %v4628_v45, %v4627_v3 }
 0x96e   : > { %6167 = vrsqrt.f32 %v4746_v44  ;;  %v7696_v62 = vsub.f32 %v4576_v0, %v4644_v58  ;;  %v7698_v29 = vsub.f32 %v4578_v12, %v4644_v58  ;;  %v4636_v19 = vadd.f32 %v4635_v25, %v4634_v31 }
 0x96f   : > { %v4671_v9 = vmul.f32 %v7692_v26, %v7692_v26  ;;  %v4673_v4 = vmul.f32 %v7694_v5, %v7694_v5  ;;  %v4630_v22 = vrot.slane %v4629_v8, 1 }
 0x970   : > { %v4672_v18 = vmul.f32 %v7696_v62, %v7696_v62  ;;  %v4674_v59 = vmul.f32 %v7698_v29, %v7698_v29  ;;  %v4637_v11 = vrot.slane %v4636_v19, 1 }
 0x971   : > { %v4707_v63 = vadd.f32 %v4673_v4, %v4671_v9  ;;  %v4631_v0 = vadd.f32 %v4630_v22, %v4629_v8 }
 0x972   : > { %v4714_v34 = vadd.f32 %v4674_v59, %v4672_v18  ;;  %v4638_v12 = vadd.f32 %v4637_v11, %v4636_v19 }
 0x973   : > { %v4708_v33 = vrot.slane %v4707_v63, 4  ;;  %v4645_v23 = vmul.f32 0.0625, %v4631_v0 }
 0x974   : > { %v4715_v6 = vrot.slane %v4714_v34, 4  ;;  %v4646_v57 = vmul.f32 0.0625, %v4638_v12  ;;  %v7974_v12 = vld [vmem:[#allocation13_spill] sm:$0xff] (!%p5182_p5) }
 0x975   : > { %v4709_v15 = vadd.f32 %v4708_v33, %v4707_v63  ;;  %v7708_v13 = vsub.f32 %v4579_v54, %v4645_v23  ;;  %v7710_v16 = vsub.f32 %v4581_v1, %v4645_v23  ;;  %4819 = vst.msk [vmem:[#allocation3 + $0x8] sm:$0xff] (!%p5182_p5), %vm2094_vm1, %v7974_v12  ;;  %v7975_v33 = vld [vmem:[#allocation14_spill] sm:$0xff] (!%p5182_p5)  ;;  %v7976_v23 = vld [vmem:[#allocation15_spill] sm:$0xff] (!%p5182_p5) }
 0x976   : > { %v4716_v7 = vadd.f32 %v4715_v6, %v4714_v34  ;;  %v7712_v60 = vsub.f32 %v4580_v42, %v4646_v57  ;;  %v7714_v10 = vsub.f32 %v4582_v37, %v4646_v57  ;;  %v7973_v34 = vld [vmem:[#allocation12_spill] sm:$0xff] (!%p5182_p5)  ;;  %4820 = vst.msk [vmem:[#allocation3 + $0x10] sm:$0xff] (!%p5182_p5), %vm2094_vm1, %v7975_v33  ;;  %4821 = vst.msk [vmem:[#allocation3 + $0x18] sm:$0xff] (!%p5182_p5), %vm2094_vm1, %v7976_v23  ;;  %v7978_v57 = vld [vmem:[#allocation17_spill] sm:$0xff] (!%p5182_p5) }
 0x977   : > { %v6166_v30 = vpop.eup %6165  ;;  %v4710_v41 = vrot.slane %v4709_v15, 2  ;;  %v4675_v36 = vmul.f32 %v7708_v13, %v7708_v13  ;;  %v4677_v24 = vmul.f32 %v7710_v16, %v7710_v16  ;;  %4818 = vst.msk [vmem:[#allocation3] sm:$0xff] (!%p5182_p5), %vm2094_vm1, %v7973_v34  ;;  %v7977_v6 = vld [vmem:[#allocation16_spill] sm:$0xff] (!%p5182_p5)  ;;  %4823 = vst.msk [vmem:[#allocation3 + $0x28] sm:$0xff] (!%p5182_p5), %vm2094_vm1, %v7978_v57 }
 0x978   : > { %v6168_v17 = vpop.eup %6167  ;;  %v4763_v49 = vmul.f32 %v6166_v30, %v7660_v20  ;;  %v4765_v54 = vmul.f32 %v6166_v30, %v7662_v39  ;;  %v4717_v1 = vrot.slane %v4716_v7, 2  ;;  %v4676_v42 = vmul.f32 %v7712_v60, %v7712_v60  ;;  %4822 = vst.msk [vmem:[#allocation3 + $0x20] sm:$0xff] (!%p5182_p5), %vm2094_vm1, %v7977_v6 }
 0x979   : > { %v4764_v37 = vmul.f32 %v6168_v17, %v7665_v38  ;;  %v4766_v28 = vmul.f32 %v6168_v17, %v7667_v53  ;;  %v4711_v27 = vadd.f32 %v4710_v41, %v4709_v15  ;;  %v4721_v56 = vadd.f32 %v4677_v24, %v4675_v36  ;;  %v7979_v15 = vld [vmem:[#allocation18_spill] sm:$0xff] (!%p5182_p5) }
 0x97a   : > { %4779 = vst [vmem:[#allocation2 + $0x20] sm:$0xff] %v4763_v49  ;;  %4781 = vst [vmem:[#allocation2 + $0x30] sm:$0xff] %v4765_v54  ;;  %v4718_v20 = vadd.f32 %v4717_v1, %v4716_v7  ;;  %v4678_v39 = vmul.f32 %v7714_v10, %v7714_v10 }
 0x97b   : > { %4795 = vst [vmem:[%s7972_s2 + $0x20] sm:$0xff] %v4763_v49  ;;  %4797 = vst [vmem:[%s7972_s2 + $0x30] sm:$0xff] %v4765_v54  ;;  %v4712_v38 = vrot.slane %v4711_v27, 1  ;;  %v4722_v53 = vrot.slane %v4721_v56, 4 }
 0x97c   : > { %4780 = vst [vmem:[#allocation2 + $0x28] sm:$0xff] %v4764_v37  ;;  %4782 = vst [vmem:[#allocation2 + $0x38] sm:$0xff] %v4766_v28  ;;  %v4719_v55 = vrot.slane %v4718_v20, 1  ;;  %v4728_v48 = vadd.f32 %v4678_v39, %v4676_v42 }
 0x97d   : > { %4796 = vst [vmem:[%s7972_s2 + $0x28] sm:$0xff] %v4764_v37  ;;  %4798 = vst [vmem:[%s7972_s2 + $0x38] sm:$0xff] %v4766_v28  ;;  %v4713_v52 = vadd.f32 %v4712_v38, %v4711_v27  ;;  %v4723_v14 = vadd.f32 %v4722_v53, %v4721_v56 }
 0x97e   : > { %v4720_v35 = vadd.f32 %v4719_v55, %v4718_v20  ;;  %v4729_v46 = vrot.slane %v4728_v48, 4  ;;  %4824 = vst.msk [vmem:[#allocation3 + $0x30] sm:$0xff] (!%p5182_p5), %vm2094_vm1, %v7979_v15 }
 0x97f   : > { %v4739_v40 = vmul.f32 0.0625, %v4713_v52  ;;  %v4724_v61 = vrot.slane %v4723_v14, 2 }
 0x980   : > { %v4740_v51 = vmul.f32 0.0625, %v4720_v35  ;;  %v4730_v2 = vadd.f32 %v4729_v46, %v4728_v48 }
 0x981   : > { %v4747_v32 = vadd.f32 1e-05, %v4739_v40  ;;  %v4725_v3 = vadd.f32 %v4724_v61, %v4723_v14 }
 0x982   : > { %v4748_v47 = vadd.f32 1e-05, %v4740_v51  ;;  %v4731_v43 = vrot.slane %v4730_v2, 2 }
 0x983   : > { %6169 = vrsqrt.f32 %v4747_v32  ;;  %v4726_v31 = vrot.slane %v4725_v3, 1 }
 0x984   : > { %6171 = vrsqrt.f32 %v4748_v47  ;;  %v4732_v50 = vadd.f32 %v4731_v43, %v4730_v2 }
 0x985   : > { %v4727_v21 = vadd.f32 %v4726_v31, %v4725_v3 }
 0x986   : > { %v4733_v45 = vrot.slane %v4732_v50, 1 }
 0x987   : > { %v4741_v44 = vmul.f32 0.0625, %v4727_v21 }
 0x988   : > { %v4734_v58 = vadd.f32 %v4733_v45, %v4732_v50 }
 0x989   : > { %v4749_v25 = vadd.f32 1e-05, %v4741_v44 }
 0x98a   : > { %v4742_v8 = vmul.f32 0.0625, %v4734_v58 }
 0x98b   : > { %6173 = vrsqrt.f32 %v4749_v25 }
 0x98c   : > { %v4750_v19 = vadd.f32 1e-05, %v4742_v8 }
 0x98d   : > { %v6170_v9 = vpop.eup %6169 }
 0x98e   : > { %v6172_v4 = vpop.eup %6171  ;;  %v4767_v22 = vmul.f32 %v6170_v9, %v7692_v26  ;;  %v4769_v18 = vmul.f32 %v6170_v9, %v7694_v5  ;;  %6175 = vrsqrt.f32 %v4750_v19 }
 0x98f   : > { %v4768_v59 = vmul.f32 %v6172_v4, %v7696_v62  ;;  %v4770_v11 = vmul.f32 %v6172_v4, %v7698_v29 }
 0x990   : > { %4783 = vst [vmem:[#allocation2 + $0x40] sm:$0xff] %v4767_v22  ;;  %4785 = vst [vmem:[#allocation2 + $0x50] sm:$0xff] %v4769_v18 }
 0x991   : > { %4799 = vst [vmem:[%s7972_s2 + $0x40] sm:$0xff] %v4767_v22  ;;  %4801 = vst [vmem:[%s7972_s2 + $0x50] sm:$0xff] %v4769_v18 }
 0x992   : > { %4784 = vst [vmem:[#allocation2 + $0x48] sm:$0xff] %v4768_v59  ;;  %4786 = vst [vmem:[#allocation2 + $0x58] sm:$0xff] %v4770_v11 }
 0x993   : > { %4800 = vst [vmem:[%s7972_s2 + $0x48] sm:$0xff] %v4768_v59  ;;  %4802 = vst [vmem:[%s7972_s2 + $0x58] sm:$0xff] %v4770_v11 }
 0x995   : > { %v6174_v26 = vpop.eup %6173 }
 0x996   : > { %v4771_v5 = vmul.f32 %v6174_v26, %v7708_v13  ;;  %v4773_v62 = vmul.f32 %v6174_v26, %v7710_v16  ;;  %4817 = sbr.rel (%p5182_p5) target bundleno = 2461 (0x99d), region = 92  ;;  %v7980_v13 = vld [vmem:[#allocation19_spill] sm:$0xff] (!%p5182_p5) }
 0x997   : > { %4825 = vst.msk [vmem:[#allocation3 + $0x38] sm:$0xff] (!%p5182_p5), %vm2094_vm1, %v7980_v13 }
 0x998   : > { %v6176_v29 = vpop.eup %6175  ;;  %4787 = vst [vmem:[#allocation2 + $0x60] sm:$0xff] %v4771_v5  ;;  %4789 = vst [vmem:[#allocation2 + $0x70] sm:$0xff] %v4773_v62 }
 0x999   : > { %4803 = vst [vmem:[%s7972_s2 + $0x60] sm:$0xff] %v4771_v5  ;;  %4805 = vst [vmem:[%s7972_s2 + $0x70] sm:$0xff] %v4773_v62  ;;  %v4772_v63 = vmul.f32 %v6176_v29, %v7712_v60  ;;  %v4774_v0 = vmul.f32 %v6176_v29, %v7714_v10 }
 0x99b   : > { %4788 = vst [vmem:[#allocation2 + $0x68] sm:$0xff] %v4772_v63  ;;  %4790 = vst [vmem:[#allocation2 + $0x78] sm:$0xff] %v4774_v0 }
 0x99c   : > { %4804 = vst [vmem:[%s7972_s2 + $0x68] sm:$0xff] %v4772_v63  ;;  %4806 = vst [vmem:[%s7972_s2 + $0x78] sm:$0xff] %v4774_v0 }
 0x99d PF: > { %p5448_p6 = scmp.ne.s32.totalorder %s6267_s27, 1 }
 0x99e   : > { %v7981_v16 = vld [vmem:[#allocation12_spill] sm:$0xff] (!%p5448_p6)  ;;  %v7982_v7 = vld [vmem:[#allocation13_spill] sm:$0xff] (!%p5448_p6)  ;;  %v7983_v60 = vld [vmem:[#allocation14_spill] sm:$0xff] (!%p5448_p6) }
 0x99f   : > { %4829 = sbr.rel (%p5448_p6) target bundleno = 2470 (0x9a6), region = 96  ;;  %4830 = vst.msk [vmem:[#allocation5] sm:$0xff] (!%p5448_p6), %vm2094_vm1, %v7981_v16  ;;  %4831 = vst.msk [vmem:[#allocation5 + $0x8] sm:$0xff] (!%p5448_p6), %vm2094_vm1, %v7982_v7  ;;  %v7984_v10 = vld [vmem:[#allocation15_spill] sm:$0xff] (!%p5448_p6)  ;;  %v7985_v30 = vld [vmem:[#allocation16_spill] sm:$0xff] (!%p5448_p6) }
 0x9a0   : > { %4832 = vst.msk [vmem:[#allocation5 + $0x10] sm:$0xff] (!%p5448_p6), %vm2094_vm1, %v7983_v60  ;;  %4833 = vst.msk [vmem:[#allocation5 + $0x18] sm:$0xff] (!%p5448_p6), %vm2094_vm1, %v7984_v10  ;;  %v7986_v41 = vld [vmem:[#allocation17_spill] sm:$0xff] (!%p5448_p6)  ;;  %v7987_v36 = vld [vmem:[#allocation18_spill] sm:$0xff] (!%p5448_p6) }
 0x9a1   : > { %4834 = vst.msk [vmem:[#allocation5 + $0x20] sm:$0xff] (!%p5448_p6), %vm2094_vm1, %v7985_v30  ;;  %4835 = vst.msk [vmem:[#allocation5 + $0x28] sm:$0xff] (!%p5448_p6), %vm2094_vm1, %v7986_v41  ;;  %v7988_v24 = vld [vmem:[#allocation19_spill] sm:$0xff] (!%p5448_p6) }
 0x9a2   : > { %4836 = vst.msk [vmem:[#allocation5 + $0x30] sm:$0xff] (!%p5448_p6), %vm2094_vm1, %v7987_v36  ;;  %4837 = vst.msk [vmem:[#allocation5 + $0x38] sm:$0xff] (!%p5448_p6), %vm2094_vm1, %v7988_v24 }
 0x9a6 PF: > { %s7989_s27 = sld [smem:[#allocation10_spill]]  ;;  %s6279_s20 = smov [#allocation3]  }
 0x9a7   : > { %s4858_s8 = sshll.u32 %s6279_s20, 4  ;;  %s4859_s8 = int_to_ptr.vmem [resolvable:$true] %s4858_s8 }
 0x9a8   : > { %s6193_s28 = scalar_lea.vmem %s4859_s8, 1024  ;;  %p6200_p11 = scmp.lt.s32.totalorder %s4859_s8, %s4859_s8 }
 0x9a9   : > { %p6194_p8 = scmp.ne.s32.totalorder %s4859_s8, %s6193_s28  ;;  %p6201_p12 = scmp.lt.s32.totalorder %s6193_s28, %s6193_s28 }
 0x9ab   : > { %p6202_p13 = por %p6201_p12, %p6200_p11 }
 0x9ac   : > { %s7990_s1 = sadd.s32 4294967295, %s7989_s27  }
 0x9ad   : > { %p7809_p7 = scmp.eq.s32.totalorder %s7990_s1, 1 }
 0x9af   : > { %p6195_p9 = pnand %p6194_p8, %p7809_p7 }
 0x9b1   : > { %p6196_p10 = pneg %p6195_p9 }
 0x9b3   : > { %p6203_p0 = pnand %p6202_p13, %p6196_p10 }
 0x9b5   : > { %6206 = shalt.err (!%p6203_p0)
}
 0x9b6   : > { %s7992_s16 = sld [smem:[#allocation43_spill]] }
 0x9bc   : > { %s6207_s23 = scalar_lea.hbm %s7992_s16, 1024 }
 0x9bd   : > { %p6208_p1 = scmp.ne.s32.totalorder %s7992_s16, %s6207_s23  ;;  %p6213_p4 = scmp.lt.u32.totalorder %s6207_s23, %s7992_s16 }
 0x9bf   : > { %p6209_p2 = pnand %p6208_p1, %p7809_p7 }
 0x9c1   : > { %p6210_p3 = pneg %p6209_p2 }
 0x9c3   : > { %p6215_p5 = pnand %p6213_p4, %p6210_p3 }
 0x9c5   : > { %6218 = shalt.err (!%p6215_p5)
}
 0x9c6   : > { %s6280_s25 = smov 128   ;;  %s6281_s17 = smov 8  }
 0x9c7   : > { %5656 = dma.vmem_to_hbm [thread:$0]  (%p7809_p7), %s4859_s8, 1024, %s7992_s16, [#allocation4], %s6280_s25, %s6280_s25, %s6281_s17  }
 0x9c8   : > { %s6282_s27 = smov [#allocation5]  }
 0x9c9   : > { %s4875_s1 = sshll.u32 %s6282_s27, 4  ;;  %s4876_s1 = int_to_ptr.vmem [resolvable:$true] %s4875_s1 }
 0x9ca   : > { %s6219_s20 = scalar_lea.vmem %s4876_s1, 1024  ;;  %p6226_p10 = scmp.lt.s32.totalorder %s4876_s1, %s4876_s1 }
 0x9cb   : > { %p6220_p6 = scmp.ne.s32.totalorder %s4876_s1, %s6219_s20  ;;  %p6227_p11 = scmp.lt.s32.totalorder %s6219_s20, %s6219_s20 }
 0x9cd   : > { %p6221_p8 = pnand %p6220_p6, %p7809_p7  ;;  %p6228_p12 = por %p6227_p11, %p6226_p10 }
 0x9cf   : > { %p6222_p9 = pneg %p6221_p8 }
 0x9d1   : > { %p6229_p13 = pnand %p6228_p12, %p6222_p9 }
 0x9d3   : > { %6232 = shalt.err (!%p6229_p13)
}
 0x9d4   : > { %s7993_s18 = sld [smem:[#allocation44_spill]] }
 0x9da   : > { %s6233_s23 = scalar_lea.hbm %s7993_s18, 1024 }
 0x9db   : > { %p6234_p0 = scmp.ne.s32.totalorder %s7993_s18, %s6233_s23  ;;  %p6239_p3 = scmp.lt.u32.totalorder %s6233_s23, %s7993_s18 }
 0x9dd   : > { %p6235_p1 = pnand %p6234_p0, %p7809_p7 }
 0x9df   : > { %p6236_p2 = pneg %p6235_p1 }
 0x9e1   : > { %p6241_p4 = pnand %p6239_p3, %p6236_p2 }
 0x9e3   : > { %6244 = shalt.err (!%p6241_p4)
}
 0x9e4   : > { %5658 = dma.vmem_to_hbm [thread:$0]  (%p7809_p7), %s4876_s1, 1024, %s7993_s18, [#allocation6], %s6280_s25, %s6280_s25, %s6281_s17  }
 0x9e5   : > { %6258 = dma.done.wait (%p7809_p7), [#allocation4], 1024  }
 0x9e6   : > { %6260 = vsyncadd (%p7809_p7), [#allocation4], 4294966272 }
 0x9e7   : > { %6262 = dma.done.wait (%p7809_p7), [#allocation6], 1024  }
 0x9e8   : > { %6264 = vsyncadd (%p7809_p7), [#allocation6], 4294966272 }
 0x9e9 PF: > { %s7994_s4 = sld [smem:[#allocation10_spill]]  ;;  %s7995_s27 = sld [smem:[#allocation9_spill]] }
 0x9ea   : > { %s7996_s28 = sld [smem:[#allocation11_spill]] }
 0x9ef   : > { %s31_s29 = sadd.s32 1, %s7994_s4  }
 0x9f0   : > { %p28_p5 = scmp.ge.s32.totalorder %s31_s29, 4  }
 0x9f2   :  { %30 = sbr.rel (!%p28_p5) target bundleno = 15 (0xf), region = 190 }
 0x9f9   :  { %4904 = vsyncpa [#allocation4], 1 }
 0x9fa   :  { %4906 = vsyncpa [#allocation4 + $0x1], 1 }
 0x9fb   :  { %4907 = vsyncpa [#allocation6], 1 }

</bundles_post_ra>
